<compile_context>
chip_gen: v7x
topology: tpu7x:2x2x1
jax: 0.10.0
libtpu: 0.0.40
codegen_flags: <defaults>
</compile_context>

<pallas_src>
import functools

import jax
import jax.numpy as jnp
from jax import lax
from jax.experimental import pallas as pl
from jax.experimental.pallas import tpu as pltpu


K = 5                 # effective (folded) depthwise kernel size
MAX_PAD = K // 2      # 2
BAND = 8              # output rows per accumulator band (one sublane group)


def _msconv_kernel(w_ref, x_ref, o_ref, xp_ref, *, ct, h, w):
    """One (batch, channel-tile) grid step.

    w_ref  : (25, C)         folded depthwise tap weights, SMEM (f32)
    x_ref  : (1, CT, H, W)   input block, VMEM
    o_ref  : (1, CT, H, W)   output block, VMEM
    xp_ref : (CT, H+4, W+4)  zero-padded per-channel scratch, VMEM
    """
    ct_idx = pl.program_id(1)
    wp = w + 2 * MAX_PAD
    nb = h // BAND            # number of full 8-row bands (static)
    rem = h - nb * BAND       # trailing partial band height (static)

    def channel_body(c, carry):
        c_g = ct_idx * ct + c                       # global channel index

        # ---- fused zero padding ---------------------------------------
        # Lane padding is built value-side (lane concat, RoPE-style) and the
        # result is stored full-lane-width at a sublane offset; top/bottom
        # halo rows are plain zero stores.  No unaligned lane-offset stores.
        xch = x_ref[0, c]                           # (H, W)
        zcol = jnp.zeros((h, MAX_PAD), xch.dtype)
        zrow = jnp.zeros((MAX_PAD, wp), xch.dtype)
        xp_ref[c, 0:MAX_PAD, :] = zrow
        xp_ref[c, MAX_PAD + h:h + 2 * MAX_PAD, :] = zrow
        xp_ref[c, MAX_PAD:MAX_PAD + h, :] = jnp.concatenate(
            [zcol, xch, zcol], axis=1)

        # 25 per-channel tap weights as SMEM scalars (identity + 1x1 + 3x3
        # already folded into the 5x5 by the wrapper).
        taps = [w_ref[t, c_g] for t in range(K * K)]

        def do_band(y0, bh):
            acc = jnp.zeros((bh, w), jnp.float32)
            for dy in range(K):
                row = xp_ref[c, pl.ds(y0 + dy, bh), :].astype(jnp.float32)
                for dx in range(K):
                    acc = acc + row[:, dx:dx + w] * taps[dy * K + dx]
            o_ref[0, c, pl.ds(y0, bh), :] = acc.astype(o_ref.dtype)

        if nb > 0:
            def band_step(bi, bcarry):
                do_band(pl.multiple_of(bi * BAND, BAND), BAND)
                return bcarry
            lax.fori_loop(0, nb, band_step, 0, unroll=(nb <= 4))
        if rem > 0:
            do_band(nb * BAND, rem)

        return carry

    lax.fori_loop(0, ct, channel_body, 0, unroll=(ct <= 8))


def _fold_weights(w1, w3, w5):
    """identity + dw1 + dw3 + dw5  ->  one effective (25, C) 5x5 weight."""
    c = w5.shape[-1]
    w = w5.astype(jnp.float32)
    w = w.at[1:4, 1:4, :].add(w3.astype(jnp.float32))
    w = w.at[2, 2, :].add(w1[0, 0, :].astype(jnp.float32) + 1.0)
    return w.reshape(K * K, c)


def _pick_channel_tile(c, h, w, esize, budget_bytes=1 << 20):
    """Largest divisor of C whose (CT, H, W) block stays under the budget."""
    best = 1
    for ct in range(1, c + 1):
        if c % ct == 0 and ct * h * w * esize <= budget_bytes:
            best = ct
    return best


@jax.jit
def msconv(x_nchw, w1, w3, w5):
    """x_nchw: (B, C, H, W); w_k: (k, k, C) depthwise weights (groups=C).

    Returns x + dw1(x) + dw3(x) + dw5(x)  (NCHW), matching MSConv.forward.
    """
    b, c, h, w = x_nchw.shape
    w_eff = _fold_weights(w1, w3, w5)                      # (25, C), f32

    ct = _pick_channel_tile(c, h, w, x_nchw.dtype.itemsize)
    n_ct = c // ct

    kernel = functools.partial(_msconv_kernel, ct=ct, h=h, w=w)

    return pl.pallas_call(
        kernel,
        out_shape=jax.ShapeDtypeStruct((b, c, h, w), x_nchw.dtype),
        grid=(b, n_ct),
        in_specs=[
            pl.BlockSpec(memory_space=pltpu.MemorySpace.SMEM),      # weights
            pl.BlockSpec((1, ct, h, w), lambda bi, ci: (bi, ci, 0, 0)),
        ],
        out_specs=pl.BlockSpec((1, ct, h, w), lambda bi, ci: (bi, ci, 0, 0)),
        scratch_shapes=[
            pltpu.VMEM((ct, h + 2 * MAX_PAD, w + 2 * MAX_PAD), x_nchw.dtype),
        ],
        compiler_params=pltpu.CompilerParams(
            dimension_semantics=("parallel", "parallel")),
    )(w_eff, x_nchw)


def _reference(x_nchw, w1, w3, w5):
    """Pure-JAX reference using lax.conv_general_dilated (depthwise)."""
    c = x_nchw.shape[1]
    out = x_nchw.astype(jnp.float32)
    for wk, k in ((w1, 1), (w3, 3), (w5, 5)):
        kern = wk.astype(jnp.float32)[:, :, None, :]       # (k, k, 1, C) HWIO
        y = lax.conv_general_dilated(
            x_nchw.astype(jnp.float32), kern,
            window_strides=(1, 1), padding=[(k // 2, k // 2)] * 2,
            dimension_numbers=("NCHW", "HWIO", "NCHW"),
            feature_group_count=c)
        out = out + y
    return out.astype(x_nchw.dtype)


if __name__ == "__main__":
    key = jax.random.PRNGKey(0)
    B, C, H, W = 2, 4, 16, 16
    kx, k1, k3, k5 = jax.random.split(key, 4)

    x = jax.random.normal(kx, (B, C, H, W), dtype=jnp.float32)
    # Depthwise weights stored as (k, k, C).
    w1 = jax.random.normal(k1, (1, 1, C), dtype=jnp.float32) * 0.1
    w3 = jax.random.normal(k3, (3, 3, C), dtype=jnp.float32) * 0.1
    w5 = jax.random.normal(k5, (5, 5, C), dtype=jnp.float32) * 0.1

    out = jax.block_until_ready(msconv(x, w1, w3, w5))
    ref = _reference(x, w1, w3, w5)

    assert out.shape == (B, C, H, W)
    assert jnp.allclose(out, ref, atol=1e-4, rtol=1e-4), "mismatch vs reference"

    print("KERNEL_OK")
</pallas_src>

<mosaic_0001>
module attributes {stable_mosaic.version = 11 : i64} {
  func.func @_msconv_kernel(%arg0: i32, %arg1: i32, %arg2: memref<25x4xf32, #tpu.memory_space<smem>>, %arg3: memref<1x4x16x16xf32, #tpu.memory_space<vmem>>, %arg4: memref<1x4x16x16xf32, #tpu.memory_space<vmem>>, %arg5: memref<4x20x20xf32, #tpu.memory_space<vmem>>) attributes {dimension_semantics = [#tpu.dimension_semantics<parallel>, #tpu.dimension_semantics<parallel>], iteration_bounds = array<i64: 2, 1>, scalar_prefetch = 0 : i64, scratch_operands = 1 : i64, tpu.core_type = #tpu.core_type<tc>, window_params = [{transform_indices = @transform_0, window_bounds = array<i64: 25, 4>}, {transform_indices = @transform_1, window_bounds = array<i64: 1, 4, 16, 16>}, {transform_indices = @transform_2, window_bounds = array<i64: 1, 4, 16, 16>}]} {
    %c0_i32 = arith.constant 0 : i32
    %c4_i32 = arith.constant 4 : i32
    %0 = arith.muli %arg1, %c4_i32 : i32
    %1 = arith.addi %0, %c0_i32 : i32
    %c0 = arith.constant 0 : index
    %2 = arith.index_cast %c0_i32 : i32 to index
    %c0_0 = arith.constant 0 : index
    %c0_1 = arith.constant 0 : index
    %3 = vector.load %arg3[%c0, %2, %c0_0, %c0_1] : memref<1x4x16x16xf32, #tpu.memory_space<vmem>>, vector<1x1x16x16xf32>
    %4 = vector.shape_cast %3 : vector<1x1x16x16xf32> to vector<16x16xf32>
    %cst = arith.constant 0.000000e+00 : f32
    %5 = vector.broadcast %cst : f32 to vector<16x2xf32>
    %cst_2 = arith.constant 0.000000e+00 : f32
    %6 = vector.broadcast %cst_2 : f32 to vector<2x20xf32>
    %7 = arith.index_cast %c0_i32 : i32 to index
    %c0_3 = arith.constant 0 : index
    %c0_4 = arith.constant 0 : index
    %8 = vector.load %arg5[%7, %c0_3, %c0_4] : memref<4x20x20xf32, #tpu.memory_space<vmem>>, vector<1x2x20xf32>
    %9 = vector.shape_cast %8 : vector<1x2x20xf32> to vector<2x20xf32>
    %10 = vector.shape_cast %6 : vector<2x20xf32> to vector<1x2x20xf32>
    tpu.vector_store %arg5[%7, %c0_3, %c0_4], %10 {strides = array<i32>} : memref<4x20x20xf32, #tpu.memory_space<vmem>>, vector<1x2x20xf32>,
    %11 = arith.index_cast %c0_i32 : i32 to index
    %c18 = arith.constant 18 : index
    %c0_5 = arith.constant 0 : index
    %12 = vector.load %arg5[%11, %c18, %c0_5] : memref<4x20x20xf32, #tpu.memory_space<vmem>>, vector<1x2x20xf32>
    %13 = vector.shape_cast %12 : vector<1x2x20xf32> to vector<2x20xf32>
    %14 = vector.shape_cast %6 : vector<2x20xf32> to vector<1x2x20xf32>
    tpu.vector_store %arg5[%11, %c18, %c0_5], %14 {strides = array<i32>} : memref<4x20x20xf32, #tpu.memory_space<vmem>>, vector<1x2x20xf32>,
    %15 = tpu.concatenate %5, %4, %5 in 1 : vector<16x2xf32>, vector<16x16xf32>, vector<16x2xf32> -> vector<16x20xf32>
    %16 = arith.index_cast %c0_i32 : i32 to index
    %c2 = arith.constant 2 : index
    %c0_6 = arith.constant 0 : index
    %17 = vector.load %arg5[%16, %c2, %c0_6] : memref<4x20x20xf32, #tpu.memory_space<vmem>>, vector<1x16x20xf32>
    %18 = vector.shape_cast %17 : vector<1x16x20xf32> to vector<16x20xf32>
    %19 = vector.shape_cast %15 : vector<16x20xf32> to vector<1x16x20xf32>
    tpu.vector_store %arg5[%16, %c2, %c0_6], %19 {strides = array<i32>} : memref<4x20x20xf32, #tpu.memory_space<vmem>>, vector<1x16x20xf32>,
    %c0_7 = arith.constant 0 : index
    %20 = arith.index_cast %1 : i32 to index
    %21 = memref.load %arg2[%c0_7, %20] : memref<25x4xf32, #tpu.memory_space<smem>>
    %c1 = arith.constant 1 : index
    %22 = arith.index_cast %1 : i32 to index
    %23 = memref.load %arg2[%c1, %22] : memref<25x4xf32, #tpu.memory_space<smem>>
    %c2_8 = arith.constant 2 : index
    %24 = arith.index_cast %1 : i32 to index
    %25 = memref.load %arg2[%c2_8, %24] : memref<25x4xf32, #tpu.memory_space<smem>>
    %c3 = arith.constant 3 : index
    %26 = arith.index_cast %1 : i32 to index
    %27 = memref.load %arg2[%c3, %26] : memref<25x4xf32, #tpu.memory_space<smem>>
    %c4 = arith.constant 4 : index
    %28 = arith.index_cast %1 : i32 to index
    %29 = memref.load %arg2[%c4, %28] : memref<25x4xf32, #tpu.memory_space<smem>>
    %c5 = arith.constant 5 : index
    %30 = arith.index_cast %1 : i32 to index
    %31 = memref.load %arg2[%c5, %30] : memref<25x4xf32, #tpu.memory_space<smem>>
    %c6 = arith.constant 6 : index
    %32 = arith.index_cast %1 : i32 to index
    %33 = memref.load %arg2[%c6, %32] : memref<25x4xf32, #tpu.memory_space<smem>>
    %c7 = arith.constant 7 : index
    %34 = arith.index_cast %1 : i32 to index
    %35 = memref.load %arg2[%c7, %34] : memref<25x4xf32, #tpu.memory_space<smem>>
    %c8 = arith.constant 8 : index
    %36 = arith.index_cast %1 : i32 to index
    %37 = memref.load %arg2[%c8, %36] : memref<25x4xf32, #tpu.memory_space<smem>>
    %c9 = arith.constant 9 : index
    %38 = arith.index_cast %1 : i32 to index
    %39 = memref.load %arg2[%c9, %38] : memref<25x4xf32, #tpu.memory_space<smem>>
    %c10 = arith.constant 10 : index
    %40 = arith.index_cast %1 : i32 to index
    %41 = memref.load %arg2[%c10, %40] : memref<25x4xf32, #tpu.memory_space<smem>>
    %c11 = arith.constant 11 : index
    %42 = arith.index_cast %1 : i32 to index
    %43 = memref.load %arg2[%c11, %42] : memref<25x4xf32, #tpu.memory_space<smem>>
    %c12 = arith.constant 12 : index
    %44 = arith.index_cast %1 : i32 to index
    %45 = memref.load %arg2[%c12, %44] : memref<25x4xf32, #tpu.memory_space<smem>>
    %c13 = arith.constant 13 : index
    %46 = arith.index_cast %1 : i32 to index
    %47 = memref.load %arg2[%c13, %46] : memref<25x4xf32, #tpu.memory_space<smem>>
    %c14 = arith.constant 14 : index
    %48 = arith.index_cast %1 : i32 to index
    %49 = memref.load %arg2[%c14, %48] : memref<25x4xf32, #tpu.memory_space<smem>>
    %c15 = arith.constant 15 : index
    %50 = arith.index_cast %1 : i32 to index
    %51 = memref.load %arg2[%c15, %50] : memref<25x4xf32, #tpu.memory_space<smem>>
    %c16 = arith.constant 16 : index
    %52 = arith.index_cast %1 : i32 to index
    %53 = memref.load %arg2[%c16, %52] : memref<25x4xf32, #tpu.memory_space<smem>>
    %c17 = arith.constant 17 : index
    %54 = arith.index_cast %1 : i32 to index
    %55 = memref.load %arg2[%c17, %54] : memref<25x4xf32, #tpu.memory_space<smem>>
    %c18_9 = arith.constant 18 : index
    %56 = arith.index_cast %1 : i32 to index
    %57 = memref.load %arg2[%c18_9, %56] : memref<25x4xf32, #tpu.memory_space<smem>>
    %c19 = arith.constant 19 : index
    %58 = arith.index_cast %1 : i32 to index
    %59 = memref.load %arg2[%c19, %58] : memref<25x4xf32, #tpu.memory_space<smem>>
    %c20 = arith.constant 20 : index
    %60 = arith.index_cast %1 : i32 to index
    %61 = memref.load %arg2[%c20, %60] : memref<25x4xf32, #tpu.memory_space<smem>>
    %c21 = arith.constant 21 : index
    %62 = arith.index_cast %1 : i32 to index
    %63 = memref.load %arg2[%c21, %62] : memref<25x4xf32, #tpu.memory_space<smem>>
    %c22 = arith.constant 22 : index
    %64 = arith.index_cast %1 : i32 to index
    %65 = memref.load %arg2[%c22, %64] : memref<25x4xf32, #tpu.memory_space<smem>>
    %c23 = arith.constant 23 : index
    %66 = arith.index_cast %1 : i32 to index
    %67 = memref.load %arg2[%c23, %66] : memref<25x4xf32, #tpu.memory_space<smem>>
    %c24 = arith.constant 24 : index
    %68 = arith.index_cast %1 : i32 to index
    %69 = memref.load %arg2[%c24, %68] : memref<25x4xf32, #tpu.memory_space<smem>>
    %c0_i32_10 = arith.constant 0 : i32
    %c8_i32 = arith.constant 8 : i32
    %70 = arith.muli %c0_i32_10, %c8_i32 : i32
    %71 = tpu.assume_multiple %70, 8 : i32
    %cst_11 = arith.constant 0.000000e+00 : f32
    %72 = vector.broadcast %cst_11 : f32 to vector<8x16xf32>
    %c0_i32_12 = arith.constant 0 : i32
    %73 = arith.addi %71, %c0_i32_12 : i32
    %74 = arith.index_cast %c0_i32 : i32 to index
    %75 = arith.index_cast %73 : i32 to index
    %c0_13 = arith.constant 0 : index
    %76 = vector.load %arg5[%74, %75, %c0_13] : memref<4x20x20xf32, #tpu.memory_space<vmem>>, vector<1x8x20xf32>
    %77 = vector.shape_cast %76 : vector<1x8x20xf32> to vector<8x20xf32>
    %78 = vector.extract_strided_slice %77 {offsets = [0, 0], sizes = [8, 16], strides = [1, 1]} : vector<8x20xf32> to vector<8x16xf32>
    %79 = vector.broadcast %21 : f32 to vector<8x16xf32>
    %80 = arith.mulf %78, %79 : vector<8x16xf32>
    %81 = arith.addf %72, %80 : vector<8x16xf32>
    %82 = vector.extract_strided_slice %77 {offsets = [0, 1], sizes = [8, 16], strides = [1, 1]} : vector<8x20xf32> to vector<8x16xf32>
    %83 = vector.broadcast %23 : f32 to vector<8x16xf32>
    %84 = arith.mulf %82, %83 : vector<8x16xf32>
    %85 = arith.addf %81, %84 : vector<8x16xf32>
    %86 = vector.extract_strided_slice %77 {offsets = [0, 2], sizes = [8, 16], strides = [1, 1]} : vector<8x20xf32> to vector<8x16xf32>
    %87 = vector.broadcast %25 : f32 to vector<8x16xf32>
    %88 = arith.mulf %86, %87 : vector<8x16xf32>
    %89 = arith.addf %85, %88 : vector<8x16xf32>
    %90 = vector.extract_strided_slice %77 {offsets = [0, 3], sizes = [8, 16], strides = [1, 1]} : vector<8x20xf32> to vector<8x16xf32>
    %91 = vector.broadcast %27 : f32 to vector<8x16xf32>
    %92 = arith.mulf %90, %91 : vector<8x16xf32>
    %93 = arith.addf %89, %92 : vector<8x16xf32>
    %94 = vector.extract_strided_slice %77 {offsets = [0, 4], sizes = [8, 16], strides = [1, 1]} : vector<8x20xf32> to vector<8x16xf32>
    %95 = vector.broadcast %29 : f32 to vector<8x16xf32>
    %96 = arith.mulf %94, %95 : vector<8x16xf32>
    %97 = arith.addf %93, %96 : vector<8x16xf32>
    %c1_i32 = arith.constant 1 : i32
    %98 = arith.addi %71, %c1_i32 : i32
    %99 = arith.index_cast %c0_i32 : i32 to index
    %100 = arith.index_cast %98 : i32 to index
    %c0_14 = arith.constant 0 : index
    %101 = vector.load %arg5[%99, %100, %c0_14] : memref<4x20x20xf32, #tpu.memory_space<vmem>>, vector<1x8x20xf32>
    %102 = vector.shape_cast %101 : vector<1x8x20xf32> to vector<8x20xf32>
    %103 = vector.extract_strided_slice %102 {offsets = [0, 0], sizes = [8, 16], strides = [1, 1]} : vector<8x20xf32> to vector<8x16xf32>
    %104 = vector.broadcast %31 : f32 to vector<8x16xf32>
    %105 = arith.mulf %103, %104 : vector<8x16xf32>
    %106 = arith.addf %97, %105 : vector<8x16xf32>
    %107 = vector.extract_strided_slice %102 {offsets = [0, 1], sizes = [8, 16], strides = [1, 1]} : vector<8x20xf32> to vector<8x16xf32>
    %108 = vector.broadcast %33 : f32 to vector<8x16xf32>
    %109 = arith.mulf %107, %108 : vector<8x16xf32>
    %110 = arith.addf %106, %109 : vector<8x16xf32>
    %111 = vector.extract_strided_slice %102 {offsets = [0, 2], sizes = [8, 16], strides = [1, 1]} : vector<8x20xf32> to vector<8x16xf32>
    %112 = vector.broadcast %35 : f32 to vector<8x16xf32>
    %113 = arith.mulf %111, %112 : vector<8x16xf32>
    %114 = arith.addf %110, %113 : vector<8x16xf32>
    %115 = vector.extract_strided_slice %102 {offsets = [0, 3], sizes = [8, 16], strides = [1, 1]} : vector<8x20xf32> to vector<8x16xf32>
    %116 = vector.broadcast %37 : f32 to vector<8x16xf32>
    %117 = arith.mulf %115, %116 : vector<8x16xf32>
    %118 = arith.addf %114, %117 : vector<8x16xf32>
    %119 = vector.extract_strided_slice %102 {offsets = [0, 4], sizes = [8, 16], strides = [1, 1]} : vector<8x20xf32> to vector<8x16xf32>
    %120 = vector.broadcast %39 : f32 to vector<8x16xf32>
    %121 = arith.mulf %119, %120 : vector<8x16xf32>
    %122 = arith.addf %118, %121 : vector<8x16xf32>
    %c2_i32 = arith.constant 2 : i32
    %123 = arith.addi %71, %c2_i32 : i32
    %124 = arith.index_cast %c0_i32 : i32 to index
    %125 = arith.index_cast %123 : i32 to index
    %c0_15 = arith.constant 0 : index
    %126 = vector.load %arg5[%124, %125, %c0_15] : memref<4x20x20xf32, #tpu.memory_space<vmem>>, vector<1x8x20xf32>
    %127 = vector.shape_cast %126 : vector<1x8x20xf32> to vector<8x20xf32>
    %128 = vector.extract_strided_slice %127 {offsets = [0, 0], sizes = [8, 16], strides = [1, 1]} : vector<8x20xf32> to vector<8x16xf32>
    %129 = vector.broadcast %41 : f32 to vector<8x16xf32>
    %130 = arith.mulf %128, %129 : vector<8x16xf32>
    %131 = arith.addf %122, %130 : vector<8x16xf32>
    %132 = vector.extract_strided_slice %127 {offsets = [0, 1], sizes = [8, 16], strides = [1, 1]} : vector<8x20xf32> to vector<8x16xf32>
    %133 = vector.broadcast %43 : f32 to vector<8x16xf32>
    %134 = arith.mulf %132, %133 : vector<8x16xf32>
    %135 = arith.addf %131, %134 : vector<8x16xf32>
    %136 = vector.extract_strided_slice %127 {offsets = [0, 2], sizes = [8, 16], strides = [1, 1]} : vector<8x20xf32> to vector<8x16xf32>
    %137 = vector.broadcast %45 : f32 to vector<8x16xf32>
    %138 = arith.mulf %136, %137 : vector<8x16xf32>
    %139 = arith.addf %135, %138 : vector<8x16xf32>
    %140 = vector.extract_strided_slice %127 {offsets = [0, 3], sizes = [8, 16], strides = [1, 1]} : vector<8x20xf32> to vector<8x16xf32>
    %141 = vector.broadcast %47 : f32 to vector<8x16xf32>
    %142 = arith.mulf %140, %141 : vector<8x16xf32>
    %143 = arith.addf %139, %142 : vector<8x16xf32>
    %144 = vector.extract_strided_slice %127 {offsets = [0, 4], sizes = [8, 16], strides = [1, 1]} : vector<8x20xf32> to vector<8x16xf32>
    %145 = vector.broadcast %49 : f32 to vector<8x16xf32>
    %146 = arith.mulf %144, %145 : vector<8x16xf32>
    %147 = arith.addf %143, %146 : vector<8x16xf32>
    %c3_i32 = arith.constant 3 : i32
    %148 = arith.addi %71, %c3_i32 : i32
    %149 = arith.index_cast %c0_i32 : i32 to index
    %150 = arith.index_cast %148 : i32 to index
    %c0_16 = arith.constant 0 : index
    %151 = vector.load %arg5[%149, %150, %c0_16] : memref<4x20x20xf32, #tpu.memory_space<vmem>>, vector<1x8x20xf32>
    %152 = vector.shape_cast %151 : vector<1x8x20xf32> to vector<8x20xf32>
    %153 = vector.extract_strided_slice %152 {offsets = [0, 0], sizes = [8, 16], strides = [1, 1]} : vector<8x20xf32> to vector<8x16xf32>
    %154 = vector.broadcast %51 : f32 to vector<8x16xf32>
    %155 = arith.mulf %153, %154 : vector<8x16xf32>
    %156 = arith.addf %147, %155 : vector<8x16xf32>
    %157 = vector.extract_strided_slice %152 {offsets = [0, 1], sizes = [8, 16], strides = [1, 1]} : vector<8x20xf32> to vector<8x16xf32>
    %158 = vector.broadcast %53 : f32 to vector<8x16xf32>
    %159 = arith.mulf %157, %158 : vector<8x16xf32>
    %160 = arith.addf %156, %159 : vector<8x16xf32>
    %161 = vector.extract_strided_slice %152 {offsets = [0, 2], sizes = [8, 16], strides = [1, 1]} : vector<8x20xf32> to vector<8x16xf32>
    %162 = vector.broadcast %55 : f32 to vector<8x16xf32>
    %163 = arith.mulf %161, %162 : vector<8x16xf32>
    %164 = arith.addf %160, %163 : vector<8x16xf32>
    %165 = vector.extract_strided_slice %152 {offsets = [0, 3], sizes = [8, 16], strides = [1, 1]} : vector<8x20xf32> to vector<8x16xf32>
    %166 = vector.broadcast %57 : f32 to vector<8x16xf32>
    %167 = arith.mulf %165, %166 : vector<8x16xf32>
    %168 = arith.addf %164, %167 : vector<8x16xf32>
    %169 = vector.extract_strided_slice %152 {offsets = [0, 4], sizes = [8, 16], strides = [1, 1]} : vector<8x20xf32> to vector<8x16xf32>
    %170 = vector.broadcast %59 : f32 to vector<8x16xf32>
    %171 = arith.mulf %169, %170 : vector<8x16xf32>
    %172 = arith.addf %168, %171 : vector<8x16xf32>
    %c4_i32_17 = arith.constant 4 : i32
    %173 = arith.addi %71, %c4_i32_17 : i32
    %174 = arith.index_cast %c0_i32 : i32 to index
    %175 = arith.index_cast %173 : i32 to index
    %c0_18 = arith.constant 0 : index
    %176 = vector.load %arg5[%174, %175, %c0_18] : memref<4x20x20xf32, #tpu.memory_space<vmem>>, vector<1x8x20xf32>
    %177 = vector.shape_cast %176 : vector<1x8x20xf32> to vector<8x20xf32>
    %178 = vector.extract_strided_slice %177 {offsets = [0, 0], sizes = [8, 16], strides = [1, 1]} : vector<8x20xf32> to vector<8x16xf32>
    %179 = vector.broadcast %61 : f32 to vector<8x16xf32>
    %180 = arith.mulf %178, %179 : vector<8x16xf32>
    %181 = arith.addf %172, %180 : vector<8x16xf32>
    %182 = vector.extract_strided_slice %177 {offsets = [0, 1], sizes = [8, 16], strides = [1, 1]} : vector<8x20xf32> to vector<8x16xf32>
    %183 = vector.broadcast %63 : f32 to vector<8x16xf32>
    %184 = arith.mulf %182, %183 : vector<8x16xf32>
    %185 = arith.addf %181, %184 : vector<8x16xf32>
    %186 = vector.extract_strided_slice %177 {offsets = [0, 2], sizes = [8, 16], strides = [1, 1]} : vector<8x20xf32> to vector<8x16xf32>
    %187 = vector.broadcast %65 : f32 to vector<8x16xf32>
    %188 = arith.mulf %186, %187 : vector<8x16xf32>
    %189 = arith.addf %185, %188 : vector<8x16xf32>
    %190 = vector.extract_strided_slice %177 {offsets = [0, 3], sizes = [8, 16], strides = [1, 1]} : vector<8x20xf32> to vector<8x16xf32>
    %191 = vector.broadcast %67 : f32 to vector<8x16xf32>
    %192 = arith.mulf %190, %191 : vector<8x16xf32>
    %193 = arith.addf %189, %192 : vector<8x16xf32>
    %194 = vector.extract_strided_slice %177 {offsets = [0, 4], sizes = [8, 16], strides = [1, 1]} : vector<8x20xf32> to vector<8x16xf32>
    %195 = vector.broadcast %69 : f32 to vector<8x16xf32>
    %196 = arith.mulf %194, %195 : vector<8x16xf32>
    %197 = arith.addf %193, %196 : vector<8x16xf32>
    %c0_19 = arith.constant 0 : index
    %198 = arith.index_cast %c0_i32 : i32 to index
    %199 = arith.index_cast %71 : i32 to index
    %c0_20 = arith.constant 0 : index
    %200 = vector.load %arg4[%c0_19, %198, %199, %c0_20] : memref<1x4x16x16xf32, #tpu.memory_space<vmem>>, vector<1x1x8x16xf32>
    %201 = vector.shape_cast %200 : vector<1x1x8x16xf32> to vector<8x16xf32>
    %202 = vector.shape_cast %197 : vector<8x16xf32> to vector<1x1x8x16xf32>
    tpu.vector_store %arg4[%c0_19, %198, %199, %c0_20], %202 {strides = array<i32>} : memref<1x4x16x16xf32, #tpu.memory_space<vmem>>, vector<1x1x8x16xf32>,
    %c1_i32_21 = arith.constant 1 : i32
    %c8_i32_22 = arith.constant 8 : i32
    %203 = arith.muli %c1_i32_21, %c8_i32_22 : i32
    %204 = tpu.assume_multiple %203, 8 : i32
    %cst_23 = arith.constant 0.000000e+00 : f32
    %205 = vector.broadcast %cst_23 : f32 to vector<8x16xf32>
    %c0_i32_24 = arith.constant 0 : i32
    %206 = arith.addi %204, %c0_i32_24 : i32
    %207 = arith.index_cast %c0_i32 : i32 to index
    %208 = arith.index_cast %206 : i32 to index
    %c0_25 = arith.constant 0 : index
    %209 = vector.load %arg5[%207, %208, %c0_25] : memref<4x20x20xf32, #tpu.memory_space<vmem>>, vector<1x8x20xf32>
    %210 = vector.shape_cast %209 : vector<1x8x20xf32> to vector<8x20xf32>
    %211 = vector.extract_strided_slice %210 {offsets = [0, 0], sizes = [8, 16], strides = [1, 1]} : vector<8x20xf32> to vector<8x16xf32>
    %212 = vector.broadcast %21 : f32 to vector<8x16xf32>
    %213 = arith.mulf %211, %212 : vector<8x16xf32>
    %214 = arith.addf %205, %213 : vector<8x16xf32>
    %215 = vector.extract_strided_slice %210 {offsets = [0, 1], sizes = [8, 16], strides = [1, 1]} : vector<8x20xf32> to vector<8x16xf32>
    %216 = vector.broadcast %23 : f32 to vector<8x16xf32>
    %217 = arith.mulf %215, %216 : vector<8x16xf32>
    %218 = arith.addf %214, %217 : vector<8x16xf32>
    %219 = vector.extract_strided_slice %210 {offsets = [0, 2], sizes = [8, 16], strides = [1, 1]} : vector<8x20xf32> to vector<8x16xf32>
    %220 = vector.broadcast %25 : f32 to vector<8x16xf32>
    %221 = arith.mulf %219, %220 : vector<8x16xf32>
    %222 = arith.addf %218, %221 : vector<8x16xf32>
    %223 = vector.extract_strided_slice %210 {offsets = [0, 3], sizes = [8, 16], strides = [1, 1]} : vector<8x20xf32> to vector<8x16xf32>
    %224 = vector.broadcast %27 : f32 to vector<8x16xf32>
    %225 = arith.mulf %223, %224 : vector<8x16xf32>
    %226 = arith.addf %222, %225 : vector<8x16xf32>
    %227 = vector.extract_strided_slice %210 {offsets = [0, 4], sizes = [8, 16], strides = [1, 1]} : vector<8x20xf32> to vector<8x16xf32>
    %228 = vector.broadcast %29 : f32 to vector<8x16xf32>
    %229 = arith.mulf %227, %228 : vector<8x16xf32>
    %230 = arith.addf %226, %229 : vector<8x16xf32>
    %c1_i32_26 = arith.constant 1 : i32
    %231 = arith.addi %204, %c1_i32_26 : i32
    %232 = arith.index_cast %c0_i32 : i32 to index
    %233 = arith.index_cast %231 : i32 to index
    %c0_27 = arith.constant 0 : index
    %234 = vector.load %arg5[%232, %233, %c0_27] : memref<4x20x20xf32, #tpu.memory_space<vmem>>, vector<1x8x20xf32>
    %235 = vector.shape_cast %234 : vector<1x8x20xf32> to vector<8x20xf32>
    %236 = vector.extract_strided_slice %235 {offsets = [0, 0], sizes = [8, 16], strides = [1, 1]} : vector<8x20xf32> to vector<8x16xf32>
    %237 = vector.broadcast %31 : f32 to vector<8x16xf32>
    %238 = arith.mulf %236, %237 : vector<8x16xf32>
    %239 = arith.addf %230, %238 : vector<8x16xf32>
    %240 = vector.extract_strided_slice %235 {offsets = [0, 1], sizes = [8, 16], strides = [1, 1]} : vector<8x20xf32> to vector<8x16xf32>
    %241 = vector.broadcast %33 : f32 to vector<8x16xf32>
    %242 = arith.mulf %240, %241 : vector<8x16xf32>
    %243 = arith.addf %239, %242 : vector<8x16xf32>
    %244 = vector.extract_strided_slice %235 {offsets = [0, 2], sizes = [8, 16], strides = [1, 1]} : vector<8x20xf32> to vector<8x16xf32>
    %245 = vector.broadcast %35 : f32 to vector<8x16xf32>
    %246 = arith.mulf %244, %245 : vector<8x16xf32>
    %247 = arith.addf %243, %246 : vector<8x16xf32>
    %248 = vector.extract_strided_slice %235 {offsets = [0, 3], sizes = [8, 16], strides = [1, 1]} : vector<8x20xf32> to vector<8x16xf32>
    %249 = vector.broadcast %37 : f32 to vector<8x16xf32>
    %250 = arith.mulf %248, %249 : vector<8x16xf32>
    %251 = arith.addf %247, %250 : vector<8x16xf32>
    %252 = vector.extract_strided_slice %235 {offsets = [0, 4], sizes = [8, 16], strides = [1, 1]} : vector<8x20xf32> to vector<8x16xf32>
    %253 = vector.broadcast %39 : f32 to vector<8x16xf32>
    %254 = arith.mulf %252, %253 : vector<8x16xf32>
    %255 = arith.addf %251, %254 : vector<8x16xf32>
    %c2_i32_28 = arith.constant 2 : i32
    %256 = arith.addi %204, %c2_i32_28 : i32
    %257 = arith.index_cast %c0_i32 : i32 to index
    %258 = arith.index_cast %256 : i32 to index
    %c0_29 = arith.constant 0 : index
    %259 = vector.load %arg5[%257, %258, %c0_29] : memref<4x20x20xf32, #tpu.memory_space<vmem>>, vector<1x8x20xf32>
    %260 = vector.shape_cast %259 : vector<1x8x20xf32> to vector<8x20xf32>
    %261 = vector.extract_strided_slice %260 {offsets = [0, 0], sizes = [8, 16], strides = [1, 1]} : vector<8x20xf32> to vector<8x16xf32>
    %262 = vector.broadcast %41 : f32 to vector<8x16xf32>
    %263 = arith.mulf %261, %262 : vector<8x16xf32>
    %264 = arith.addf %255, %263 : vector<8x16xf32>
    %265 = vector.extract_strided_slice %260 {offsets = [0, 1], sizes = [8, 16], strides = [1, 1]} : vector<8x20xf32> to vector<8x16xf32>
    %266 = vector.broadcast %43 : f32 to vector<8x16xf32>
    %267 = arith.mulf %265, %266 : vector<8x16xf32>
    %268 = arith.addf %264, %267 : vector<8x16xf32>
    %269 = vector.extract_strided_slice %260 {offsets = [0, 2], sizes = [8, 16], strides = [1, 1]} : vector<8x20xf32> to vector<8x16xf32>
    %270 = vector.broadcast %45 : f32 to vector<8x16xf32>
    %271 = arith.mulf %269, %270 : vector<8x16xf32>
    %272 = arith.addf %268, %271 : vector<8x16xf32>
    %273 = vector.extract_strided_slice %260 {offsets = [0, 3], sizes = [8, 16], strides = [1, 1]} : vector<8x20xf32> to vector<8x16xf32>
    %274 = vector.broadcast %47 : f32 to vector<8x16xf32>
    %275 = arith.mulf %273, %274 : vector<8x16xf32>
    %276 = arith.addf %272, %275 : vector<8x16xf32>
    %277 = vector.extract_strided_slice %260 {offsets = [0, 4], sizes = [8, 16], strides = [1, 1]} : vector<8x20xf32> to vector<8x16xf32>
    %278 = vector.broadcast %49 : f32 to vector<8x16xf32>
    %279 = arith.mulf %277, %278 : vector<8x16xf32>
    %280 = arith.addf %276, %279 : vector<8x16xf32>
    %c3_i32_30 = arith.constant 3 : i32
    %281 = arith.addi %204, %c3_i32_30 : i32
    %282 = arith.index_cast %c0_i32 : i32 to index
    %283 = arith.index_cast %281 : i32 to index
    %c0_31 = arith.constant 0 : index
    %284 = vector.load %arg5[%282, %283, %c0_31] : memref<4x20x20xf32, #tpu.memory_space<vmem>>, vector<1x8x20xf32>
    %285 = vector.shape_cast %284 : vector<1x8x20xf32> to vector<8x20xf32>
    %286 = vector.extract_strided_slice %285 {offsets = [0, 0], sizes = [8, 16], strides = [1, 1]} : vector<8x20xf32> to vector<8x16xf32>
    %287 = vector.broadcast %51 : f32 to vector<8x16xf32>
    %288 = arith.mulf %286, %287 : vector<8x16xf32>
    %289 = arith.addf %280, %288 : vector<8x16xf32>
    %290 = vector.extract_strided_slice %285 {offsets = [0, 1], sizes = [8, 16], strides = [1, 1]} : vector<8x20xf32> to vector<8x16xf32>
    %291 = vector.broadcast %53 : f32 to vector<8x16xf32>
    %292 = arith.mulf %290, %291 : vector<8x16xf32>
    %293 = arith.addf %289, %292 : vector<8x16xf32>
    %294 = vector.extract_strided_slice %285 {offsets = [0, 2], sizes = [8, 16], strides = [1, 1]} : vector<8x20xf32> to vector<8x16xf32>
    %295 = vector.broadcast %55 : f32 to vector<8x16xf32>
    %296 = arith.mulf %294, %295 : vector<8x16xf32>
    %297 = arith.addf %293, %296 : vector<8x16xf32>
    %298 = vector.extract_strided_slice %285 {offsets = [0, 3], sizes = [8, 16], strides = [1, 1]} : vector<8x20xf32> to vector<8x16xf32>
    %299 = vector.broadcast %57 : f32 to vector<8x16xf32>
    %300 = arith.mulf %298, %299 : vector<8x16xf32>
    %301 = arith.addf %297, %300 : vector<8x16xf32>
    %302 = vector.extract_strided_slice %285 {offsets = [0, 4], sizes = [8, 16], strides = [1, 1]} : vector<8x20xf32> to vector<8x16xf32>
    %303 = vector.broadcast %59 : f32 to vector<8x16xf32>
    %304 = arith.mulf %302, %303 : vector<8x16xf32>
    %305 = arith.addf %301, %304 : vector<8x16xf32>
    %c4_i32_32 = arith.constant 4 : i32
    %306 = arith.addi %204, %c4_i32_32 : i32
    %307 = arith.index_cast %c0_i32 : i32 to index
    %308 = arith.index_cast %306 : i32 to index
    %c0_33 = arith.constant 0 : index
    %309 = vector.load %arg5[%307, %308, %c0_33] : memref<4x20x20xf32, #tpu.memory_space<vmem>>, vector<1x8x20xf32>
    %310 = vector.shape_cast %309 : vector<1x8x20xf32> to vector<8x20xf32>
    %311 = vector.extract_strided_slice %310 {offsets = [0, 0], sizes = [8, 16], strides = [1, 1]} : vector<8x20xf32> to vector<8x16xf32>
    %312 = vector.broadcast %61 : f32 to vector<8x16xf32>
    %313 = arith.mulf %311, %312 : vector<8x16xf32>
    %314 = arith.addf %305, %313 : vector<8x16xf32>
    %315 = vector.extract_strided_slice %310 {offsets = [0, 1], sizes = [8, 16], strides = [1, 1]} : vector<8x20xf32> to vector<8x16xf32>
    %316 = vector.broadcast %63 : f32 to vector<8x16xf32>
    %317 = arith.mulf %315, %316 : vector<8x16xf32>
    %318 = arith.addf %314, %317 : vector<8x16xf32>
    %319 = vector.extract_strided_slice %310 {offsets = [0, 2], sizes = [8, 16], strides = [1, 1]} : vector<8x20xf32> to vector<8x16xf32>
    %320 = vector.broadcast %65 : f32 to vector<8x16xf32>
    %321 = arith.mulf %319, %320 : vector<8x16xf32>
    %322 = arith.addf %318, %321 : vector<8x16xf32>
    %323 = vector.extract_strided_slice %310 {offsets = [0, 3], sizes = [8, 16], strides = [1, 1]} : vector<8x20xf32> to vector<8x16xf32>
    %324 = vector.broadcast %67 : f32 to vector<8x16xf32>
    %325 = arith.mulf %323, %324 : vector<8x16xf32>
    %326 = arith.addf %322, %325 : vector<8x16xf32>
    %327 = vector.extract_strided_slice %310 {offsets = [0, 4], sizes = [8, 16], strides = [1, 1]} : vector<8x20xf32> to vector<8x16xf32>
    %328 = vector.broadcast %69 : f32 to vector<8x16xf32>
    %329 = arith.mulf %327, %328 : vector<8x16xf32>
    %330 = arith.addf %326, %329 : vector<8x16xf32>
    %c0_34 = arith.constant 0 : index
    %331 = arith.index_cast %c0_i32 : i32 to index
    %332 = arith.index_cast %204 : i32 to index
    %c0_35 = arith.constant 0 : index
    %333 = vector.load %arg4[%c0_34, %331, %332, %c0_35] : memref<1x4x16x16xf32, #tpu.memory_space<vmem>>, vector<1x1x8x16xf32>
    %334 = vector.shape_cast %333 : vector<1x1x8x16xf32> to vector<8x16xf32>
    %335 = vector.shape_cast %330 : vector<8x16xf32> to vector<1x1x8x16xf32>
    tpu.vector_store %arg4[%c0_34, %331, %332, %c0_35], %335 {strides = array<i32>} : memref<1x4x16x16xf32, #tpu.memory_space<vmem>>, vector<1x1x8x16xf32>,
    %c2_i32_36 = arith.constant 2 : i32
    %c1_i32_37 = arith.constant 1 : i32
    %c4_i32_38 = arith.constant 4 : i32
    %336 = arith.muli %arg1, %c4_i32_38 : i32
    %337 = arith.addi %336, %c1_i32_37 : i32
    %c0_39 = arith.constant 0 : index
    %338 = arith.index_cast %c1_i32_37 : i32 to index
    %c0_40 = arith.constant 0 : index
    %c0_41 = arith.constant 0 : index
    %339 = vector.load %arg3[%c0_39, %338, %c0_40, %c0_41] : memref<1x4x16x16xf32, #tpu.memory_space<vmem>>, vector<1x1x16x16xf32>
    %340 = vector.shape_cast %339 : vector<1x1x16x16xf32> to vector<16x16xf32>
    %cst_42 = arith.constant 0.000000e+00 : f32
    %341 = vector.broadcast %cst_42 : f32 to vector<16x2xf32>
    %cst_43 = arith.constant 0.000000e+00 : f32
    %342 = vector.broadcast %cst_43 : f32 to vector<2x20xf32>
    %343 = arith.index_cast %c1_i32_37 : i32 to index
    %c0_44 = arith.constant 0 : index
    %c0_45 = arith.constant 0 : index
    %344 = vector.load %arg5[%343, %c0_44, %c0_45] : memref<4x20x20xf32, #tpu.memory_space<vmem>>, vector<1x2x20xf32>
    %345 = vector.shape_cast %344 : vector<1x2x20xf32> to vector<2x20xf32>
    %346 = vector.shape_cast %342 : vector<2x20xf32> to vector<1x2x20xf32>
    tpu.vector_store %arg5[%343, %c0_44, %c0_45], %346 {strides = array<i32>} : memref<4x20x20xf32, #tpu.memory_space<vmem>>, vector<1x2x20xf32>,
    %347 = arith.index_cast %c1_i32_37 : i32 to index
    %c18_46 = arith.constant 18 : index
    %c0_47 = arith.constant 0 : index
    %348 = vector.load %arg5[%347, %c18_46, %c0_47] : memref<4x20x20xf32, #tpu.memory_space<vmem>>, vector<1x2x20xf32>
    %349 = vector.shape_cast %348 : vector<1x2x20xf32> to vector<2x20xf32>
    %350 = vector.shape_cast %342 : vector<2x20xf32> to vector<1x2x20xf32>
    tpu.vector_store %arg5[%347, %c18_46, %c0_47], %350 {strides = array<i32>} : memref<4x20x20xf32, #tpu.memory_space<vmem>>, vector<1x2x20xf32>,
    %351 = tpu.concatenate %341, %340, %341 in 1 : vector<16x2xf32>, vector<16x16xf32>, vector<16x2xf32> -> vector<16x20xf32>
    %352 = arith.index_cast %c1_i32_37 : i32 to index
    %c2_48 = arith.constant 2 : index
    %c0_49 = arith.constant 0 : index
    %353 = vector.load %arg5[%352, %c2_48, %c0_49] : memref<4x20x20xf32, #tpu.memory_space<vmem>>, vector<1x16x20xf32>
    %354 = vector.shape_cast %353 : vector<1x16x20xf32> to vector<16x20xf32>
    %355 = vector.shape_cast %351 : vector<16x20xf32> to vector<1x16x20xf32>
    tpu.vector_store %arg5[%352, %c2_48, %c0_49], %355 {strides = array<i32>} : memref<4x20x20xf32, #tpu.memory_space<vmem>>, vector<1x16x20xf32>,
    %c0_50 = arith.constant 0 : index
    %356 = arith.index_cast %337 : i32 to index
    %357 = memref.load %arg2[%c0_50, %356] : memref<25x4xf32, #tpu.memory_space<smem>>
    %c1_51 = arith.constant 1 : index
    %358 = arith.index_cast %337 : i32 to index
    %359 = memref.load %arg2[%c1_51, %358] : memref<25x4xf32, #tpu.memory_space<smem>>
    %c2_52 = arith.constant 2 : index
    %360 = arith.index_cast %337 : i32 to index
    %361 = memref.load %arg2[%c2_52, %360] : memref<25x4xf32, #tpu.memory_space<smem>>
    %c3_53 = arith.constant 3 : index
    %362 = arith.index_cast %337 : i32 to index
    %363 = memref.load %arg2[%c3_53, %362] : memref<25x4xf32, #tpu.memory_space<smem>>
    %c4_54 = arith.constant 4 : index
    %364 = arith.index_cast %337 : i32 to index
    %365 = memref.load %arg2[%c4_54, %364] : memref<25x4xf32, #tpu.memory_space<smem>>
    %c5_55 = arith.constant 5 : index
    %366 = arith.index_cast %337 : i32 to index
    %367 = memref.load %arg2[%c5_55, %366] : memref<25x4xf32, #tpu.memory_space<smem>>
    %c6_56 = arith.constant 6 : index
    %368 = arith.index_cast %337 : i32 to index
    %369 = memref.load %arg2[%c6_56, %368] : memref<25x4xf32, #tpu.memory_space<smem>>
    %c7_57 = arith.constant 7 : index
    %370 = arith.index_cast %337 : i32 to index
    %371 = memref.load %arg2[%c7_57, %370] : memref<25x4xf32, #tpu.memory_space<smem>>
    %c8_58 = arith.constant 8 : index
    %372 = arith.index_cast %337 : i32 to index
    %373 = memref.load %arg2[%c8_58, %372] : memref<25x4xf32, #tpu.memory_space<smem>>
    %c9_59 = arith.constant 9 : index
    %374 = arith.index_cast %337 : i32 to index
    %375 = memref.load %arg2[%c9_59, %374] : memref<25x4xf32, #tpu.memory_space<smem>>
    %c10_60 = arith.constant 10 : index
    %376 = arith.index_cast %337 : i32 to index
    %377 = memref.load %arg2[%c10_60, %376] : memref<25x4xf32, #tpu.memory_space<smem>>
    %c11_61 = arith.constant 11 : index
    %378 = arith.index_cast %337 : i32 to index
    %379 = memref.load %arg2[%c11_61, %378] : memref<25x4xf32, #tpu.memory_space<smem>>
    %c12_62 = arith.constant 12 : index
    %380 = arith.index_cast %337 : i32 to index
    %381 = memref.load %arg2[%c12_62, %380] : memref<25x4xf32, #tpu.memory_space<smem>>
    %c13_63 = arith.constant 13 : index
    %382 = arith.index_cast %337 : i32 to index
    %383 = memref.load %arg2[%c13_63, %382] : memref<25x4xf32, #tpu.memory_space<smem>>
    %c14_64 = arith.constant 14 : index
    %384 = arith.index_cast %337 : i32 to index
    %385 = memref.load %arg2[%c14_64, %384] : memref<25x4xf32, #tpu.memory_space<smem>>
    %c15_65 = arith.constant 15 : index
    %386 = arith.index_cast %337 : i32 to index
    %387 = memref.load %arg2[%c15_65, %386] : memref<25x4xf32, #tpu.memory_space<smem>>
    %c16_66 = arith.constant 16 : index
    %388 = arith.index_cast %337 : i32 to index
    %389 = memref.load %arg2[%c16_66, %388] : memref<25x4xf32, #tpu.memory_space<smem>>
    %c17_67 = arith.constant 17 : index
    %390 = arith.index_cast %337 : i32 to index
    %391 = memref.load %arg2[%c17_67, %390] : memref<25x4xf32, #tpu.memory_space<smem>>
    %c18_68 = arith.constant 18 : index
    %392 = arith.index_cast %337 : i32 to index
    %393 = memref.load %arg2[%c18_68, %392] : memref<25x4xf32, #tpu.memory_space<smem>>
    %c19_69 = arith.constant 19 : index
    %394 = arith.index_cast %337 : i32 to index
    %395 = memref.load %arg2[%c19_69, %394] : memref<25x4xf32, #tpu.memory_space<smem>>
    %c20_70 = arith.constant 20 : index
    %396 = arith.index_cast %337 : i32 to index
    %397 = memref.load %arg2[%c20_70, %396] : memref<25x4xf32, #tpu.memory_space<smem>>
    %c21_71 = arith.constant 21 : index
    %398 = arith.index_cast %337 : i32 to index
    %399 = memref.load %arg2[%c21_71, %398] : memref<25x4xf32, #tpu.memory_space<smem>>
    %c22_72 = arith.constant 22 : index
    %400 = arith.index_cast %337 : i32 to index
    %401 = memref.load %arg2[%c22_72, %400] : memref<25x4xf32, #tpu.memory_space<smem>>
    %c23_73 = arith.constant 23 : index
    %402 = arith.index_cast %337 : i32 to index
    %403 = memref.load %arg2[%c23_73, %402] : memref<25x4xf32, #tpu.memory_space<smem>>
    %c24_74 = arith.constant 24 : index
    %404 = arith.index_cast %337 : i32 to index
    %405 = memref.load %arg2[%c24_74, %404] : memref<25x4xf32, #tpu.memory_space<smem>>
    %c0_i32_75 = arith.constant 0 : i32
    %c8_i32_76 = arith.constant 8 : i32
    %406 = arith.muli %c0_i32_75, %c8_i32_76 : i32
    %407 = tpu.assume_multiple %406, 8 : i32
    %cst_77 = arith.constant 0.000000e+00 : f32
    %408 = vector.broadcast %cst_77 : f32 to vector<8x16xf32>
    %c0_i32_78 = arith.constant 0 : i32
    %409 = arith.addi %407, %c0_i32_78 : i32
    %410 = arith.index_cast %c1_i32_37 : i32 to index
    %411 = arith.index_cast %409 : i32 to index
    %c0_79 = arith.constant 0 : index
    %412 = vector.load %arg5[%410, %411, %c0_79] : memref<4x20x20xf32, #tpu.memory_space<vmem>>, vector<1x8x20xf32>
    %413 = vector.shape_cast %412 : vector<1x8x20xf32> to vector<8x20xf32>
    %414 = vector.extract_strided_slice %413 {offsets = [0, 0], sizes = [8, 16], strides = [1, 1]} : vector<8x20xf32> to vector<8x16xf32>
    %415 = vector.broadcast %357 : f32 to vector<8x16xf32>
    %416 = arith.mulf %414, %415 : vector<8x16xf32>
    %417 = arith.addf %408, %416 : vector<8x16xf32>
    %418 = vector.extract_strided_slice %413 {offsets = [0, 1], sizes = [8, 16], strides = [1, 1]} : vector<8x20xf32> to vector<8x16xf32>
    %419 = vector.broadcast %359 : f32 to vector<8x16xf32>
    %420 = arith.mulf %418, %419 : vector<8x16xf32>
    %421 = arith.addf %417, %420 : vector<8x16xf32>
    %422 = vector.extract_strided_slice %413 {offsets = [0, 2], sizes = [8, 16], strides = [1, 1]} : vector<8x20xf32> to vector<8x16xf32>
    %423 = vector.broadcast %361 : f32 to vector<8x16xf32>
    %424 = arith.mulf %422, %423 : vector<8x16xf32>
    %425 = arith.addf %421, %424 : vector<8x16xf32>
    %426 = vector.extract_strided_slice %413 {offsets = [0, 3], sizes = [8, 16], strides = [1, 1]} : vector<8x20xf32> to vector<8x16xf32>
    %427 = vector.broadcast %363 : f32 to vector<8x16xf32>
    %428 = arith.mulf %426, %427 : vector<8x16xf32>
    %429 = arith.addf %425, %428 : vector<8x16xf32>
    %430 = vector.extract_strided_slice %413 {offsets = [0, 4], sizes = [8, 16], strides = [1, 1]} : vector<8x20xf32> to vector<8x16xf32>
    %431 = vector.broadcast %365 : f32 to vector<8x16xf32>
    %432 = arith.mulf %430, %431 : vector<8x16xf32>
    %433 = arith.addf %429, %432 : vector<8x16xf32>
    %c1_i32_80 = arith.constant 1 : i32
    %434 = arith.addi %407, %c1_i32_80 : i32
    %435 = arith.index_cast %c1_i32_37 : i32 to index
    %436 = arith.index_cast %434 : i32 to index
    %c0_81 = arith.constant 0 : index
    %437 = vector.load %arg5[%435, %436, %c0_81] : memref<4x20x20xf32, #tpu.memory_space<vmem>>, vector<1x8x20xf32>
    %438 = vector.shape_cast %437 : vector<1x8x20xf32> to vector<8x20xf32>
    %439 = vector.extract_strided_slice %438 {offsets = [0, 0], sizes = [8, 16], strides = [1, 1]} : vector<8x20xf32> to vector<8x16xf32>
    %440 = vector.broadcast %367 : f32 to vector<8x16xf32>
    %441 = arith.mulf %439, %440 : vector<8x16xf32>
    %442 = arith.addf %433, %441 : vector<8x16xf32>
    %443 = vector.extract_strided_slice %438 {offsets = [0, 1], sizes = [8, 16], strides = [1, 1]} : vector<8x20xf32> to vector<8x16xf32>
    %444 = vector.broadcast %369 : f32 to vector<8x16xf32>
    %445 = arith.mulf %443, %444 : vector<8x16xf32>
    %446 = arith.addf %442, %445 : vector<8x16xf32>
    %447 = vector.extract_strided_slice %438 {offsets = [0, 2], sizes = [8, 16], strides = [1, 1]} : vector<8x20xf32> to vector<8x16xf32>
    %448 = vector.broadcast %371 : f32 to vector<8x16xf32>
    %449 = arith.mulf %447, %448 : vector<8x16xf32>
    %450 = arith.addf %446, %449 : vector<8x16xf32>
    %451 = vector.extract_strided_slice %438 {offsets = [0, 3], sizes = [8, 16], strides = [1, 1]} : vector<8x20xf32> to vector<8x16xf32>
    %452 = vector.broadcast %373 : f32 to vector<8x16xf32>
    %453 = arith.mulf %451, %452 : vector<8x16xf32>
    %454 = arith.addf %450, %453 : vector<8x16xf32>
    %455 = vector.extract_strided_slice %438 {offsets = [0, 4], sizes = [8, 16], strides = [1, 1]} : vector<8x20xf32> to vector<8x16xf32>
    %456 = vector.broadcast %375 : f32 to vector<8x16xf32>
    %457 = arith.mulf %455, %456 : vector<8x16xf32>
    %458 = arith.addf %454, %457 : vector<8x16xf32>
    %c2_i32_82 = arith.constant 2 : i32
    %459 = arith.addi %407, %c2_i32_82 : i32
    %460 = arith.index_cast %c1_i32_37 : i32 to index
    %461 = arith.index_cast %459 : i32 to index
    %c0_83 = arith.constant 0 : index
    %462 = vector.load %arg5[%460, %461, %c0_83] : memref<4x20x20xf32, #tpu.memory_space<vmem>>, vector<1x8x20xf32>
    %463 = vector.shape_cast %462 : vector<1x8x20xf32> to vector<8x20xf32>
    %464 = vector.extract_strided_slice %463 {offsets = [0, 0], sizes = [8, 16], strides = [1, 1]} : vector<8x20xf32> to vector<8x16xf32>
    %465 = vector.broadcast %377 : f32 to vector<8x16xf32>
    %466 = arith.mulf %464, %465 : vector<8x16xf32>
    %467 = arith.addf %458, %466 : vector<8x16xf32>
    %468 = vector.extract_strided_slice %463 {offsets = [0, 1], sizes = [8, 16], strides = [1, 1]} : vector<8x20xf32> to vector<8x16xf32>
    %469 = vector.broadcast %379 : f32 to vector<8x16xf32>
    %470 = arith.mulf %468, %469 : vector<8x16xf32>
    %471 = arith.addf %467, %470 : vector<8x16xf32>
    %472 = vector.extract_strided_slice %463 {offsets = [0, 2], sizes = [8, 16], strides = [1, 1]} : vector<8x20xf32> to vector<8x16xf32>
    %473 = vector.broadcast %381 : f32 to vector<8x16xf32>
    %474 = arith.mulf %472, %473 : vector<8x16xf32>
    %475 = arith.addf %471, %474 : vector<8x16xf32>
    %476 = vector.extract_strided_slice %463 {offsets = [0, 3], sizes = [8, 16], strides = [1, 1]} : vector<8x20xf32> to vector<8x16xf32>
    %477 = vector.broadcast %383 : f32 to vector<8x16xf32>
    %478 = arith.mulf %476, %477 : vector<8x16xf32>
    %479 = arith.addf %475, %478 : vector<8x16xf32>
    %480 = vector.extract_strided_slice %463 {offsets = [0, 4], sizes = [8, 16], strides = [1, 1]} : vector<8x20xf32> to vector<8x16xf32>
    %481 = vector.broadcast %385 : f32 to vector<8x16xf32>
    %482 = arith.mulf %480, %481 : vector<8x16xf32>
    %483 = arith.addf %479, %482 : vector<8x16xf32>
    %c3_i32_84 = arith.constant 3 : i32
    %484 = arith.addi %407, %c3_i32_84 : i32
    %485 = arith.index_cast %c1_i32_37 : i32 to index
    %486 = arith.index_cast %484 : i32 to index
    %c0_85 = arith.constant 0 : index
    %487 = vector.load %arg5[%485, %486, %c0_85] : memref<4x20x20xf32, #tpu.memory_space<vmem>>, vector<1x8x20xf32>
    %488 = vector.shape_cast %487 : vector<1x8x20xf32> to vector<8x20xf32>
    %489 = vector.extract_strided_slice %488 {offsets = [0, 0], sizes = [8, 16], strides = [1, 1]} : vector<8x20xf32> to vector<8x16xf32>
    %490 = vector.broadcast %387 : f32 to vector<8x16xf32>
    %491 = arith.mulf %489, %490 : vector<8x16xf32>
    %492 = arith.addf %483, %491 : vector<8x16xf32>
    %493 = vector.extract_strided_slice %488 {offsets = [0, 1], sizes = [8, 16], strides = [1, 1]} : vector<8x20xf32> to vector<8x16xf32>
    %494 = vector.broadcast %389 : f32 to vector<8x16xf32>
    %495 = arith.mulf %493, %494 : vector<8x16xf32>
    %496 = arith.addf %492, %495 : vector<8x16xf32>
    %497 = vector.extract_strided_slice %488 {offsets = [0, 2], sizes = [8, 16], strides = [1, 1]} : vector<8x20xf32> to vector<8x16xf32>
    %498 = vector.broadcast %391 : f32 to vector<8x16xf32>
    %499 = arith.mulf %497, %498 : vector<8x16xf32>
    %500 = arith.addf %496, %499 : vector<8x16xf32>
    %501 = vector.extract_strided_slice %488 {offsets = [0, 3], sizes = [8, 16], strides = [1, 1]} : vector<8x20xf32> to vector<8x16xf32>
    %502 = vector.broadcast %393 : f32 to vector<8x16xf32>
    %503 = arith.mulf %501, %502 : vector<8x16xf32>
    %504 = arith.addf %500, %503 : vector<8x16xf32>
    %505 = vector.extract_strided_slice %488 {offsets = [0, 4], sizes = [8, 16], strides = [1, 1]} : vector<8x20xf32> to vector<8x16xf32>
    %506 = vector.broadcast %395 : f32 to vector<8x16xf32>
    %507 = arith.mulf %505, %506 : vector<8x16xf32>
    %508 = arith.addf %504, %507 : vector<8x16xf32>
    %c4_i32_86 = arith.constant 4 : i32
    %509 = arith.addi %407, %c4_i32_86 : i32
    %510 = arith.index_cast %c1_i32_37 : i32 to index
    %511 = arith.index_cast %509 : i32 to index
    %c0_87 = arith.constant 0 : index
    %512 = vector.load %arg5[%510, %511, %c0_87] : memref<4x20x20xf32, #tpu.memory_space<vmem>>, vector<1x8x20xf32>
    %513 = vector.shape_cast %512 : vector<1x8x20xf32> to vector<8x20xf32>
    %514 = vector.extract_strided_slice %513 {offsets = [0, 0], sizes = [8, 16], strides = [1, 1]} : vector<8x20xf32> to vector<8x16xf32>
    %515 = vector.broadcast %397 : f32 to vector<8x16xf32>
    %516 = arith.mulf %514, %515 : vector<8x16xf32>
    %517 = arith.addf %508, %516 : vector<8x16xf32>
    %518 = vector.extract_strided_slice %513 {offsets = [0, 1], sizes = [8, 16], strides = [1, 1]} : vector<8x20xf32> to vector<8x16xf32>
    %519 = vector.broadcast %399 : f32 to vector<8x16xf32>
    %520 = arith.mulf %518, %519 : vector<8x16xf32>
    %521 = arith.addf %517, %520 : vector<8x16xf32>
    %522 = vector.extract_strided_slice %513 {offsets = [0, 2], sizes = [8, 16], strides = [1, 1]} : vector<8x20xf32> to vector<8x16xf32>
    %523 = vector.broadcast %401 : f32 to vector<8x16xf32>
    %524 = arith.mulf %522, %523 : vector<8x16xf32>
    %525 = arith.addf %521, %524 : vector<8x16xf32>
    %526 = vector.extract_strided_slice %513 {offsets = [0, 3], sizes = [8, 16], strides = [1, 1]} : vector<8x20xf32> to vector<8x16xf32>
    %527 = vector.broadcast %403 : f32 to vector<8x16xf32>
    %528 = arith.mulf %526, %527 : vector<8x16xf32>
    %529 = arith.addf %525, %528 : vector<8x16xf32>
    %530 = vector.extract_strided_slice %513 {offsets = [0, 4], sizes = [8, 16], strides = [1, 1]} : vector<8x20xf32> to vector<8x16xf32>
    %531 = vector.broadcast %405 : f32 to vector<8x16xf32>
    %532 = arith.mulf %530, %531 : vector<8x16xf32>
    %533 = arith.addf %529, %532 : vector<8x16xf32>
    %c0_88 = arith.constant 0 : index
    %534 = arith.index_cast %c1_i32_37 : i32 to index
    %535 = arith.index_cast %407 : i32 to index
    %c0_89 = arith.constant 0 : index
    %536 = vector.load %arg4[%c0_88, %534, %535, %c0_89] : memref<1x4x16x16xf32, #tpu.memory_space<vmem>>, vector<1x1x8x16xf32>
    %537 = vector.shape_cast %536 : vector<1x1x8x16xf32> to vector<8x16xf32>
    %538 = vector.shape_cast %533 : vector<8x16xf32> to vector<1x1x8x16xf32>
    tpu.vector_store %arg4[%c0_88, %534, %535, %c0_89], %538 {strides = array<i32>} : memref<1x4x16x16xf32, #tpu.memory_space<vmem>>, vector<1x1x8x16xf32>,
    %c1_i32_90 = arith.constant 1 : i32
    %c8_i32_91 = arith.constant 8 : i32
    %539 = arith.muli %c1_i32_90, %c8_i32_91 : i32
    %540 = tpu.assume_multiple %539, 8 : i32
    %cst_92 = arith.constant 0.000000e+00 : f32
    %541 = vector.broadcast %cst_92 : f32 to vector<8x16xf32>
    %c0_i32_93 = arith.constant 0 : i32
    %542 = arith.addi %540, %c0_i32_93 : i32
    %543 = arith.index_cast %c1_i32_37 : i32 to index
    %544 = arith.index_cast %542 : i32 to index
    %c0_94 = arith.constant 0 : index
    %545 = vector.load %arg5[%543, %544, %c0_94] : memref<4x20x20xf32, #tpu.memory_space<vmem>>, vector<1x8x20xf32>
    %546 = vector.shape_cast %545 : vector<1x8x20xf32> to vector<8x20xf32>
    %547 = vector.extract_strided_slice %546 {offsets = [0, 0], sizes = [8, 16], strides = [1, 1]} : vector<8x20xf32> to vector<8x16xf32>
    %548 = vector.broadcast %357 : f32 to vector<8x16xf32>
    %549 = arith.mulf %547, %548 : vector<8x16xf32>
    %550 = arith.addf %541, %549 : vector<8x16xf32>
    %551 = vector.extract_strided_slice %546 {offsets = [0, 1], sizes = [8, 16], strides = [1, 1]} : vector<8x20xf32> to vector<8x16xf32>
    %552 = vector.broadcast %359 : f32 to vector<8x16xf32>
    %553 = arith.mulf %551, %552 : vector<8x16xf32>
    %554 = arith.addf %550, %553 : vector<8x16xf32>
    %555 = vector.extract_strided_slice %546 {offsets = [0, 2], sizes = [8, 16], strides = [1, 1]} : vector<8x20xf32> to vector<8x16xf32>
    %556 = vector.broadcast %361 : f32 to vector<8x16xf32>
    %557 = arith.mulf %555, %556 : vector<8x16xf32>
    %558 = arith.addf %554, %557 : vector<8x16xf32>
    %559 = vector.extract_strided_slice %546 {offsets = [0, 3], sizes = [8, 16], strides = [1, 1]} : vector<8x20xf32> to vector<8x16xf32>
    %560 = vector.broadcast %363 : f32 to vector<8x16xf32>
    %561 = arith.mulf %559, %560 : vector<8x16xf32>
    %562 = arith.addf %558, %561 : vector<8x16xf32>
    %563 = vector.extract_strided_slice %546 {offsets = [0, 4], sizes = [8, 16], strides = [1, 1]} : vector<8x20xf32> to vector<8x16xf32>
    %564 = vector.broadcast %365 : f32 to vector<8x16xf32>
    %565 = arith.mulf %563, %564 : vector<8x16xf32>
    %566 = arith.addf %562, %565 : vector<8x16xf32>
    %c1_i32_95 = arith.constant 1 : i32
    %567 = arith.addi %540, %c1_i32_95 : i32
    %568 = arith.index_cast %c1_i32_37 : i32 to index
    %569 = arith.index_cast %567 : i32 to index
    %c0_96 = arith.constant 0 : index
    %570 = vector.load %arg5[%568, %569, %c0_96] : memref<4x20x20xf32, #tpu.memory_space<vmem>>, vector<1x8x20xf32>
    %571 = vector.shape_cast %570 : vector<1x8x20xf32> to vector<8x20xf32>
    %572 = vector.extract_strided_slice %571 {offsets = [0, 0], sizes = [8, 16], strides = [1, 1]} : vector<8x20xf32> to vector<8x16xf32>
    %573 = vector.broadcast %367 : f32 to vector<8x16xf32>
    %574 = arith.mulf %572, %573 : vector<8x16xf32>
    %575 = arith.addf %566, %574 : vector<8x16xf32>
    %576 = vector.extract_strided_slice %571 {offsets = [0, 1], sizes = [8, 16], strides = [1, 1]} : vector<8x20xf32> to vector<8x16xf32>
    %577 = vector.broadcast %369 : f32 to vector<8x16xf32>
    %578 = arith.mulf %576, %577 : vector<8x16xf32>
    %579 = arith.addf %575, %578 : vector<8x16xf32>
    %580 = vector.extract_strided_slice %571 {offsets = [0, 2], sizes = [8, 16], strides = [1, 1]} : vector<8x20xf32> to vector<8x16xf32>
    %581 = vector.broadcast %371 : f32 to vector<8x16xf32>
    %582 = arith.mulf %580, %581 : vector<8x16xf32>
    %583 = arith.addf %579, %582 : vector<8x16xf32>
    %584 = vector.extract_strided_slice %571 {offsets = [0, 3], sizes = [8, 16], strides = [1, 1]} : vector<8x20xf32> to vector<8x16xf32>
    %585 = vector.broadcast %373 : f32 to vector<8x16xf32>
    %586 = arith.mulf %584, %585 : vector<8x16xf32>
    %587 = arith.addf %583, %586 : vector<8x16xf32>
    %588 = vector.extract_strided_slice %571 {offsets = [0, 4], sizes = [8, 16], strides = [1, 1]} : vector<8x20xf32> to vector<8x16xf32>
    %589 = vector.broadcast %375 : f32 to vector<8x16xf32>
    %590 = arith.mulf %588, %589 : vector<8x16xf32>
    %591 = arith.addf %587, %590 : vector<8x16xf32>
    %c2_i32_97 = arith.constant 2 : i32
    %592 = arith.addi %540, %c2_i32_97 : i32
    %593 = arith.index_cast %c1_i32_37 : i32 to index
    %594 = arith.index_cast %592 : i32 to index
    %c0_98 = arith.constant 0 : index
    %595 = vector.load %arg5[%593, %594, %c0_98] : memref<4x20x20xf32, #tpu.memory_space<vmem>>, vector<1x8x20xf32>
    %596 = vector.shape_cast %595 : vector<1x8x20xf32> to vector<8x20xf32>
    %597 = vector.extract_strided_slice %596 {offsets = [0, 0], sizes = [8, 16], strides = [1, 1]} : vector<8x20xf32> to vector<8x16xf32>
    %598 = vector.broadcast %377 : f32 to vector<8x16xf32>
    %599 = arith.mulf %597, %598 : vector<8x16xf32>
    %600 = arith.addf %591, %599 : vector<8x16xf32>
    %601 = vector.extract_strided_slice %596 {offsets = [0, 1], sizes = [8, 16], strides = [1, 1]} : vector<8x20xf32> to vector<8x16xf32>
    %602 = vector.broadcast %379 : f32 to vector<8x16xf32>
    %603 = arith.mulf %601, %602 : vector<8x16xf32>
    %604 = arith.addf %600, %603 : vector<8x16xf32>
    %605 = vector.extract_strided_slice %596 {offsets = [0, 2], sizes = [8, 16], strides = [1, 1]} : vector<8x20xf32> to vector<8x16xf32>
    %606 = vector.broadcast %381 : f32 to vector<8x16xf32>
    %607 = arith.mulf %605, %606 : vector<8x16xf32>
    %608 = arith.addf %604, %607 : vector<8x16xf32>
    %609 = vector.extract_strided_slice %596 {offsets = [0, 3], sizes = [8, 16], strides = [1, 1]} : vector<8x20xf32> to vector<8x16xf32>
    %610 = vector.broadcast %383 : f32 to vector<8x16xf32>
    %611 = arith.mulf %609, %610 : vector<8x16xf32>
    %612 = arith.addf %608, %611 : vector<8x16xf32>
    %613 = vector.extract_strided_slice %596 {offsets = [0, 4], sizes = [8, 16], strides = [1, 1]} : vector<8x20xf32> to vector<8x16xf32>
    %614 = vector.broadcast %385 : f32 to vector<8x16xf32>
    %615 = arith.mulf %613, %614 : vector<8x16xf32>
    %616 = arith.addf %612, %615 : vector<8x16xf32>
    %c3_i32_99 = arith.constant 3 : i32
    %617 = arith.addi %540, %c3_i32_99 : i32
    %618 = arith.index_cast %c1_i32_37 : i32 to index
    %619 = arith.index_cast %617 : i32 to index
    %c0_100 = arith.constant 0 : index
    %620 = vector.load %arg5[%618, %619, %c0_100] : memref<4x20x20xf32, #tpu.memory_space<vmem>>, vector<1x8x20xf32>
    %621 = vector.shape_cast %620 : vector<1x8x20xf32> to vector<8x20xf32>
    %622 = vector.extract_strided_slice %621 {offsets = [0, 0], sizes = [8, 16], strides = [1, 1]} : vector<8x20xf32> to vector<8x16xf32>
    %623 = vector.broadcast %387 : f32 to vector<8x16xf32>
    %624 = arith.mulf %622, %623 : vector<8x16xf32>
    %625 = arith.addf %616, %624 : vector<8x16xf32>
    %626 = vector.extract_strided_slice %621 {offsets = [0, 1], sizes = [8, 16], strides = [1, 1]} : vector<8x20xf32> to vector<8x16xf32>
    %627 = vector.broadcast %389 : f32 to vector<8x16xf32>
    %628 = arith.mulf %626, %627 : vector<8x16xf32>
    %629 = arith.addf %625, %628 : vector<8x16xf32>
    %630 = vector.extract_strided_slice %621 {offsets = [0, 2], sizes = [8, 16], strides = [1, 1]} : vector<8x20xf32> to vector<8x16xf32>
    %631 = vector.broadcast %391 : f32 to vector<8x16xf32>
    %632 = arith.mulf %630, %631 : vector<8x16xf32>
    %633 = arith.addf %629, %632 : vector<8x16xf32>
    %634 = vector.extract_strided_slice %621 {offsets = [0, 3], sizes = [8, 16], strides = [1, 1]} : vector<8x20xf32> to vector<8x16xf32>
    %635 = vector.broadcast %393 : f32 to vector<8x16xf32>
    %636 = arith.mulf %634, %635 : vector<8x16xf32>
    %637 = arith.addf %633, %636 : vector<8x16xf32>
    %638 = vector.extract_strided_slice %621 {offsets = [0, 4], sizes = [8, 16], strides = [1, 1]} : vector<8x20xf32> to vector<8x16xf32>
    %639 = vector.broadcast %395 : f32 to vector<8x16xf32>
    %640 = arith.mulf %638, %639 : vector<8x16xf32>
    %641 = arith.addf %637, %640 : vector<8x16xf32>
    %c4_i32_101 = arith.constant 4 : i32
    %642 = arith.addi %540, %c4_i32_101 : i32
    %643 = arith.index_cast %c1_i32_37 : i32 to index
    %644 = arith.index_cast %642 : i32 to index
    %c0_102 = arith.constant 0 : index
    %645 = vector.load %arg5[%643, %644, %c0_102] : memref<4x20x20xf32, #tpu.memory_space<vmem>>, vector<1x8x20xf32>
    %646 = vector.shape_cast %645 : vector<1x8x20xf32> to vector<8x20xf32>
    %647 = vector.extract_strided_slice %646 {offsets = [0, 0], sizes = [8, 16], strides = [1, 1]} : vector<8x20xf32> to vector<8x16xf32>
    %648 = vector.broadcast %397 : f32 to vector<8x16xf32>
    %649 = arith.mulf %647, %648 : vector<8x16xf32>
    %650 = arith.addf %641, %649 : vector<8x16xf32>
    %651 = vector.extract_strided_slice %646 {offsets = [0, 1], sizes = [8, 16], strides = [1, 1]} : vector<8x20xf32> to vector<8x16xf32>
    %652 = vector.broadcast %399 : f32 to vector<8x16xf32>
    %653 = arith.mulf %651, %652 : vector<8x16xf32>
    %654 = arith.addf %650, %653 : vector<8x16xf32>
    %655 = vector.extract_strided_slice %646 {offsets = [0, 2], sizes = [8, 16], strides = [1, 1]} : vector<8x20xf32> to vector<8x16xf32>
    %656 = vector.broadcast %401 : f32 to vector<8x16xf32>
    %657 = arith.mulf %655, %656 : vector<8x16xf32>
    %658 = arith.addf %654, %657 : vector<8x16xf32>
    %659 = vector.extract_strided_slice %646 {offsets = [0, 3], sizes = [8, 16], strides = [1, 1]} : vector<8x20xf32> to vector<8x16xf32>
    %660 = vector.broadcast %403 : f32 to vector<8x16xf32>
    %661 = arith.mulf %659, %660 : vector<8x16xf32>
    %662 = arith.addf %658, %661 : vector<8x16xf32>
    %663 = vector.extract_strided_slice %646 {offsets = [0, 4], sizes = [8, 16], strides = [1, 1]} : vector<8x20xf32> to vector<8x16xf32>
    %664 = vector.broadcast %405 : f32 to vector<8x16xf32>
    %665 = arith.mulf %663, %664 : vector<8x16xf32>
    %666 = arith.addf %662, %665 : vector<8x16xf32>
    %c0_103 = arith.constant 0 : index
    %667 = arith.index_cast %c1_i32_37 : i32 to index
    %668 = arith.index_cast %540 : i32 to index
    %c0_104 = arith.constant 0 : index
    %669 = vector.load %arg4[%c0_103, %667, %668, %c0_104] : memref<1x4x16x16xf32, #tpu.memory_space<vmem>>, vector<1x1x8x16xf32>
    %670 = vector.shape_cast %669 : vector<1x1x8x16xf32> to vector<8x16xf32>
    %671 = vector.shape_cast %666 : vector<8x16xf32> to vector<1x1x8x16xf32>
    tpu.vector_store %arg4[%c0_103, %667, %668, %c0_104], %671 {strides = array<i32>} : memref<1x4x16x16xf32, #tpu.memory_space<vmem>>, vector<1x1x8x16xf32>,
    %c2_i32_105 = arith.constant 2 : i32
    %c2_i32_106 = arith.constant 2 : i32
    %c4_i32_107 = arith.constant 4 : i32
    %672 = arith.muli %arg1, %c4_i32_107 : i32
    %673 = arith.addi %672, %c2_i32_106 : i32
    %c0_108 = arith.constant 0 : index
    %674 = arith.index_cast %c2_i32_106 : i32 to index
    %c0_109 = arith.constant 0 : index
    %c0_110 = arith.constant 0 : index
    %675 = vector.load %arg3[%c0_108, %674, %c0_109, %c0_110] : memref<1x4x16x16xf32, #tpu.memory_space<vmem>>, vector<1x1x16x16xf32>
    %676 = vector.shape_cast %675 : vector<1x1x16x16xf32> to vector<16x16xf32>
    %cst_111 = arith.constant 0.000000e+00 : f32
    %677 = vector.broadcast %cst_111 : f32 to vector<16x2xf32>
    %cst_112 = arith.constant 0.000000e+00 : f32
    %678 = vector.broadcast %cst_112 : f32 to vector<2x20xf32>
    %679 = arith.index_cast %c2_i32_106 : i32 to index
    %c0_113 = arith.constant 0 : index
    %c0_114 = arith.constant 0 : index
    %680 = vector.load %arg5[%679, %c0_113, %c0_114] : memref<4x20x20xf32, #tpu.memory_space<vmem>>, vector<1x2x20xf32>
    %681 = vector.shape_cast %680 : vector<1x2x20xf32> to vector<2x20xf32>
    %682 = vector.shape_cast %678 : vector<2x20xf32> to vector<1x2x20xf32>
    tpu.vector_store %arg5[%679, %c0_113, %c0_114], %682 {strides = array<i32>} : memref<4x20x20xf32, #tpu.memory_space<vmem>>, vector<1x2x20xf32>,
    %683 = arith.index_cast %c2_i32_106 : i32 to index
    %c18_115 = arith.constant 18 : index
    %c0_116 = arith.constant 0 : index
    %684 = vector.load %arg5[%683, %c18_115, %c0_116] : memref<4x20x20xf32, #tpu.memory_space<vmem>>, vector<1x2x20xf32>
    %685 = vector.shape_cast %684 : vector<1x2x20xf32> to vector<2x20xf32>
    %686 = vector.shape_cast %678 : vector<2x20xf32> to vector<1x2x20xf32>
    tpu.vector_store %arg5[%683, %c18_115, %c0_116], %686 {strides = array<i32>} : memref<4x20x20xf32, #tpu.memory_space<vmem>>, vector<1x2x20xf32>,
    %687 = tpu.concatenate %677, %676, %677 in 1 : vector<16x2xf32>, vector<16x16xf32>, vector<16x2xf32> -> vector<16x20xf32>
    %688 = arith.index_cast %c2_i32_106 : i32 to index
    %c2_117 = arith.constant 2 : index
    %c0_118 = arith.constant 0 : index
    %689 = vector.load %arg5[%688, %c2_117, %c0_118] : memref<4x20x20xf32, #tpu.memory_space<vmem>>, vector<1x16x20xf32>
    %690 = vector.shape_cast %689 : vector<1x16x20xf32> to vector<16x20xf32>
    %691 = vector.shape_cast %687 : vector<16x20xf32> to vector<1x16x20xf32>
    tpu.vector_store %arg5[%688, %c2_117, %c0_118], %691 {strides = array<i32>} : memref<4x20x20xf32, #tpu.memory_space<vmem>>, vector<1x16x20xf32>,
    %c0_119 = arith.constant 0 : index
    %692 = arith.index_cast %673 : i32 to index
    %693 = memref.load %arg2[%c0_119, %692] : memref<25x4xf32, #tpu.memory_space<smem>>
    %c1_120 = arith.constant 1 : index
    %694 = arith.index_cast %673 : i32 to index
    %695 = memref.load %arg2[%c1_120, %694] : memref<25x4xf32, #tpu.memory_space<smem>>
    %c2_121 = arith.constant 2 : index
    %696 = arith.index_cast %673 : i32 to index
    %697 = memref.load %arg2[%c2_121, %696] : memref<25x4xf32, #tpu.memory_space<smem>>
    %c3_122 = arith.constant 3 : index
    %698 = arith.index_cast %673 : i32 to index
    %699 = memref.load %arg2[%c3_122, %698] : memref<25x4xf32, #tpu.memory_space<smem>>
    %c4_123 = arith.constant 4 : index
    %700 = arith.index_cast %673 : i32 to index
    %701 = memref.load %arg2[%c4_123, %700] : memref<25x4xf32, #tpu.memory_space<smem>>
    %c5_124 = arith.constant 5 : index
    %702 = arith.index_cast %673 : i32 to index
    %703 = memref.load %arg2[%c5_124, %702] : memref<25x4xf32, #tpu.memory_space<smem>>
    %c6_125 = arith.constant 6 : index
    %704 = arith.index_cast %673 : i32 to index
    %705 = memref.load %arg2[%c6_125, %704] : memref<25x4xf32, #tpu.memory_space<smem>>
    %c7_126 = arith.constant 7 : index
    %706 = arith.index_cast %673 : i32 to index
    %707 = memref.load %arg2[%c7_126, %706] : memref<25x4xf32, #tpu.memory_space<smem>>
    %c8_127 = arith.constant 8 : index
    %708 = arith.index_cast %673 : i32 to index
    %709 = memref.load %arg2[%c8_127, %708] : memref<25x4xf32, #tpu.memory_space<smem>>
    %c9_128 = arith.constant 9 : index
    %710 = arith.index_cast %673 : i32 to index
    %711 = memref.load %arg2[%c9_128, %710] : memref<25x4xf32, #tpu.memory_space<smem>>
    %c10_129 = arith.constant 10 : index
    %712 = arith.index_cast %673 : i32 to index
    %713 = memref.load %arg2[%c10_129, %712] : memref<25x4xf32, #tpu.memory_space<smem>>
    %c11_130 = arith.constant 11 : index
    %714 = arith.index_cast %673 : i32 to index
    %715 = memref.load %arg2[%c11_130, %714] : memref<25x4xf32, #tpu.memory_space<smem>>
    %c12_131 = arith.constant 12 : index
    %716 = arith.index_cast %673 : i32 to index
    %717 = memref.load %arg2[%c12_131, %716] : memref<25x4xf32, #tpu.memory_space<smem>>
    %c13_132 = arith.constant 13 : index
    %718 = arith.index_cast %673 : i32 to index
    %719 = memref.load %arg2[%c13_132, %718] : memref<25x4xf32, #tpu.memory_space<smem>>
    %c14_133 = arith.constant 14 : index
    %720 = arith.index_cast %673 : i32 to index
    %721 = memref.load %arg2[%c14_133, %720] : memref<25x4xf32, #tpu.memory_space<smem>>
    %c15_134 = arith.constant 15 : index
    %722 = arith.index_cast %673 : i32 to index
    %723 = memref.load %arg2[%c15_134, %722] : memref<25x4xf32, #tpu.memory_space<smem>>
    %c16_135 = arith.constant 16 : index
    %724 = arith.index_cast %673 : i32 to index
    %725 = memref.load %arg2[%c16_135, %724] : memref<25x4xf32, #tpu.memory_space<smem>>
    %c17_136 = arith.constant 17 : index
    %726 = arith.index_cast %673 : i32 to index
    %727 = memref.load %arg2[%c17_136, %726] : memref<25x4xf32, #tpu.memory_space<smem>>
    %c18_137 = arith.constant 18 : index
    %728 = arith.index_cast %673 : i32 to index
    %729 = memref.load %arg2[%c18_137, %728] : memref<25x4xf32, #tpu.memory_space<smem>>
    %c19_138 = arith.constant 19 : index
    %730 = arith.index_cast %673 : i32 to index
    %731 = memref.load %arg2[%c19_138, %730] : memref<25x4xf32, #tpu.memory_space<smem>>
    %c20_139 = arith.constant 20 : index
    %732 = arith.index_cast %673 : i32 to index
    %733 = memref.load %arg2[%c20_139, %732] : memref<25x4xf32, #tpu.memory_space<smem>>
    %c21_140 = arith.constant 21 : index
    %734 = arith.index_cast %673 : i32 to index
    %735 = memref.load %arg2[%c21_140, %734] : memref<25x4xf32, #tpu.memory_space<smem>>
    %c22_141 = arith.constant 22 : index
    %736 = arith.index_cast %673 : i32 to index
    %737 = memref.load %arg2[%c22_141, %736] : memref<25x4xf32, #tpu.memory_space<smem>>
    %c23_142 = arith.constant 23 : index
    %738 = arith.index_cast %673 : i32 to index
    %739 = memref.load %arg2[%c23_142, %738] : memref<25x4xf32, #tpu.memory_space<smem>>
    %c24_143 = arith.constant 24 : index
    %740 = arith.index_cast %673 : i32 to index
    %741 = memref.load %arg2[%c24_143, %740] : memref<25x4xf32, #tpu.memory_space<smem>>
    %c0_i32_144 = arith.constant 0 : i32
    %c8_i32_145 = arith.constant 8 : i32
    %742 = arith.muli %c0_i32_144, %c8_i32_145 : i32
    %743 = tpu.assume_multiple %742, 8 : i32
    %cst_146 = arith.constant 0.000000e+00 : f32
    %744 = vector.broadcast %cst_146 : f32 to vector<8x16xf32>
    %c0_i32_147 = arith.constant 0 : i32
    %745 = arith.addi %743, %c0_i32_147 : i32
    %746 = arith.index_cast %c2_i32_106 : i32 to index
    %747 = arith.index_cast %745 : i32 to index
    %c0_148 = arith.constant 0 : index
    %748 = vector.load %arg5[%746, %747, %c0_148] : memref<4x20x20xf32, #tpu.memory_space<vmem>>, vector<1x8x20xf32>
    %749 = vector.shape_cast %748 : vector<1x8x20xf32> to vector<8x20xf32>
    %750 = vector.extract_strided_slice %749 {offsets = [0, 0], sizes = [8, 16], strides = [1, 1]} : vector<8x20xf32> to vector<8x16xf32>
    %751 = vector.broadcast %693 : f32 to vector<8x16xf32>
    %752 = arith.mulf %750, %751 : vector<8x16xf32>
    %753 = arith.addf %744, %752 : vector<8x16xf32>
    %754 = vector.extract_strided_slice %749 {offsets = [0, 1], sizes = [8, 16], strides = [1, 1]} : vector<8x20xf32> to vector<8x16xf32>
    %755 = vector.broadcast %695 : f32 to vector<8x16xf32>
    %756 = arith.mulf %754, %755 : vector<8x16xf32>
    %757 = arith.addf %753, %756 : vector<8x16xf32>
    %758 = vector.extract_strided_slice %749 {offsets = [0, 2], sizes = [8, 16], strides = [1, 1]} : vector<8x20xf32> to vector<8x16xf32>
    %759 = vector.broadcast %697 : f32 to vector<8x16xf32>
    %760 = arith.mulf %758, %759 : vector<8x16xf32>
    %761 = arith.addf %757, %760 : vector<8x16xf32>
    %762 = vector.extract_strided_slice %749 {offsets = [0, 3], sizes = [8, 16], strides = [1, 1]} : vector<8x20xf32> to vector<8x16xf32>
    %763 = vector.broadcast %699 : f32 to vector<8x16xf32>
    %764 = arith.mulf %762, %763 : vector<8x16xf32>
    %765 = arith.addf %761, %764 : vector<8x16xf32>
    %766 = vector.extract_strided_slice %749 {offsets = [0, 4], sizes = [8, 16], strides = [1, 1]} : vector<8x20xf32> to vector<8x16xf32>
    %767 = vector.broadcast %701 : f32 to vector<8x16xf32>
    %768 = arith.mulf %766, %767 : vector<8x16xf32>
    %769 = arith.addf %765, %768 : vector<8x16xf32>
    %c1_i32_149 = arith.constant 1 : i32
    %770 = arith.addi %743, %c1_i32_149 : i32
    %771 = arith.index_cast %c2_i32_106 : i32 to index
    %772 = arith.index_cast %770 : i32 to index
    %c0_150 = arith.constant 0 : index
    %773 = vector.load %arg5[%771, %772, %c0_150] : memref<4x20x20xf32, #tpu.memory_space<vmem>>, vector<1x8x20xf32>
    %774 = vector.shape_cast %773 : vector<1x8x20xf32> to vector<8x20xf32>
    %775 = vector.extract_strided_slice %774 {offsets = [0, 0], sizes = [8, 16], strides = [1, 1]} : vector<8x20xf32> to vector<8x16xf32>
    %776 = vector.broadcast %703 : f32 to vector<8x16xf32>
    %777 = arith.mulf %775, %776 : vector<8x16xf32>
    %778 = arith.addf %769, %777 : vector<8x16xf32>
    %779 = vector.extract_strided_slice %774 {offsets = [0, 1], sizes = [8, 16], strides = [1, 1]} : vector<8x20xf32> to vector<8x16xf32>
    %780 = vector.broadcast %705 : f32 to vector<8x16xf32>
    %781 = arith.mulf %779, %780 : vector<8x16xf32>
    %782 = arith.addf %778, %781 : vector<8x16xf32>
    %783 = vector.extract_strided_slice %774 {offsets = [0, 2], sizes = [8, 16], strides = [1, 1]} : vector<8x20xf32> to vector<8x16xf32>
    %784 = vector.broadcast %707 : f32 to vector<8x16xf32>
    %785 = arith.mulf %783, %784 : vector<8x16xf32>
    %786 = arith.addf %782, %785 : vector<8x16xf32>
    %787 = vector.extract_strided_slice %774 {offsets = [0, 3], sizes = [8, 16], strides = [1, 1]} : vector<8x20xf32> to vector<8x16xf32>
    %788 = vector.broadcast %709 : f32 to vector<8x16xf32>
    %789 = arith.mulf %787, %788 : vector<8x16xf32>
    %790 = arith.addf %786, %789 : vector<8x16xf32>
    %791 = vector.extract_strided_slice %774 {offsets = [0, 4], sizes = [8, 16], strides = [1, 1]} : vector<8x20xf32> to vector<8x16xf32>
    %792 = vector.broadcast %711 : f32 to vector<8x16xf32>
    %793 = arith.mulf %791, %792 : vector<8x16xf32>
    %794 = arith.addf %790, %793 : vector<8x16xf32>
    %c2_i32_151 = arith.constant 2 : i32
    %795 = arith.addi %743, %c2_i32_151 : i32
    %796 = arith.index_cast %c2_i32_106 : i32 to index
    %797 = arith.index_cast %795 : i32 to index
    %c0_152 = arith.constant 0 : index
    %798 = vector.load %arg5[%796, %797, %c0_152] : memref<4x20x20xf32, #tpu.memory_space<vmem>>, vector<1x8x20xf32>
    %799 = vector.shape_cast %798 : vector<1x8x20xf32> to vector<8x20xf32>
    %800 = vector.extract_strided_slice %799 {offsets = [0, 0], sizes = [8, 16], strides = [1, 1]} : vector<8x20xf32> to vector<8x16xf32>
    %801 = vector.broadcast %713 : f32 to vector<8x16xf32>
    %802 = arith.mulf %800, %801 : vector<8x16xf32>
    %803 = arith.addf %794, %802 : vector<8x16xf32>
    %804 = vector.extract_strided_slice %799 {offsets = [0, 1], sizes = [8, 16], strides = [1, 1]} : vector<8x20xf32> to vector<8x16xf32>
    %805 = vector.broadcast %715 : f32 to vector<8x16xf32>
    %806 = arith.mulf %804, %805 : vector<8x16xf32>
    %807 = arith.addf %803, %806 : vector<8x16xf32>
    %808 = vector.extract_strided_slice %799 {offsets = [0, 2], sizes = [8, 16], strides = [1, 1]} : vector<8x20xf32> to vector<8x16xf32>
    %809 = vector.broadcast %717 : f32 to vector<8x16xf32>
    %810 = arith.mulf %808, %809 : vector<8x16xf32>
    %811 = arith.addf %807, %810 : vector<8x16xf32>
    %812 = vector.extract_strided_slice %799 {offsets = [0, 3], sizes = [8, 16], strides = [1, 1]} : vector<8x20xf32> to vector<8x16xf32>
    %813 = vector.broadcast %719 : f32 to vector<8x16xf32>
    %814 = arith.mulf %812, %813 : vector<8x16xf32>
    %815 = arith.addf %811, %814 : vector<8x16xf32>
    %816 = vector.extract_strided_slice %799 {offsets = [0, 4], sizes = [8, 16], strides = [1, 1]} : vector<8x20xf32> to vector<8x16xf32>
    %817 = vector.broadcast %721 : f32 to vector<8x16xf32>
    %818 = arith.mulf %816, %817 : vector<8x16xf32>
    %819 = arith.addf %815, %818 : vector<8x16xf32>
    %c3_i32_153 = arith.constant 3 : i32
    %820 = arith.addi %743, %c3_i32_153 : i32
    %821 = arith.index_cast %c2_i32_106 : i32 to index
    %822 = arith.index_cast %820 : i32 to index
    %c0_154 = arith.constant 0 : index
    %823 = vector.load %arg5[%821, %822, %c0_154] : memref<4x20x20xf32, #tpu.memory_space<vmem>>, vector<1x8x20xf32>
    %824 = vector.shape_cast %823 : vector<1x8x20xf32> to vector<8x20xf32>
    %825 = vector.extract_strided_slice %824 {offsets = [0, 0], sizes = [8, 16], strides = [1, 1]} : vector<8x20xf32> to vector<8x16xf32>
    %826 = vector.broadcast %723 : f32 to vector<8x16xf32>
    %827 = arith.mulf %825, %826 : vector<8x16xf32>
    %828 = arith.addf %819, %827 : vector<8x16xf32>
    %829 = vector.extract_strided_slice %824 {offsets = [0, 1], sizes = [8, 16], strides = [1, 1]} : vector<8x20xf32> to vector<8x16xf32>
    %830 = vector.broadcast %725 : f32 to vector<8x16xf32>
    %831 = arith.mulf %829, %830 : vector<8x16xf32>
    %832 = arith.addf %828, %831 : vector<8x16xf32>
    %833 = vector.extract_strided_slice %824 {offsets = [0, 2], sizes = [8, 16], strides = [1, 1]} : vector<8x20xf32> to vector<8x16xf32>
    %834 = vector.broadcast %727 : f32 to vector<8x16xf32>
    %835 = arith.mulf %833, %834 : vector<8x16xf32>
    %836 = arith.addf %832, %835 : vector<8x16xf32>
    %837 = vector.extract_strided_slice %824 {offsets = [0, 3], sizes = [8, 16], strides = [1, 1]} : vector<8x20xf32> to vector<8x16xf32>
    %838 = vector.broadcast %729 : f32 to vector<8x16xf32>
    %839 = arith.mulf %837, %838 : vector<8x16xf32>
    %840 = arith.addf %836, %839 : vector<8x16xf32>
    %841 = vector.extract_strided_slice %824 {offsets = [0, 4], sizes = [8, 16], strides = [1, 1]} : vector<8x20xf32> to vector<8x16xf32>
    %842 = vector.broadcast %731 : f32 to vector<8x16xf32>
    %843 = arith.mulf %841, %842 : vector<8x16xf32>
    %844 = arith.addf %840, %843 : vector<8x16xf32>
    %c4_i32_155 = arith.constant 4 : i32
    %845 = arith.addi %743, %c4_i32_155 : i32
    %846 = arith.index_cast %c2_i32_106 : i32 to index
    %847 = arith.index_cast %845 : i32 to index
    %c0_156 = arith.constant 0 : index
    %848 = vector.load %arg5[%846, %847, %c0_156] : memref<4x20x20xf32, #tpu.memory_space<vmem>>, vector<1x8x20xf32>
    %849 = vector.shape_cast %848 : vector<1x8x20xf32> to vector<8x20xf32>
    %850 = vector.extract_strided_slice %849 {offsets = [0, 0], sizes = [8, 16], strides = [1, 1]} : vector<8x20xf32> to vector<8x16xf32>
    %851 = vector.broadcast %733 : f32 to vector<8x16xf32>
    %852 = arith.mulf %850, %851 : vector<8x16xf32>
    %853 = arith.addf %844, %852 : vector<8x16xf32>
    %854 = vector.extract_strided_slice %849 {offsets = [0, 1], sizes = [8, 16], strides = [1, 1]} : vector<8x20xf32> to vector<8x16xf32>
    %855 = vector.broadcast %735 : f32 to vector<8x16xf32>
    %856 = arith.mulf %854, %855 : vector<8x16xf32>
    %857 = arith.addf %853, %856 : vector<8x16xf32>
    %858 = vector.extract_strided_slice %849 {offsets = [0, 2], sizes = [8, 16], strides = [1, 1]} : vector<8x20xf32> to vector<8x16xf32>
    %859 = vector.broadcast %737 : f32 to vector<8x16xf32>
    %860 = arith.mulf %858, %859 : vector<8x16xf32>
    %861 = arith.addf %857, %860 : vector<8x16xf32>
    %862 = vector.extract_strided_slice %849 {offsets = [0, 3], sizes = [8, 16], strides = [1, 1]} : vector<8x20xf32> to vector<8x16xf32>
    %863 = vector.broadcast %739 : f32 to vector<8x16xf32>
    %864 = arith.mulf %862, %863 : vector<8x16xf32>
    %865 = arith.addf %861, %864 : vector<8x16xf32>
    %866 = vector.extract_strided_slice %849 {offsets = [0, 4], sizes = [8, 16], strides = [1, 1]} : vector<8x20xf32> to vector<8x16xf32>
    %867 = vector.broadcast %741 : f32 to vector<8x16xf32>
    %868 = arith.mulf %866, %867 : vector<8x16xf32>
    %869 = arith.addf %865, %868 : vector<8x16xf32>
    %c0_157 = arith.constant 0 : index
    %870 = arith.index_cast %c2_i32_106 : i32 to index
    %871 = arith.index_cast %743 : i32 to index
    %c0_158 = arith.constant 0 : index
    %872 = vector.load %arg4[%c0_157, %870, %871, %c0_158] : memref<1x4x16x16xf32, #tpu.memory_space<vmem>>, vector<1x1x8x16xf32>
    %873 = vector.shape_cast %872 : vector<1x1x8x16xf32> to vector<8x16xf32>
    %874 = vector.shape_cast %869 : vector<8x16xf32> to vector<1x1x8x16xf32>
    tpu.vector_store %arg4[%c0_157, %870, %871, %c0_158], %874 {strides = array<i32>} : memref<1x4x16x16xf32, #tpu.memory_space<vmem>>, vector<1x1x8x16xf32>,
    %c1_i32_159 = arith.constant 1 : i32
    %c8_i32_160 = arith.constant 8 : i32
    %875 = arith.muli %c1_i32_159, %c8_i32_160 : i32
    %876 = tpu.assume_multiple %875, 8 : i32
    %cst_161 = arith.constant 0.000000e+00 : f32
    %877 = vector.broadcast %cst_161 : f32 to vector<8x16xf32>
    %c0_i32_162 = arith.constant 0 : i32
    %878 = arith.addi %876, %c0_i32_162 : i32
    %879 = arith.index_cast %c2_i32_106 : i32 to index
    %880 = arith.index_cast %878 : i32 to index
    %c0_163 = arith.constant 0 : index
    %881 = vector.load %arg5[%879, %880, %c0_163] : memref<4x20x20xf32, #tpu.memory_space<vmem>>, vector<1x8x20xf32>
    %882 = vector.shape_cast %881 : vector<1x8x20xf32> to vector<8x20xf32>
    %883 = vector.extract_strided_slice %882 {offsets = [0, 0], sizes = [8, 16], strides = [1, 1]} : vector<8x20xf32> to vector<8x16xf32>
    %884 = vector.broadcast %693 : f32 to vector<8x16xf32>
    %885 = arith.mulf %883, %884 : vector<8x16xf32>
    %886 = arith.addf %877, %885 : vector<8x16xf32>
    %887 = vector.extract_strided_slice %882 {offsets = [0, 1], sizes = [8, 16], strides = [1, 1]} : vector<8x20xf32> to vector<8x16xf32>
    %888 = vector.broadcast %695 : f32 to vector<8x16xf32>
    %889 = arith.mulf %887, %888 : vector<8x16xf32>
    %890 = arith.addf %886, %889 : vector<8x16xf32>
    %891 = vector.extract_strided_slice %882 {offsets = [0, 2], sizes = [8, 16], strides = [1, 1]} : vector<8x20xf32> to vector<8x16xf32>
    %892 = vector.broadcast %697 : f32 to vector<8x16xf32>
    %893 = arith.mulf %891, %892 : vector<8x16xf32>
    %894 = arith.addf %890, %893 : vector<8x16xf32>
    %895 = vector.extract_strided_slice %882 {offsets = [0, 3], sizes = [8, 16], strides = [1, 1]} : vector<8x20xf32> to vector<8x16xf32>
    %896 = vector.broadcast %699 : f32 to vector<8x16xf32>
    %897 = arith.mulf %895, %896 : vector<8x16xf32>
    %898 = arith.addf %894, %897 : vector<8x16xf32>
    %899 = vector.extract_strided_slice %882 {offsets = [0, 4], sizes = [8, 16], strides = [1, 1]} : vector<8x20xf32> to vector<8x16xf32>
    %900 = vector.broadcast %701 : f32 to vector<8x16xf32>
    %901 = arith.mulf %899, %900 : vector<8x16xf32>
    %902 = arith.addf %898, %901 : vector<8x16xf32>
    %c1_i32_164 = arith.constant 1 : i32
    %903 = arith.addi %876, %c1_i32_164 : i32
    %904 = arith.index_cast %c2_i32_106 : i32 to index
    %905 = arith.index_cast %903 : i32 to index
    %c0_165 = arith.constant 0 : index
    %906 = vector.load %arg5[%904, %905, %c0_165] : memref<4x20x20xf32, #tpu.memory_space<vmem>>, vector<1x8x20xf32>
    %907 = vector.shape_cast %906 : vector<1x8x20xf32> to vector<8x20xf32>
    %908 = vector.extract_strided_slice %907 {offsets = [0, 0], sizes = [8, 16], strides = [1, 1]} : vector<8x20xf32> to vector<8x16xf32>
    %909 = vector.broadcast %703 : f32 to vector<8x16xf32>
    %910 = arith.mulf %908, %909 : vector<8x16xf32>
    %911 = arith.addf %902, %910 : vector<8x16xf32>
    %912 = vector.extract_strided_slice %907 {offsets = [0, 1], sizes = [8, 16], strides = [1, 1]} : vector<8x20xf32> to vector<8x16xf32>
    %913 = vector.broadcast %705 : f32 to vector<8x16xf32>
    %914 = arith.mulf %912, %913 : vector<8x16xf32>
    %915 = arith.addf %911, %914 : vector<8x16xf32>
    %916 = vector.extract_strided_slice %907 {offsets = [0, 2], sizes = [8, 16], strides = [1, 1]} : vector<8x20xf32> to vector<8x16xf32>
    %917 = vector.broadcast %707 : f32 to vector<8x16xf32>
    %918 = arith.mulf %916, %917 : vector<8x16xf32>
    %919 = arith.addf %915, %918 : vector<8x16xf32>
    %920 = vector.extract_strided_slice %907 {offsets = [0, 3], sizes = [8, 16], strides = [1, 1]} : vector<8x20xf32> to vector<8x16xf32>
    %921 = vector.broadcast %709 : f32 to vector<8x16xf32>
    %922 = arith.mulf %920, %921 : vector<8x16xf32>
    %923 = arith.addf %919, %922 : vector<8x16xf32>
    %924 = vector.extract_strided_slice %907 {offsets = [0, 4], sizes = [8, 16], strides = [1, 1]} : vector<8x20xf32> to vector<8x16xf32>
    %925 = vector.broadcast %711 : f32 to vector<8x16xf32>
    %926 = arith.mulf %924, %925 : vector<8x16xf32>
    %927 = arith.addf %923, %926 : vector<8x16xf32>
    %c2_i32_166 = arith.constant 2 : i32
    %928 = arith.addi %876, %c2_i32_166 : i32
    %929 = arith.index_cast %c2_i32_106 : i32 to index
    %930 = arith.index_cast %928 : i32 to index
    %c0_167 = arith.constant 0 : index
    %931 = vector.load %arg5[%929, %930, %c0_167] : memref<4x20x20xf32, #tpu.memory_space<vmem>>, vector<1x8x20xf32>
    %932 = vector.shape_cast %931 : vector<1x8x20xf32> to vector<8x20xf32>
    %933 = vector.extract_strided_slice %932 {offsets = [0, 0], sizes = [8, 16], strides = [1, 1]} : vector<8x20xf32> to vector<8x16xf32>
    %934 = vector.broadcast %713 : f32 to vector<8x16xf32>
    %935 = arith.mulf %933, %934 : vector<8x16xf32>
    %936 = arith.addf %927, %935 : vector<8x16xf32>
    %937 = vector.extract_strided_slice %932 {offsets = [0, 1], sizes = [8, 16], strides = [1, 1]} : vector<8x20xf32> to vector<8x16xf32>
    %938 = vector.broadcast %715 : f32 to vector<8x16xf32>
    %939 = arith.mulf %937, %938 : vector<8x16xf32>
    %940 = arith.addf %936, %939 : vector<8x16xf32>
    %941 = vector.extract_strided_slice %932 {offsets = [0, 2], sizes = [8, 16], strides = [1, 1]} : vector<8x20xf32> to vector<8x16xf32>
    %942 = vector.broadcast %717 : f32 to vector<8x16xf32>
    %943 = arith.mulf %941, %942 : vector<8x16xf32>
    %944 = arith.addf %940, %943 : vector<8x16xf32>
    %945 = vector.extract_strided_slice %932 {offsets = [0, 3], sizes = [8, 16], strides = [1, 1]} : vector<8x20xf32> to vector<8x16xf32>
    %946 = vector.broadcast %719 : f32 to vector<8x16xf32>
    %947 = arith.mulf %945, %946 : vector<8x16xf32>
    %948 = arith.addf %944, %947 : vector<8x16xf32>
    %949 = vector.extract_strided_slice %932 {offsets = [0, 4], sizes = [8, 16], strides = [1, 1]} : vector<8x20xf32> to vector<8x16xf32>
    %950 = vector.broadcast %721 : f32 to vector<8x16xf32>
    %951 = arith.mulf %949, %950 : vector<8x16xf32>
    %952 = arith.addf %948, %951 : vector<8x16xf32>
    %c3_i32_168 = arith.constant 3 : i32
    %953 = arith.addi %876, %c3_i32_168 : i32
    %954 = arith.index_cast %c2_i32_106 : i32 to index
    %955 = arith.index_cast %953 : i32 to index
    %c0_169 = arith.constant 0 : index
    %956 = vector.load %arg5[%954, %955, %c0_169] : memref<4x20x20xf32, #tpu.memory_space<vmem>>, vector<1x8x20xf32>
    %957 = vector.shape_cast %956 : vector<1x8x20xf32> to vector<8x20xf32>
    %958 = vector.extract_strided_slice %957 {offsets = [0, 0], sizes = [8, 16], strides = [1, 1]} : vector<8x20xf32> to vector<8x16xf32>
    %959 = vector.broadcast %723 : f32 to vector<8x16xf32>
    %960 = arith.mulf %958, %959 : vector<8x16xf32>
    %961 = arith.addf %952, %960 : vector<8x16xf32>
    %962 = vector.extract_strided_slice %957 {offsets = [0, 1], sizes = [8, 16], strides = [1, 1]} : vector<8x20xf32> to vector<8x16xf32>
    %963 = vector.broadcast %725 : f32 to vector<8x16xf32>
    %964 = arith.mulf %962, %963 : vector<8x16xf32>
    %965 = arith.addf %961, %964 : vector<8x16xf32>
    %966 = vector.extract_strided_slice %957 {offsets = [0, 2], sizes = [8, 16], strides = [1, 1]} : vector<8x20xf32> to vector<8x16xf32>
    %967 = vector.broadcast %727 : f32 to vector<8x16xf32>
    %968 = arith.mulf %966, %967 : vector<8x16xf32>
    %969 = arith.addf %965, %968 : vector<8x16xf32>
    %970 = vector.extract_strided_slice %957 {offsets = [0, 3], sizes = [8, 16], strides = [1, 1]} : vector<8x20xf32> to vector<8x16xf32>
    %971 = vector.broadcast %729 : f32 to vector<8x16xf32>
    %972 = arith.mulf %970, %971 : vector<8x16xf32>
    %973 = arith.addf %969, %972 : vector<8x16xf32>
    %974 = vector.extract_strided_slice %957 {offsets = [0, 4], sizes = [8, 16], strides = [1, 1]} : vector<8x20xf32> to vector<8x16xf32>
    %975 = vector.broadcast %731 : f32 to vector<8x16xf32>
    %976 = arith.mulf %974, %975 : vector<8x16xf32>
    %977 = arith.addf %973, %976 : vector<8x16xf32>
    %c4_i32_170 = arith.constant 4 : i32
    %978 = arith.addi %876, %c4_i32_170 : i32
    %979 = arith.index_cast %c2_i32_106 : i32 to index
    %980 = arith.index_cast %978 : i32 to index
    %c0_171 = arith.constant 0 : index
    %981 = vector.load %arg5[%979, %980, %c0_171] : memref<4x20x20xf32, #tpu.memory_space<vmem>>, vector<1x8x20xf32>
    %982 = vector.shape_cast %981 : vector<1x8x20xf32> to vector<8x20xf32>
    %983 = vector.extract_strided_slice %982 {offsets = [0, 0], sizes = [8, 16], strides = [1, 1]} : vector<8x20xf32> to vector<8x16xf32>
    %984 = vector.broadcast %733 : f32 to vector<8x16xf32>
    %985 = arith.mulf %983, %984 : vector<8x16xf32>
    %986 = arith.addf %977, %985 : vector<8x16xf32>
    %987 = vector.extract_strided_slice %982 {offsets = [0, 1], sizes = [8, 16], strides = [1, 1]} : vector<8x20xf32> to vector<8x16xf32>
    %988 = vector.broadcast %735 : f32 to vector<8x16xf32>
    %989 = arith.mulf %987, %988 : vector<8x16xf32>
    %990 = arith.addf %986, %989 : vector<8x16xf32>
    %991 = vector.extract_strided_slice %982 {offsets = [0, 2], sizes = [8, 16], strides = [1, 1]} : vector<8x20xf32> to vector<8x16xf32>
    %992 = vector.broadcast %737 : f32 to vector<8x16xf32>
    %993 = arith.mulf %991, %992 : vector<8x16xf32>
    %994 = arith.addf %990, %993 : vector<8x16xf32>
    %995 = vector.extract_strided_slice %982 {offsets = [0, 3], sizes = [8, 16], strides = [1, 1]} : vector<8x20xf32> to vector<8x16xf32>
    %996 = vector.broadcast %739 : f32 to vector<8x16xf32>
    %997 = arith.mulf %995, %996 : vector<8x16xf32>
    %998 = arith.addf %994, %997 : vector<8x16xf32>
    %999 = vector.extract_strided_slice %982 {offsets = [0, 4], sizes = [8, 16], strides = [1, 1]} : vector<8x20xf32> to vector<8x16xf32>
    %1000 = vector.broadcast %741 : f32 to vector<8x16xf32>
    %1001 = arith.mulf %999, %1000 : vector<8x16xf32>
    %1002 = arith.addf %998, %1001 : vector<8x16xf32>
    %c0_172 = arith.constant 0 : index
    %1003 = arith.index_cast %c2_i32_106 : i32 to index
    %1004 = arith.index_cast %876 : i32 to index
    %c0_173 = arith.constant 0 : index
    %1005 = vector.load %arg4[%c0_172, %1003, %1004, %c0_173] : memref<1x4x16x16xf32, #tpu.memory_space<vmem>>, vector<1x1x8x16xf32>
    %1006 = vector.shape_cast %1005 : vector<1x1x8x16xf32> to vector<8x16xf32>
    %1007 = vector.shape_cast %1002 : vector<8x16xf32> to vector<1x1x8x16xf32>
    tpu.vector_store %arg4[%c0_172, %1003, %1004, %c0_173], %1007 {strides = array<i32>} : memref<1x4x16x16xf32, #tpu.memory_space<vmem>>, vector<1x1x8x16xf32>,
    %c2_i32_174 = arith.constant 2 : i32
    %c3_i32_175 = arith.constant 3 : i32
    %c4_i32_176 = arith.constant 4 : i32
    %1008 = arith.muli %arg1, %c4_i32_176 : i32
    %1009 = arith.addi %1008, %c3_i32_175 : i32
    %c0_177 = arith.constant 0 : index
    %1010 = arith.index_cast %c3_i32_175 : i32 to index
    %c0_178 = arith.constant 0 : index
    %c0_179 = arith.constant 0 : index
    %1011 = vector.load %arg3[%c0_177, %1010, %c0_178, %c0_179] : memref<1x4x16x16xf32, #tpu.memory_space<vmem>>, vector<1x1x16x16xf32>
    %1012 = vector.shape_cast %1011 : vector<1x1x16x16xf32> to vector<16x16xf32>
    %cst_180 = arith.constant 0.000000e+00 : f32
    %1013 = vector.broadcast %cst_180 : f32 to vector<16x2xf32>
    %cst_181 = arith.constant 0.000000e+00 : f32
    %1014 = vector.broadcast %cst_181 : f32 to vector<2x20xf32>
    %1015 = arith.index_cast %c3_i32_175 : i32 to index
    %c0_182 = arith.constant 0 : index
    %c0_183 = arith.constant 0 : index
    %1016 = vector.load %arg5[%1015, %c0_182, %c0_183] : memref<4x20x20xf32, #tpu.memory_space<vmem>>, vector<1x2x20xf32>
    %1017 = vector.shape_cast %1016 : vector<1x2x20xf32> to vector<2x20xf32>
    %1018 = vector.shape_cast %1014 : vector<2x20xf32> to vector<1x2x20xf32>
    tpu.vector_store %arg5[%1015, %c0_182, %c0_183], %1018 {strides = array<i32>} : memref<4x20x20xf32, #tpu.memory_space<vmem>>, vector<1x2x20xf32>,
    %1019 = arith.index_cast %c3_i32_175 : i32 to index
    %c18_184 = arith.constant 18 : index
    %c0_185 = arith.constant 0 : index
    %1020 = vector.load %arg5[%1019, %c18_184, %c0_185] : memref<4x20x20xf32, #tpu.memory_space<vmem>>, vector<1x2x20xf32>
    %1021 = vector.shape_cast %1020 : vector<1x2x20xf32> to vector<2x20xf32>
    %1022 = vector.shape_cast %1014 : vector<2x20xf32> to vector<1x2x20xf32>
    tpu.vector_store %arg5[%1019, %c18_184, %c0_185], %1022 {strides = array<i32>} : memref<4x20x20xf32, #tpu.memory_space<vmem>>, vector<1x2x20xf32>,
    %1023 = tpu.concatenate %1013, %1012, %1013 in 1 : vector<16x2xf32>, vector<16x16xf32>, vector<16x2xf32> -> vector<16x20xf32>
    %1024 = arith.index_cast %c3_i32_175 : i32 to index
    %c2_186 = arith.constant 2 : index
    %c0_187 = arith.constant 0 : index
    %1025 = vector.load %arg5[%1024, %c2_186, %c0_187] : memref<4x20x20xf32, #tpu.memory_space<vmem>>, vector<1x16x20xf32>
    %1026 = vector.shape_cast %1025 : vector<1x16x20xf32> to vector<16x20xf32>
    %1027 = vector.shape_cast %1023 : vector<16x20xf32> to vector<1x16x20xf32>
    tpu.vector_store %arg5[%1024, %c2_186, %c0_187], %1027 {strides = array<i32>} : memref<4x20x20xf32, #tpu.memory_space<vmem>>, vector<1x16x20xf32>,
    %c0_188 = arith.constant 0 : index
    %1028 = arith.index_cast %1009 : i32 to index
    %1029 = memref.load %arg2[%c0_188, %1028] : memref<25x4xf32, #tpu.memory_space<smem>>
    %c1_189 = arith.constant 1 : index
    %1030 = arith.index_cast %1009 : i32 to index
    %1031 = memref.load %arg2[%c1_189, %1030] : memref<25x4xf32, #tpu.memory_space<smem>>
    %c2_190 = arith.constant 2 : index
    %1032 = arith.index_cast %1009 : i32 to index
    %1033 = memref.load %arg2[%c2_190, %1032] : memref<25x4xf32, #tpu.memory_space<smem>>
    %c3_191 = arith.constant 3 : index
    %1034 = arith.index_cast %1009 : i32 to index
    %1035 = memref.load %arg2[%c3_191, %1034] : memref<25x4xf32, #tpu.memory_space<smem>>
    %c4_192 = arith.constant 4 : index
    %1036 = arith.index_cast %1009 : i32 to index
    %1037 = memref.load %arg2[%c4_192, %1036] : memref<25x4xf32, #tpu.memory_space<smem>>
    %c5_193 = arith.constant 5 : index
    %1038 = arith.index_cast %1009 : i32 to index
    %1039 = memref.load %arg2[%c5_193, %1038] : memref<25x4xf32, #tpu.memory_space<smem>>
    %c6_194 = arith.constant 6 : index
    %1040 = arith.index_cast %1009 : i32 to index
    %1041 = memref.load %arg2[%c6_194, %1040] : memref<25x4xf32, #tpu.memory_space<smem>>
    %c7_195 = arith.constant 7 : index
    %1042 = arith.index_cast %1009 : i32 to index
    %1043 = memref.load %arg2[%c7_195, %1042] : memref<25x4xf32, #tpu.memory_space<smem>>
    %c8_196 = arith.constant 8 : index
    %1044 = arith.index_cast %1009 : i32 to index
    %1045 = memref.load %arg2[%c8_196, %1044] : memref<25x4xf32, #tpu.memory_space<smem>>
    %c9_197 = arith.constant 9 : index
    %1046 = arith.index_cast %1009 : i32 to index
    %1047 = memref.load %arg2[%c9_197, %1046] : memref<25x4xf32, #tpu.memory_space<smem>>
    %c10_198 = arith.constant 10 : index
    %1048 = arith.index_cast %1009 : i32 to index
    %1049 = memref.load %arg2[%c10_198, %1048] : memref<25x4xf32, #tpu.memory_space<smem>>
    %c11_199 = arith.constant 11 : index
    %1050 = arith.index_cast %1009 : i32 to index
    %1051 = memref.load %arg2[%c11_199, %1050] : memref<25x4xf32, #tpu.memory_space<smem>>
    %c12_200 = arith.constant 12 : index
    %1052 = arith.index_cast %1009 : i32 to index
    %1053 = memref.load %arg2[%c12_200, %1052] : memref<25x4xf32, #tpu.memory_space<smem>>
    %c13_201 = arith.constant 13 : index
    %1054 = arith.index_cast %1009 : i32 to index
    %1055 = memref.load %arg2[%c13_201, %1054] : memref<25x4xf32, #tpu.memory_space<smem>>
    %c14_202 = arith.constant 14 : index
    %1056 = arith.index_cast %1009 : i32 to index
    %1057 = memref.load %arg2[%c14_202, %1056] : memref<25x4xf32, #tpu.memory_space<smem>>
    %c15_203 = arith.constant 15 : index
    %1058 = arith.index_cast %1009 : i32 to index
    %1059 = memref.load %arg2[%c15_203, %1058] : memref<25x4xf32, #tpu.memory_space<smem>>
    %c16_204 = arith.constant 16 : index
    %1060 = arith.index_cast %1009 : i32 to index
    %1061 = memref.load %arg2[%c16_204, %1060] : memref<25x4xf32, #tpu.memory_space<smem>>
    %c17_205 = arith.constant 17 : index
    %1062 = arith.index_cast %1009 : i32 to index
    %1063 = memref.load %arg2[%c17_205, %1062] : memref<25x4xf32, #tpu.memory_space<smem>>
    %c18_206 = arith.constant 18 : index
    %1064 = arith.index_cast %1009 : i32 to index
    %1065 = memref.load %arg2[%c18_206, %1064] : memref<25x4xf32, #tpu.memory_space<smem>>
    %c19_207 = arith.constant 19 : index
    %1066 = arith.index_cast %1009 : i32 to index
    %1067 = memref.load %arg2[%c19_207, %1066] : memref<25x4xf32, #tpu.memory_space<smem>>
    %c20_208 = arith.constant 20 : index
    %1068 = arith.index_cast %1009 : i32 to index
    %1069 = memref.load %arg2[%c20_208, %1068] : memref<25x4xf32, #tpu.memory_space<smem>>
    %c21_209 = arith.constant 21 : index
    %1070 = arith.index_cast %1009 : i32 to index
    %1071 = memref.load %arg2[%c21_209, %1070] : memref<25x4xf32, #tpu.memory_space<smem>>
    %c22_210 = arith.constant 22 : index
    %1072 = arith.index_cast %1009 : i32 to index
    %1073 = memref.load %arg2[%c22_210, %1072] : memref<25x4xf32, #tpu.memory_space<smem>>
    %c23_211 = arith.constant 23 : index
    %1074 = arith.index_cast %1009 : i32 to index
    %1075 = memref.load %arg2[%c23_211, %1074] : memref<25x4xf32, #tpu.memory_space<smem>>
    %c24_212 = arith.constant 24 : index
    %1076 = arith.index_cast %1009 : i32 to index
    %1077 = memref.load %arg2[%c24_212, %1076] : memref<25x4xf32, #tpu.memory_space<smem>>
    %c0_i32_213 = arith.constant 0 : i32
    %c8_i32_214 = arith.constant 8 : i32
    %1078 = arith.muli %c0_i32_213, %c8_i32_214 : i32
    %1079 = tpu.assume_multiple %1078, 8 : i32
    %cst_215 = arith.constant 0.000000e+00 : f32
    %1080 = vector.broadcast %cst_215 : f32 to vector<8x16xf32>
    %c0_i32_216 = arith.constant 0 : i32
    %1081 = arith.addi %1079, %c0_i32_216 : i32
    %1082 = arith.index_cast %c3_i32_175 : i32 to index
    %1083 = arith.index_cast %1081 : i32 to index
    %c0_217 = arith.constant 0 : index
    %1084 = vector.load %arg5[%1082, %1083, %c0_217] : memref<4x20x20xf32, #tpu.memory_space<vmem>>, vector<1x8x20xf32>
    %1085 = vector.shape_cast %1084 : vector<1x8x20xf32> to vector<8x20xf32>
    %1086 = vector.extract_strided_slice %1085 {offsets = [0, 0], sizes = [8, 16], strides = [1, 1]} : vector<8x20xf32> to vector<8x16xf32>
    %1087 = vector.broadcast %1029 : f32 to vector<8x16xf32>
    %1088 = arith.mulf %1086, %1087 : vector<8x16xf32>
    %1089 = arith.addf %1080, %1088 : vector<8x16xf32>
    %1090 = vector.extract_strided_slice %1085 {offsets = [0, 1], sizes = [8, 16], strides = [1, 1]} : vector<8x20xf32> to vector<8x16xf32>
    %1091 = vector.broadcast %1031 : f32 to vector<8x16xf32>
    %1092 = arith.mulf %1090, %1091 : vector<8x16xf32>
    %1093 = arith.addf %1089, %1092 : vector<8x16xf32>
    %1094 = vector.extract_strided_slice %1085 {offsets = [0, 2], sizes = [8, 16], strides = [1, 1]} : vector<8x20xf32> to vector<8x16xf32>
    %1095 = vector.broadcast %1033 : f32 to vector<8x16xf32>
    %1096 = arith.mulf %1094, %1095 : vector<8x16xf32>
    %1097 = arith.addf %1093, %1096 : vector<8x16xf32>
    %1098 = vector.extract_strided_slice %1085 {offsets = [0, 3], sizes = [8, 16], strides = [1, 1]} : vector<8x20xf32> to vector<8x16xf32>
    %1099 = vector.broadcast %1035 : f32 to vector<8x16xf32>
    %1100 = arith.mulf %1098, %1099 : vector<8x16xf32>
    %1101 = arith.addf %1097, %1100 : vector<8x16xf32>
    %1102 = vector.extract_strided_slice %1085 {offsets = [0, 4], sizes = [8, 16], strides = [1, 1]} : vector<8x20xf32> to vector<8x16xf32>
    %1103 = vector.broadcast %1037 : f32 to vector<8x16xf32>
    %1104 = arith.mulf %1102, %1103 : vector<8x16xf32>
    %1105 = arith.addf %1101, %1104 : vector<8x16xf32>
    %c1_i32_218 = arith.constant 1 : i32
    %1106 = arith.addi %1079, %c1_i32_218 : i32
    %1107 = arith.index_cast %c3_i32_175 : i32 to index
    %1108 = arith.index_cast %1106 : i32 to index
    %c0_219 = arith.constant 0 : index
    %1109 = vector.load %arg5[%1107, %1108, %c0_219] : memref<4x20x20xf32, #tpu.memory_space<vmem>>, vector<1x8x20xf32>
    %1110 = vector.shape_cast %1109 : vector<1x8x20xf32> to vector<8x20xf32>
    %1111 = vector.extract_strided_slice %1110 {offsets = [0, 0], sizes = [8, 16], strides = [1, 1]} : vector<8x20xf32> to vector<8x16xf32>
    %1112 = vector.broadcast %1039 : f32 to vector<8x16xf32>
    %1113 = arith.mulf %1111, %1112 : vector<8x16xf32>
    %1114 = arith.addf %1105, %1113 : vector<8x16xf32>
    %1115 = vector.extract_strided_slice %1110 {offsets = [0, 1], sizes = [8, 16], strides = [1, 1]} : vector<8x20xf32> to vector<8x16xf32>
    %1116 = vector.broadcast %1041 : f32 to vector<8x16xf32>
    %1117 = arith.mulf %1115, %1116 : vector<8x16xf32>
    %1118 = arith.addf %1114, %1117 : vector<8x16xf32>
    %1119 = vector.extract_strided_slice %1110 {offsets = [0, 2], sizes = [8, 16], strides = [1, 1]} : vector<8x20xf32> to vector<8x16xf32>
    %1120 = vector.broadcast %1043 : f32 to vector<8x16xf32>
    %1121 = arith.mulf %1119, %1120 : vector<8x16xf32>
    %1122 = arith.addf %1118, %1121 : vector<8x16xf32>
    %1123 = vector.extract_strided_slice %1110 {offsets = [0, 3], sizes = [8, 16], strides = [1, 1]} : vector<8x20xf32> to vector<8x16xf32>
    %1124 = vector.broadcast %1045 : f32 to vector<8x16xf32>
    %1125 = arith.mulf %1123, %1124 : vector<8x16xf32>
    %1126 = arith.addf %1122, %1125 : vector<8x16xf32>
    %1127 = vector.extract_strided_slice %1110 {offsets = [0, 4], sizes = [8, 16], strides = [1, 1]} : vector<8x20xf32> to vector<8x16xf32>
    %1128 = vector.broadcast %1047 : f32 to vector<8x16xf32>
    %1129 = arith.mulf %1127, %1128 : vector<8x16xf32>
    %1130 = arith.addf %1126, %1129 : vector<8x16xf32>
    %c2_i32_220 = arith.constant 2 : i32
    %1131 = arith.addi %1079, %c2_i32_220 : i32
    %1132 = arith.index_cast %c3_i32_175 : i32 to index
    %1133 = arith.index_cast %1131 : i32 to index
    %c0_221 = arith.constant 0 : index
    %1134 = vector.load %arg5[%1132, %1133, %c0_221] : memref<4x20x20xf32, #tpu.memory_space<vmem>>, vector<1x8x20xf32>
    %1135 = vector.shape_cast %1134 : vector<1x8x20xf32> to vector<8x20xf32>
    %1136 = vector.extract_strided_slice %1135 {offsets = [0, 0], sizes = [8, 16], strides = [1, 1]} : vector<8x20xf32> to vector<8x16xf32>
    %1137 = vector.broadcast %1049 : f32 to vector<8x16xf32>
    %1138 = arith.mulf %1136, %1137 : vector<8x16xf32>
    %1139 = arith.addf %1130, %1138 : vector<8x16xf32>
    %1140 = vector.extract_strided_slice %1135 {offsets = [0, 1], sizes = [8, 16], strides = [1, 1]} : vector<8x20xf32> to vector<8x16xf32>
    %1141 = vector.broadcast %1051 : f32 to vector<8x16xf32>
    %1142 = arith.mulf %1140, %1141 : vector<8x16xf32>
    %1143 = arith.addf %1139, %1142 : vector<8x16xf32>
    %1144 = vector.extract_strided_slice %1135 {offsets = [0, 2], sizes = [8, 16], strides = [1, 1]} : vector<8x20xf32> to vector<8x16xf32>
    %1145 = vector.broadcast %1053 : f32 to vector<8x16xf32>
    %1146 = arith.mulf %1144, %1145 : vector<8x16xf32>
    %1147 = arith.addf %1143, %1146 : vector<8x16xf32>
    %1148 = vector.extract_strided_slice %1135 {offsets = [0, 3], sizes = [8, 16], strides = [1, 1]} : vector<8x20xf32> to vector<8x16xf32>
    %1149 = vector.broadcast %1055 : f32 to vector<8x16xf32>
    %1150 = arith.mulf %1148, %1149 : vector<8x16xf32>
    %1151 = arith.addf %1147, %1150 : vector<8x16xf32>
    %1152 = vector.extract_strided_slice %1135 {offsets = [0, 4], sizes = [8, 16], strides = [1, 1]} : vector<8x20xf32> to vector<8x16xf32>
    %1153 = vector.broadcast %1057 : f32 to vector<8x16xf32>
    %1154 = arith.mulf %1152, %1153 : vector<8x16xf32>
    %1155 = arith.addf %1151, %1154 : vector<8x16xf32>
    %c3_i32_222 = arith.constant 3 : i32
    %1156 = arith.addi %1079, %c3_i32_222 : i32
    %1157 = arith.index_cast %c3_i32_175 : i32 to index
    %1158 = arith.index_cast %1156 : i32 to index
    %c0_223 = arith.constant 0 : index
    %1159 = vector.load %arg5[%1157, %1158, %c0_223] : memref<4x20x20xf32, #tpu.memory_space<vmem>>, vector<1x8x20xf32>
    %1160 = vector.shape_cast %1159 : vector<1x8x20xf32> to vector<8x20xf32>
    %1161 = vector.extract_strided_slice %1160 {offsets = [0, 0], sizes = [8, 16], strides = [1, 1]} : vector<8x20xf32> to vector<8x16xf32>
    %1162 = vector.broadcast %1059 : f32 to vector<8x16xf32>
    %1163 = arith.mulf %1161, %1162 : vector<8x16xf32>
    %1164 = arith.addf %1155, %1163 : vector<8x16xf32>
    %1165 = vector.extract_strided_slice %1160 {offsets = [0, 1], sizes = [8, 16], strides = [1, 1]} : vector<8x20xf32> to vector<8x16xf32>
    %1166 = vector.broadcast %1061 : f32 to vector<8x16xf32>
    %1167 = arith.mulf %1165, %1166 : vector<8x16xf32>
    %1168 = arith.addf %1164, %1167 : vector<8x16xf32>
    %1169 = vector.extract_strided_slice %1160 {offsets = [0, 2], sizes = [8, 16], strides = [1, 1]} : vector<8x20xf32> to vector<8x16xf32>
    %1170 = vector.broadcast %1063 : f32 to vector<8x16xf32>
    %1171 = arith.mulf %1169, %1170 : vector<8x16xf32>
    %1172 = arith.addf %1168, %1171 : vector<8x16xf32>
    %1173 = vector.extract_strided_slice %1160 {offsets = [0, 3], sizes = [8, 16], strides = [1, 1]} : vector<8x20xf32> to vector<8x16xf32>
    %1174 = vector.broadcast %1065 : f32 to vector<8x16xf32>
    %1175 = arith.mulf %1173, %1174 : vector<8x16xf32>
    %1176 = arith.addf %1172, %1175 : vector<8x16xf32>
    %1177 = vector.extract_strided_slice %1160 {offsets = [0, 4], sizes = [8, 16], strides = [1, 1]} : vector<8x20xf32> to vector<8x16xf32>
    %1178 = vector.broadcast %1067 : f32 to vector<8x16xf32>
    %1179 = arith.mulf %1177, %1178 : vector<8x16xf32>
    %1180 = arith.addf %1176, %1179 : vector<8x16xf32>
    %c4_i32_224 = arith.constant 4 : i32
    %1181 = arith.addi %1079, %c4_i32_224 : i32
    %1182 = arith.index_cast %c3_i32_175 : i32 to index
    %1183 = arith.index_cast %1181 : i32 to index
    %c0_225 = arith.constant 0 : index
    %1184 = vector.load %arg5[%1182, %1183, %c0_225] : memref<4x20x20xf32, #tpu.memory_space<vmem>>, vector<1x8x20xf32>
    %1185 = vector.shape_cast %1184 : vector<1x8x20xf32> to vector<8x20xf32>
    %1186 = vector.extract_strided_slice %1185 {offsets = [0, 0], sizes = [8, 16], strides = [1, 1]} : vector<8x20xf32> to vector<8x16xf32>
    %1187 = vector.broadcast %1069 : f32 to vector<8x16xf32>
    %1188 = arith.mulf %1186, %1187 : vector<8x16xf32>
    %1189 = arith.addf %1180, %1188 : vector<8x16xf32>
    %1190 = vector.extract_strided_slice %1185 {offsets = [0, 1], sizes = [8, 16], strides = [1, 1]} : vector<8x20xf32> to vector<8x16xf32>
    %1191 = vector.broadcast %1071 : f32 to vector<8x16xf32>
    %1192 = arith.mulf %1190, %1191 : vector<8x16xf32>
    %1193 = arith.addf %1189, %1192 : vector<8x16xf32>
    %1194 = vector.extract_strided_slice %1185 {offsets = [0, 2], sizes = [8, 16], strides = [1, 1]} : vector<8x20xf32> to vector<8x16xf32>
    %1195 = vector.broadcast %1073 : f32 to vector<8x16xf32>
    %1196 = arith.mulf %1194, %1195 : vector<8x16xf32>
    %1197 = arith.addf %1193, %1196 : vector<8x16xf32>
    %1198 = vector.extract_strided_slice %1185 {offsets = [0, 3], sizes = [8, 16], strides = [1, 1]} : vector<8x20xf32> to vector<8x16xf32>
    %1199 = vector.broadcast %1075 : f32 to vector<8x16xf32>
    %1200 = arith.mulf %1198, %1199 : vector<8x16xf32>
    %1201 = arith.addf %1197, %1200 : vector<8x16xf32>
    %1202 = vector.extract_strided_slice %1185 {offsets = [0, 4], sizes = [8, 16], strides = [1, 1]} : vector<8x20xf32> to vector<8x16xf32>
    %1203 = vector.broadcast %1077 : f32 to vector<8x16xf32>
    %1204 = arith.mulf %1202, %1203 : vector<8x16xf32>
    %1205 = arith.addf %1201, %1204 : vector<8x16xf32>
    %c0_226 = arith.constant 0 : index
    %1206 = arith.index_cast %c3_i32_175 : i32 to index
    %1207 = arith.index_cast %1079 : i32 to index
    %c0_227 = arith.constant 0 : index
    %1208 = vector.load %arg4[%c0_226, %1206, %1207, %c0_227] : memref<1x4x16x16xf32, #tpu.memory_space<vmem>>, vector<1x1x8x16xf32>
    %1209 = vector.shape_cast %1208 : vector<1x1x8x16xf32> to vector<8x16xf32>
    %1210 = vector.shape_cast %1205 : vector<8x16xf32> to vector<1x1x8x16xf32>
    tpu.vector_store %arg4[%c0_226, %1206, %1207, %c0_227], %1210 {strides = array<i32>} : memref<1x4x16x16xf32, #tpu.memory_space<vmem>>, vector<1x1x8x16xf32>,
    %c1_i32_228 = arith.constant 1 : i32
    %c8_i32_229 = arith.constant 8 : i32
    %1211 = arith.muli %c1_i32_228, %c8_i32_229 : i32
    %1212 = tpu.assume_multiple %1211, 8 : i32
    %cst_230 = arith.constant 0.000000e+00 : f32
    %1213 = vector.broadcast %cst_230 : f32 to vector<8x16xf32>
    %c0_i32_231 = arith.constant 0 : i32
    %1214 = arith.addi %1212, %c0_i32_231 : i32
    %1215 = arith.index_cast %c3_i32_175 : i32 to index
    %1216 = arith.index_cast %1214 : i32 to index
    %c0_232 = arith.constant 0 : index
    %1217 = vector.load %arg5[%1215, %1216, %c0_232] : memref<4x20x20xf32, #tpu.memory_space<vmem>>, vector<1x8x20xf32>
    %1218 = vector.shape_cast %1217 : vector<1x8x20xf32> to vector<8x20xf32>
    %1219 = vector.extract_strided_slice %1218 {offsets = [0, 0], sizes = [8, 16], strides = [1, 1]} : vector<8x20xf32> to vector<8x16xf32>
    %1220 = vector.broadcast %1029 : f32 to vector<8x16xf32>
    %1221 = arith.mulf %1219, %1220 : vector<8x16xf32>
    %1222 = arith.addf %1213, %1221 : vector<8x16xf32>
    %1223 = vector.extract_strided_slice %1218 {offsets = [0, 1], sizes = [8, 16], strides = [1, 1]} : vector<8x20xf32> to vector<8x16xf32>
    %1224 = vector.broadcast %1031 : f32 to vector<8x16xf32>
    %1225 = arith.mulf %1223, %1224 : vector<8x16xf32>
    %1226 = arith.addf %1222, %1225 : vector<8x16xf32>
    %1227 = vector.extract_strided_slice %1218 {offsets = [0, 2], sizes = [8, 16], strides = [1, 1]} : vector<8x20xf32> to vector<8x16xf32>
    %1228 = vector.broadcast %1033 : f32 to vector<8x16xf32>
    %1229 = arith.mulf %1227, %1228 : vector<8x16xf32>
    %1230 = arith.addf %1226, %1229 : vector<8x16xf32>
    %1231 = vector.extract_strided_slice %1218 {offsets = [0, 3], sizes = [8, 16], strides = [1, 1]} : vector<8x20xf32> to vector<8x16xf32>
    %1232 = vector.broadcast %1035 : f32 to vector<8x16xf32>
    %1233 = arith.mulf %1231, %1232 : vector<8x16xf32>
    %1234 = arith.addf %1230, %1233 : vector<8x16xf32>
    %1235 = vector.extract_strided_slice %1218 {offsets = [0, 4], sizes = [8, 16], strides = [1, 1]} : vector<8x20xf32> to vector<8x16xf32>
    %1236 = vector.broadcast %1037 : f32 to vector<8x16xf32>
    %1237 = arith.mulf %1235, %1236 : vector<8x16xf32>
    %1238 = arith.addf %1234, %1237 : vector<8x16xf32>
    %c1_i32_233 = arith.constant 1 : i32
    %1239 = arith.addi %1212, %c1_i32_233 : i32
    %1240 = arith.index_cast %c3_i32_175 : i32 to index
    %1241 = arith.index_cast %1239 : i32 to index
    %c0_234 = arith.constant 0 : index
    %1242 = vector.load %arg5[%1240, %1241, %c0_234] : memref<4x20x20xf32, #tpu.memory_space<vmem>>, vector<1x8x20xf32>
    %1243 = vector.shape_cast %1242 : vector<1x8x20xf32> to vector<8x20xf32>
    %1244 = vector.extract_strided_slice %1243 {offsets = [0, 0], sizes = [8, 16], strides = [1, 1]} : vector<8x20xf32> to vector<8x16xf32>
    %1245 = vector.broadcast %1039 : f32 to vector<8x16xf32>
    %1246 = arith.mulf %1244, %1245 : vector<8x16xf32>
    %1247 = arith.addf %1238, %1246 : vector<8x16xf32>
    %1248 = vector.extract_strided_slice %1243 {offsets = [0, 1], sizes = [8, 16], strides = [1, 1]} : vector<8x20xf32> to vector<8x16xf32>
    %1249 = vector.broadcast %1041 : f32 to vector<8x16xf32>
    %1250 = arith.mulf %1248, %1249 : vector<8x16xf32>
    %1251 = arith.addf %1247, %1250 : vector<8x16xf32>
    %1252 = vector.extract_strided_slice %1243 {offsets = [0, 2], sizes = [8, 16], strides = [1, 1]} : vector<8x20xf32> to vector<8x16xf32>
    %1253 = vector.broadcast %1043 : f32 to vector<8x16xf32>
    %1254 = arith.mulf %1252, %1253 : vector<8x16xf32>
    %1255 = arith.addf %1251, %1254 : vector<8x16xf32>
    %1256 = vector.extract_strided_slice %1243 {offsets = [0, 3], sizes = [8, 16], strides = [1, 1]} : vector<8x20xf32> to vector<8x16xf32>
    %1257 = vector.broadcast %1045 : f32 to vector<8x16xf32>
    %1258 = arith.mulf %1256, %1257 : vector<8x16xf32>
    %1259 = arith.addf %1255, %1258 : vector<8x16xf32>
    %1260 = vector.extract_strided_slice %1243 {offsets = [0, 4], sizes = [8, 16], strides = [1, 1]} : vector<8x20xf32> to vector<8x16xf32>
    %1261 = vector.broadcast %1047 : f32 to vector<8x16xf32>
    %1262 = arith.mulf %1260, %1261 : vector<8x16xf32>
    %1263 = arith.addf %1259, %1262 : vector<8x16xf32>
    %c2_i32_235 = arith.constant 2 : i32
    %1264 = arith.addi %1212, %c2_i32_235 : i32
    %1265 = arith.index_cast %c3_i32_175 : i32 to index
    %1266 = arith.index_cast %1264 : i32 to index
    %c0_236 = arith.constant 0 : index
    %1267 = vector.load %arg5[%1265, %1266, %c0_236] : memref<4x20x20xf32, #tpu.memory_space<vmem>>, vector<1x8x20xf32>
    %1268 = vector.shape_cast %1267 : vector<1x8x20xf32> to vector<8x20xf32>
    %1269 = vector.extract_strided_slice %1268 {offsets = [0, 0], sizes = [8, 16], strides = [1, 1]} : vector<8x20xf32> to vector<8x16xf32>
    %1270 = vector.broadcast %1049 : f32 to vector<8x16xf32>
    %1271 = arith.mulf %1269, %1270 : vector<8x16xf32>
    %1272 = arith.addf %1263, %1271 : vector<8x16xf32>
    %1273 = vector.extract_strided_slice %1268 {offsets = [0, 1], sizes = [8, 16], strides = [1, 1]} : vector<8x20xf32> to vector<8x16xf32>
    %1274 = vector.broadcast %1051 : f32 to vector<8x16xf32>
    %1275 = arith.mulf %1273, %1274 : vector<8x16xf32>
    %1276 = arith.addf %1272, %1275 : vector<8x16xf32>
    %1277 = vector.extract_strided_slice %1268 {offsets = [0, 2], sizes = [8, 16], strides = [1, 1]} : vector<8x20xf32> to vector<8x16xf32>
    %1278 = vector.broadcast %1053 : f32 to vector<8x16xf32>
    %1279 = arith.mulf %1277, %1278 : vector<8x16xf32>
    %1280 = arith.addf %1276, %1279 : vector<8x16xf32>
    %1281 = vector.extract_strided_slice %1268 {offsets = [0, 3], sizes = [8, 16], strides = [1, 1]} : vector<8x20xf32> to vector<8x16xf32>
    %1282 = vector.broadcast %1055 : f32 to vector<8x16xf32>
    %1283 = arith.mulf %1281, %1282 : vector<8x16xf32>
    %1284 = arith.addf %1280, %1283 : vector<8x16xf32>
    %1285 = vector.extract_strided_slice %1268 {offsets = [0, 4], sizes = [8, 16], strides = [1, 1]} : vector<8x20xf32> to vector<8x16xf32>
    %1286 = vector.broadcast %1057 : f32 to vector<8x16xf32>
    %1287 = arith.mulf %1285, %1286 : vector<8x16xf32>
    %1288 = arith.addf %1284, %1287 : vector<8x16xf32>
    %c3_i32_237 = arith.constant 3 : i32
    %1289 = arith.addi %1212, %c3_i32_237 : i32
    %1290 = arith.index_cast %c3_i32_175 : i32 to index
    %1291 = arith.index_cast %1289 : i32 to index
    %c0_238 = arith.constant 0 : index
    %1292 = vector.load %arg5[%1290, %1291, %c0_238] : memref<4x20x20xf32, #tpu.memory_space<vmem>>, vector<1x8x20xf32>
    %1293 = vector.shape_cast %1292 : vector<1x8x20xf32> to vector<8x20xf32>
    %1294 = vector.extract_strided_slice %1293 {offsets = [0, 0], sizes = [8, 16], strides = [1, 1]} : vector<8x20xf32> to vector<8x16xf32>
    %1295 = vector.broadcast %1059 : f32 to vector<8x16xf32>
    %1296 = arith.mulf %1294, %1295 : vector<8x16xf32>
    %1297 = arith.addf %1288, %1296 : vector<8x16xf32>
    %1298 = vector.extract_strided_slice %1293 {offsets = [0, 1], sizes = [8, 16], strides = [1, 1]} : vector<8x20xf32> to vector<8x16xf32>
    %1299 = vector.broadcast %1061 : f32 to vector<8x16xf32>
    %1300 = arith.mulf %1298, %1299 : vector<8x16xf32>
    %1301 = arith.addf %1297, %1300 : vector<8x16xf32>
    %1302 = vector.extract_strided_slice %1293 {offsets = [0, 2], sizes = [8, 16], strides = [1, 1]} : vector<8x20xf32> to vector<8x16xf32>
    %1303 = vector.broadcast %1063 : f32 to vector<8x16xf32>
    %1304 = arith.mulf %1302, %1303 : vector<8x16xf32>
    %1305 = arith.addf %1301, %1304 : vector<8x16xf32>
    %1306 = vector.extract_strided_slice %1293 {offsets = [0, 3], sizes = [8, 16], strides = [1, 1]} : vector<8x20xf32> to vector<8x16xf32>
    %1307 = vector.broadcast %1065 : f32 to vector<8x16xf32>
    %1308 = arith.mulf %1306, %1307 : vector<8x16xf32>
    %1309 = arith.addf %1305, %1308 : vector<8x16xf32>
    %1310 = vector.extract_strided_slice %1293 {offsets = [0, 4], sizes = [8, 16], strides = [1, 1]} : vector<8x20xf32> to vector<8x16xf32>
    %1311 = vector.broadcast %1067 : f32 to vector<8x16xf32>
    %1312 = arith.mulf %1310, %1311 : vector<8x16xf32>
    %1313 = arith.addf %1309, %1312 : vector<8x16xf32>
    %c4_i32_239 = arith.constant 4 : i32
    %1314 = arith.addi %1212, %c4_i32_239 : i32
    %1315 = arith.index_cast %c3_i32_175 : i32 to index
    %1316 = arith.index_cast %1314 : i32 to index
    %c0_240 = arith.constant 0 : index
    %1317 = vector.load %arg5[%1315, %1316, %c0_240] : memref<4x20x20xf32, #tpu.memory_space<vmem>>, vector<1x8x20xf32>
    %1318 = vector.shape_cast %1317 : vector<1x8x20xf32> to vector<8x20xf32>
    %1319 = vector.extract_strided_slice %1318 {offsets = [0, 0], sizes = [8, 16], strides = [1, 1]} : vector<8x20xf32> to vector<8x16xf32>
    %1320 = vector.broadcast %1069 : f32 to vector<8x16xf32>
    %1321 = arith.mulf %1319, %1320 : vector<8x16xf32>
    %1322 = arith.addf %1313, %1321 : vector<8x16xf32>
    %1323 = vector.extract_strided_slice %1318 {offsets = [0, 1], sizes = [8, 16], strides = [1, 1]} : vector<8x20xf32> to vector<8x16xf32>
    %1324 = vector.broadcast %1071 : f32 to vector<8x16xf32>
    %1325 = arith.mulf %1323, %1324 : vector<8x16xf32>
    %1326 = arith.addf %1322, %1325 : vector<8x16xf32>
    %1327 = vector.extract_strided_slice %1318 {offsets = [0, 2], sizes = [8, 16], strides = [1, 1]} : vector<8x20xf32> to vector<8x16xf32>
    %1328 = vector.broadcast %1073 : f32 to vector<8x16xf32>
    %1329 = arith.mulf %1327, %1328 : vector<8x16xf32>
    %1330 = arith.addf %1326, %1329 : vector<8x16xf32>
    %1331 = vector.extract_strided_slice %1318 {offsets = [0, 3], sizes = [8, 16], strides = [1, 1]} : vector<8x20xf32> to vector<8x16xf32>
    %1332 = vector.broadcast %1075 : f32 to vector<8x16xf32>
    %1333 = arith.mulf %1331, %1332 : vector<8x16xf32>
    %1334 = arith.addf %1330, %1333 : vector<8x16xf32>
    %1335 = vector.extract_strided_slice %1318 {offsets = [0, 4], sizes = [8, 16], strides = [1, 1]} : vector<8x20xf32> to vector<8x16xf32>
    %1336 = vector.broadcast %1077 : f32 to vector<8x16xf32>
    %1337 = arith.mulf %1335, %1336 : vector<8x16xf32>
    %1338 = arith.addf %1334, %1337 : vector<8x16xf32>
    %c0_241 = arith.constant 0 : index
    %1339 = arith.index_cast %c3_i32_175 : i32 to index
    %1340 = arith.index_cast %1212 : i32 to index
    %c0_242 = arith.constant 0 : index
    %1341 = vector.load %arg4[%c0_241, %1339, %1340, %c0_242] : memref<1x4x16x16xf32, #tpu.memory_space<vmem>>, vector<1x1x8x16xf32>
    %1342 = vector.shape_cast %1341 : vector<1x1x8x16xf32> to vector<8x16xf32>
    %1343 = vector.shape_cast %1338 : vector<8x16xf32> to vector<1x1x8x16xf32>
    tpu.vector_store %arg4[%c0_241, %1339, %1340, %c0_242], %1343 {strides = array<i32>} : memref<1x4x16x16xf32, #tpu.memory_space<vmem>>, vector<1x1x8x16xf32>,
    %c2_i32_243 = arith.constant 2 : i32
    %c4_i32_244 = arith.constant 4 : i32
    return
  }
  func.func @transform_0(%arg0: i32, %arg1: i32) -> (i32, i32) {
    %c0_i32 = arith.constant 0 : i32
    %c0_i32_0 = arith.constant 0 : i32
    %c0_i32_1 = arith.constant 0 : i32
    return %c0_i32, %c0_i32_0 : i32, i32
  }
  func.func @transform_1(%arg0: i32, %arg1: i32) -> (i32, i32, i32, i32) {
    %c0_i32 = arith.constant 0 : i32
    %c0_i32_0 = arith.constant 0 : i32
    %c0_i32_1 = arith.constant 0 : i32
    return %arg0, %arg1, %c0_i32, %c0_i32_0 : i32, i32, i32, i32
  }
  func.func @transform_2(%arg0: i32, %arg1: i32) -> (i32, i32, i32, i32) {
    %c0_i32 = arith.constant 0 : i32
    %c0_i32_0 = arith.constant 0 : i32
    %c0_i32_1 = arith.constant 0 : i32
    return %arg0, %arg1, %c0_i32, %c0_i32_0 : i32, i32, i32, i32
  }
}

</mosaic_0001>

<bundles_post_ra>
// kernel: msconv.1
= control target key start
LH: loop header
LB: loop body
LE: loop exit
PB: predicated region body
PF: predicated region fallthrough
CT: control target
= control target key end

     0   :  { %s3592_s0 = inlined_call_operand.vmem [shape: f32[25,4], index: 0, kind: input, shape index: {}]   ;;  %s3593_s1 = inlined_call_operand.vmem [shape: f32[2,4,16,16], index: 1, kind: input, shape index: {}]   ;;  %s3594_s2 = inlined_call_operand.hbm [shape: f32[2,4,16,16], index: 2, kind: output, shape index: {}]  }
   0x1   :  { %3620 = sst [smem:[#allocation20_spill]] %s3592_s0 }
   0x2   :  { %3621 = sst [smem:[#allocation21_spill]] %s3593_s1 }
   0x3   :  { %3622 = sst [smem:[#allocation22_spill]] %s3594_s2 }
   0x4   :  { %7 = vsyncpa [#allocation5], 0 }
   0x5   :  { %8 = vsyncpa [#allocation4], 0 }
   0x6   :  { %10 = vsyncpa [#allocation4 + $0x1], 0  ;;  %s2445_s9 = smov 0   ;;  %s2447_s10 = smov 0  }
   0x7   :  { %s2449_s11 = smov 0   ;;  %s2451_s12 = smov 0  }
   0x8   :  { %s2453_s13 = smov 0   ;;  %s2455_s14 = smov 0  }
   0x9 LB: > { %3623 = sst [smem:[#allocation9_spill]] %s2396_s9  ;;  %s2114_s15 = sadd.s32 4294967295, %s2416_s14   ;;  %s2416_s14 = sphi %s2455_s14, %s16_s14   ;;  %s2412_s13 = sphi %s2453_s13, %s3659_s13   ;;  %s2408_s12 = sphi %s2451_s12, %s3658_s12   ;;  %s2404_s11 = sphi %s2449_s11, %s3657_s11   ;;  %s2400_s10 = sphi %s2447_s10, %s3656_s10   ;;  %s2396_s9 = sphi %s2445_s9, %s3655_s9  }
   0xa   : > { %3624 = sst [smem:[#allocation10_spill]] %s2400_s10  ;;  %s2115_s16 = sadd.s32 4294967294, %s2416_s14  }
   0xb   : > { %3625 = sst [smem:[#allocation11_spill]] %s2404_s11  ;;  %s28_s17 = sadd.s32 1, %s2412_s13 }
   0xc   : > { %3626 = sst [smem:[#allocation12_spill]] %s2408_s12  ;;  %s86_s18 = sadd.s32 1, %s2404_s11 }
   0xd   : > { %3627 = sst [smem:[#allocation13_spill]] %s2412_s13  ;;  %p30_p0 = scmp.ge.s32.totalorder %s28_s17, 2 }
   0xe   : > { %3628 = sst [smem:[#allocation14_spill]] %s2416_s14  ;;  %p96_p1 = scmp.ne.s32.totalorder %s2404_s11, %s2400_s10 }
   0xf   : > { %p97_p2 = scmp.eq.s32.totalorder %s2114_s15, 1  ;;  %p102_p3 = scmp.ne.s32.totalorder %s2400_s10, %s2396_s9 }
  0x10   : > { %s3661_s17 = smov (%p30_p0, %s28_s17), 0  ;;  %p103_p5 = scmp.eq.s32.totalorder %s2115_s16, 1 }
  0x11   : > { %3629 = sst [smem:[#allocation15_spill]] %s3661_s17  ;;  %p2485_p4 = por %p97_p2, %p96_p1 }
  0x12   : > { %s81_s20 = ssub.s32 %s2412_s13, %s3661_s17  ;;  %p2116_p6 = scmp.ge.s32.totalorder %s2416_s14, 1 }
  0x13   : > { %s3630_s19 = scalar_select %p2485_p4, 1, 0 }
  0x14   : > { %p84_p7 = scmp.eq.s32.totalorder %s81_s20, 0  ;;  %p2492_p8 = por %p103_p5, %p102_p3 }
  0x15   : > { %3631 = sst [smem:[#allocation16_spill]] %s3630_s19  ;;  %p110_p9 = scmp.lt.s32.totalorder %s2416_s14, 3 }
  0x16   : > { %s3632_s21 = scalar_select %p2492_p8, 1, 0 }
  0x17   : > { %s2498_s22 = scalar_select %p84_p7, %s2404_s11, %s86_s18  }
  0x18   : > { %3633 = sst [smem:[#allocation17_spill]] %s3632_s21  ;;  %p2500_p10 = pnand %p2116_p6, %p110_p9 }
  0x19   : > { %3634 = sst [smem:[#allocation18_spill]] %s2498_s22  ;;  %p2504_p11 = scmp.eq.s32.totalorder %s2114_s15, 0 }
  0x1a   : > { %s3637_s0 = sld [smem:[#allocation20_spill]]  ;;  %p2249_p12 = pneg %p2500_p10 }
  0x1c   : > { %p2515_p13 = pnand %p2504_p11, %p2249_p12 }
  0x1e   : > { %p2321_p1 = pneg %p2515_p13 }
  0x20   : > { %s122_s27 = sshll.u32 %s3637_s0, 4  ;;  %s123_s27 = int_to_ptr.vmem [resolvable:$true] %s122_s27 }
  0x21   : > { %s2319_s29 = scalar_lea.vmem %s123_s27, 512  ;;  %p2327_p5 = scmp.lt.s32.totalorder %s123_s27, %s123_s27 }
  0x22   : > { %p2320_p0 = scmp.ne.s32.totalorder %s123_s27, %s2319_s29  ;;  %p2328_p6 = scmp.lt.s32.totalorder %s2319_s29, %s2319_s29 }
  0x24   : > { %p2322_p2 = pnand %p2321_p1, %p2320_p0  ;;  %p2329_p7 = por %p2328_p6, %p2327_p5 }
  0x26   : > { %p2323_p3 = pneg %p2322_p2 }
  0x28   : > { %p2330_p9 = pnand %p2329_p7, %p2323_p3 }
  0x2a   : > { %2333 = shalt.err (!%p2330_p9)
}
  0x2b   : > { %s2418_s30 = smov [#allocation3]   ;;  %s2419_s3 = smov 128  }
  0x2c   : > { %s2420_s4 = smov 8   ;;  %152 = sbr.rel (%p2500_p10) target bundleno = 752 (0x2f0), region = 28 }
  0x2d   : > { %2252 = dma.vmem_to_smem (!%p2515_p13), %s123_s27, 512, %s2418_s30, [#allocation5], %s2419_s3, %s2419_s3, %s2420_s4  }
  0x33   : > { %2387 = dma.done.wait (%p2504_p11), [#allocation5], 512  }
  0x34   : > { %2389 = vsyncadd (%p2504_p11), [#allocation5], 4294966784 }
  0x35   : > { %158 = sfence }
  0x36   : > { %p181_p12 = scmp.lt.s32.totalorder %s2408_s12, 1  ;;  %vm195_vm0 = vcmask 156672   ;;  %v2421_v0 = vmov 0.0   ;;  %s3639_s1 = sld [smem:[#allocation21_spill]]  ;;  %vm206_vm1 = vcmask 15360   ;;  %vm209_vm2 = vcmask 146432  }
  0x37   : > { %196 = vst.msk [vmem:[#allocation2] sm:$0x3] %vm195_vm0, %v2421_v0  ;;  %197 = vst.msk [vmem:[#allocation2 + $0x12] sm:$0x3] %vm195_vm0, %v2421_v0  ;;  %s3595_s16 = smov 2   ;;  %vm212_vm3 = vcmask 162816  }
  0x38   : > { %s182_s5 = scalar_select %p181_p12, %s2408_s12, 1  ;;  %637 = vst.msk [vmem:[#allocation2 + $0x18] sm:$0x3] %vm195_vm0, %v2421_v0  ;;  %638 = vst.msk [vmem:[#allocation2 + $0x2a] sm:$0x3] %vm195_vm0, %v2421_v0  ;;  %vm484_vm4 = vcmask 130048  }
  0x39   : > { %1080 = vst.msk [vmem:[#allocation2 + $0x30] sm:$0x3] %vm195_vm0, %v2421_v0  ;;  %1081 = vst.msk [vmem:[#allocation2 + $0x42] sm:$0x3] %vm195_vm0, %v2421_v0  ;;  %s2544_s18 = sld [smem:[#allocation3 + $0x180]]  ;;  %s3599_s29 = smov 125  }
  0x3a   : > { %1523 = vst.msk [vmem:[#allocation2 + $0x48] sm:$0x3] %vm195_vm0, %v2421_v0  ;;  %1524 = vst.msk [vmem:[#allocation2 + $0x5a] sm:$0x3] %vm195_vm0, %v2421_v0  ;;  %s2241_s6 = sshll.u32 %s182_s5, 6  ;;  %s2546_s20 = sld [smem:[#allocation3 + $0x80]] }
  0x3b   : > { %s2554_s23 = sld [smem:[#allocation3 + $0x300]]  ;;  %s3603_s30 = smov 127  }
  0x3c   : > { %s2534_s15 = scalar_lea.vmem %s3639_s1, %s2241_s6  ;;  %s2556_s24 = sld [smem:[#allocation3 + $0x100]] }
  0x3d   : > { %v193_v1 = vld [vmem:[%s2534_s15] sm:$0xff]  ;;  %v2150_v2 = vld [vmem:[%s2534_s15 + $0x18] sm:$0xff]  ;;  %v194_v3 = vld [vmem:[%s2534_s15 + $0x8] sm:$0xff]  ;;  %s2563_s25 = sld [smem:[#allocation3 + $0x400]]  ;;  %s3597_s5 = smov 126  }
  0x3e   : > { %200 = vrot.lane.b32.xlu0 %v193_v1, %s3595_s16  ;;  %643 = vrot.lane.b32.xlu1 %v2150_v2, %s3595_s16  ;;  %v2149_v4 = vld [vmem:[%s2534_s15 + $0x10] sm:$0xff]  ;;  %s2565_s26 = sld [smem:[#allocation3 + $0x200]]  ;;  %s3601_s8 = smov 124  }
  0x3f   : > { %v334_v14 = vstv %s2544_s18  ;;  %s2582_s27 = sld [smem:[#allocation3 + $0x580]]  ;;  %s3641_s1 = smov 125  }
  0x40   : > { %v320_v15 = vstv %s2546_s20  ;;  %s2584_s28 = sld [smem:[#allocation3 + $0x380]]  ;;  %s3643_s22 = smov 127  }
  0x41   : > { %v354_v23 = vstv %s2554_s23  ;;  %s2596_s3 = sld [smem:[#allocation3 + $0x680]]  ;;  %s2767_s18 = sld [smem:[#allocation3 + $0x301]] }
  0x42   : > { %202 = vrot.lane.b32.xlu0 %v194_v3, %s3595_s16  ;;  %v327_v24 = vstv %s2556_s24  ;;  %s2598_s4 = sld [smem:[#allocation3 + $0x480]]  ;;  %s2776_s20 = sld [smem:[#allocation3 + $0x201]] }
  0x43   : > { %v368_v27 = vstv %s2563_s25  ;;  %s2612_s6 = sld [smem:[#allocation3 + $0x600]]  ;;  %s2778_s23 = sld [smem:[#allocation3 + $0x401]] }
  0x44   : > { %v341_v28 = vstv %s2565_s26  ;;  %s2614_s7 = sld [smem:[#allocation3 + $0x800]]  ;;  %s2790_s24 = sld [smem:[#allocation3 + $0x381]] }
  0x45   : > { %v388_v32 = vstv %s2582_s27  ;;  %s2644_s0 = sld [smem:[#allocation3 + $0xa80]]  ;;  %s2792_s25 = sld [smem:[#allocation3 + $0x581]] }
  0x46   : > { %641 = vrot.lane.b32.xlu0 %v2149_v4, %s3595_s16  ;;  %v361_v33 = vstv %s2584_s28  ;;  %s2626_s16 = sld [smem:[#allocation3 + $0x700]]  ;;  %s2804_s26 = sld [smem:[#allocation3 + $0x481]] }
  0x47   : > { %v402_v36 = vstv %s2596_s3  ;;  %s2656_s17 = sld [smem:[#allocation3 + $0x980]]  ;;  %s2806_s27 = sld [smem:[#allocation3 + $0x681]] }
  0x48   : > { %v375_v37 = vstv %s2598_s4  ;;  %s2658_s13 = sld [smem:[#allocation3 + $0xb80]]  ;;  %s2820_s28 = sld [smem:[#allocation3 + $0x601]] }
  0x49   : > { %v395_v40 = vstv %s2612_s6  ;;  %s2822_s3 = sld [smem:[#allocation3 + $0x801]]  ;;  %s2884_s21 = sld [smem:[#allocation3]] }
  0x4a   : > { %v422_v42 = vstv %s2614_s7  ;;  %s2834_s4 = sld [smem:[#allocation3 + $0x701]]  ;;  %s2910_s14 = sld [smem:[#allocation3 + $0x280]] }
  0x4b   : > { %v456_v51 = vstv %s2644_s0  ;;  %s2746_s0 = sld [smem:[#allocation3 + $0x81]]  ;;  %s3229_s2 = sld [smem:[#allocation3 + $0xa82]] }
  0x4c   : > { %v409_v45 = vstv %s2626_s16  ;;  %s2668_s16 = sld [smem:[#allocation3 + $0xb00]]  ;;  %s2836_s6 = sld [smem:[#allocation3 + $0x901]] }
  0x4d   : > { %v443_v54 = vstv %s2656_s17  ;;  %s2765_s17 = sld [smem:[#allocation3 + $0x101]]  ;;  %s3256_s19 = sld [smem:[#allocation3 + $0xc02]] }
  0x4e   : > { %v470_v55 = vstv %s2658_s13  ;;  %s2756_s13 = sld [smem:[#allocation3 + $0x181]]  ;;  %s2210_s12 = sld [smem:[#allocation3 + $0x83]] }
  0x4f   : > { %s2850_s7 = sld [smem:[#allocation3 + $0x881]] }
  0x50   : > { %s2880_s11 = sld [smem:[#allocation3 + $0xb01]] }
  0x51   : > { %s2894_s9 = sld [smem:[#allocation3 + $0xc01]] }
  0x52   : > { %v463_v58 = vstv %s2668_s16  ;;  %s2864_s16 = sld [smem:[#allocation3 + $0x981]] }
  0xb0   : > { %v201_v5 = vpop.permute.xlu0 %200  ;;  %v644_v6 = vpop.permute.xlu1 %643 }
  0xb1   : > { %v207_v7 = vsel %vm206_vm1, 0.0, %v201_v5  ;;  %v648_v8 = vsel %vm206_vm1, 0.0, %v644_v6 }
  0xb2   : > { %v210_v9 = vsel %vm209_vm2, %v207_v7, 0.0  ;;  %v650_v10 = vsel %vm209_vm2, %v648_v8, 0.0 }
  0xb3   : > { %213 = vst.msk [vmem:[#allocation2 + $0x2] sm:$0xff] %vm212_vm3, %v210_v9  ;;  %652 = vst.msk [vmem:[#allocation2 + $0x22] sm:$0xff] %vm212_vm3, %v650_v10 }
  0xb4   : > { %v203_v11 = vpop.permute.xlu0 %202 }
  0xb5   : > { %v208_v12 = vsel %vm206_vm1, 0.0, %v203_v11 }
  0xb6   : > { %v211_v13 = vsel %vm209_vm2, %v208_v12, 0.0 }
  0xb7   : > { %214 = vst.msk [vmem:[#allocation2 + $0xa] sm:$0xff] %vm212_vm3, %v211_v13 }
  0xb8   : > { %v642_v16 = vpop.permute.xlu0 %641 }
  0xb9   : > { %v647_v17 = vsel %vm206_vm1, 0.0, %v642_v16 }
  0xba   : > { %v2568_v18 = vld [vmem:[#allocation2] sm:$0xff]  ;;  %v649_v19 = vsel %vm209_vm2, %v647_v17, 0.0 }
  0xbb   : > { %v335_v20 = vmul.f32 %v334_v14, %v2568_v18  ;;  %v321_v21 = vmul.f32 %v320_v15, %v2568_v18  ;;  %651 = vst.msk [vmem:[#allocation2 + $0x1a] sm:$0xff] %vm212_vm3, %v649_v19  ;;  %v2578_v22 = vld [vmem:[#allocation2 + $0x1] sm:$0xff]  ;;  %v328_v26 = vmul.f32 %v327_v24, %v2568_v18  ;;  %v342_v30 = vmul.f32 %v341_v28, %v2568_v18 }
  0xbc   : > { %v355_v25 = vmul.f32 %v354_v23, %v2578_v22  ;;  %v369_v29 = vmul.f32 %v368_v27, %v2578_v22  ;;  %v2608_v31 = vld [vmem:[#allocation2 + $0x2] sm:$0xff]  ;;  %v362_v35 = vmul.f32 %v361_v33, %v2578_v22  ;;  %v376_v39 = vmul.f32 %v375_v37, %v2578_v22 }
  0xbd   : > { %337 = vrot.lane.b32.xlu0 %v335_v20, %s3599_s29  ;;  %323 = vrot.lane.b32.xlu1 %v321_v21, %s3603_s30  ;;  %v389_v34 = vmul.f32 %v388_v32, %v2608_v31  ;;  %v403_v38 = vmul.f32 %v402_v36, %v2608_v31  ;;  %v396_v43 = vmul.f32 %v395_v40, %v2608_v31  ;;  %v760_v21 = vstv %s2746_s0  ;;  %s2941_s0 = sld [smem:[#allocation3 + $0x500]] }
  0xbe   : > { %v2639_v41 = vld [vmem:[#allocation2 + $0x3] sm:$0xff]  ;;  %v410_v47 = vmul.f32 %v409_v45, %v2608_v31  ;;  %v2734_v11 = vld [vmem:[#allocation2 + $0xb] sm:$0xff] }
  0xbf   : > { %v423_v44 = vmul.f32 %v422_v42, %v2639_v41  ;;  %v2665_v50 = vld [vmem:[#allocation2 + $0x4] sm:$0xff]  ;;  %v444_v56 = vmul.f32 %v443_v54, %v2639_v41  ;;  %v577_v13 = vmul.f32 %v2734_v11, %v422_v42  ;;  %v2750_v16 = vld [vmem:[#allocation2 + $0xc] sm:$0xff] }
  0xc0   : > { %v457_v53 = vmul.f32 %v456_v51, %v2665_v50  ;;  %v471_v57 = vmul.f32 %v470_v55, %v2665_v50  ;;  %v2683_v59 = vld [vmem:[#allocation2 + $0x8] sm:$0xff]  ;;  %v464_v60 = vmul.f32 %v463_v58, %v2665_v50  ;;  %v606_v19 = vmul.f32 %v2750_v16, %v456_v51 }
  0xc1   : > { %357 = vrot.lane.b32.xlu0 %v355_v25, %s3603_s30  ;;  %330 = vrot.lane.b32.xlu1 %v328_v26, %s3597_s5  ;;  %s2628_s5 = sld [smem:[#allocation3 + $0x900]]  ;;  %v490_v61 = vmul.f32 %v2683_v59, %v320_v15  ;;  %v502_v0 = vmul.f32 %v2683_v59, %v334_v14  ;;  %v2698_v1 = vld [vmem:[#allocation2 + $0x9] sm:$0xff]  ;;  %v496_v2 = vmul.f32 %v2683_v59, %v327_v24  ;;  %v835_v51 = vstv %s2820_s28  ;;  %s3107_s28 = sld [smem:[#allocation3 + $0x182]] }
  0xc2   : > { %v519_v3 = vmul.f32 %v2698_v1, %v354_v23  ;;  %v508_v4 = vmul.f32 %v2683_v59, %v341_v28  ;;  %v531_v5 = vmul.f32 %v2698_v1, %v368_v27  ;;  %v2716_v6 = vld [vmem:[#allocation2 + $0xa] sm:$0xff]  ;;  %v525_v7 = vmul.f32 %v2698_v1, %v361_v33  ;;  %v2760_v20 = vld [vmem:[#allocation2 + $0x18] sm:$0xff] }
  0xc3   : > { %v548_v8 = vmul.f32 %v2716_v6, %v388_v32  ;;  %v537_v9 = vmul.f32 %v2698_v1, %v375_v37  ;;  %v560_v10 = vmul.f32 %v2716_v6, %v402_v36  ;;  %v554_v12 = vmul.f32 %v2716_v6, %v395_v40  ;;  %v2787_v32 = vld [vmem:[#allocation2 + $0x19] sm:$0xff] }
  0xc4   : > { %v566_v14 = vmul.f32 %v2716_v6, %v409_v45  ;;  %v595_v23 = vmul.f32 %v2734_v11, %v443_v54  ;;  %v618_v24 = vmul.f32 %v2750_v16, %v470_v55  ;;  %v761_v25 = vmul.f32 %v760_v21, %v2760_v20  ;;  %v2817_v42 = vld [vmem:[#allocation2 + $0x1a] sm:$0xff] }
  0xc5   : > { %371 = vrot.lane.b32.xlu0 %v369_v29, %s3599_s29  ;;  %344 = vrot.lane.b32.xlu1 %v342_v30, %s3601_s8  ;;  %s3640_s29 = smov 126   ;;  %s2642_s8 = sld [smem:[#allocation3 + $0x880]]  ;;  %v612_v26 = vmul.f32 %v2750_v16, %v463_v58  ;;  %v774_v27 = vstv %s2756_s13  ;;  %v767_v30 = vstv %s2765_s17  ;;  %v836_v54 = vmul.f32 %v835_v51, %v2817_v42 }
  0xc6   : > { %v775_v29 = vmul.f32 %v774_v27, %v2760_v20  ;;  %v794_v33 = vstv %s2767_s18  ;;  %v781_v36 = vstv %s2776_s20  ;;  %v808_v37 = vstv %s2778_s23  ;;  %s2967_s13 = sld [smem:[#allocation3 + $0x780]]  ;;  %s3644_s18 = smov 2  }
  0xc7   : > { %v436_v46 = vstv %s2628_s5  ;;  %s2676_s5 = sld [smem:[#allocation3 + $0xc00]]  ;;  %v801_v40 = vstv %s2790_s24  ;;  %s3612_s20 = sand.u32 1, %s2400_s10  }
  0xc8   : > { %v437_v48 = vmul.f32 %v436_v46, %v2639_v41  ;;  %v589_v15 = vmul.f32 %v2734_v11, %v436_v46  ;;  %v815_v46 = vstv %s2804_s26  ;;  %s2997_s17 = sld [smem:[#allocation3 + $0xa00]]  ;;  %s3079_s23 = sld [smem:[#allocation3 + $0x781]] }
  0xc9   : > { %391 = vrot.lane.b32.xlu0 %v389_v34, %s3603_s30  ;;  %364 = vrot.lane.b32.xlu1 %v362_v35, %s3640_s29  ;;  %s3642_s30 = smov 124   ;;  %v768_v34 = vmul.f32 %v767_v30, %v2760_v20  ;;  %v795_v35 = vmul.f32 %v794_v33, %v2787_v32  ;;  %s3083_s24 = sld [smem:[#allocation3 + $0xa01]] }
  0xca   : > { %s3099_s26 = sld [smem:[#allocation3 + $0x82]] }
  0xcb   : > { %v429_v49 = vstv %s2642_s8  ;;  %s2852_s8 = sld [smem:[#allocation3 + $0xa81]]  ;;  %s3258_s10 = sld [smem:[#allocation3 + $0xb82]] }
  0xcc   : > { %v430_v52 = vmul.f32 %v429_v49, %v2639_v41  ;;  %v583_v17 = vmul.f32 %v2734_v11, %v429_v49 }
  0xcd   : > { %405 = vrot.lane.b32.xlu0 %v403_v38, %s3641_s1  ;;  %378 = vrot.lane.b32.xlu1 %v376_v39, %s3642_s30  ;;  %v477_v62 = vstv %s2676_s5  ;;  %v782_v38 = vmul.f32 %v781_v36, %v2760_v20  ;;  %v809_v39 = vmul.f32 %v808_v37, %v2787_v32  ;;  %s2866_s5 = sld [smem:[#allocation3 + $0xb81]] }
  0xce   : > { %v478_v63 = vmul.f32 %v477_v62, %v2665_v50  ;;  %v624_v28 = vmul.f32 %v2750_v16, %v477_v62  ;;  %v2877_v62 = vld [vmem:[#allocation2 + $0x1c] sm:$0xff] }
  0xd1   : > { %398 = vrot.lane.b32.xlu1 %v396_v43, %s3640_s29  ;;  %425 = vrot.lane.b32.xlu0 %v423_v44, %s3643_s22  ;;  %v828_v43 = vstv %s2792_s25  ;;  %v802_v44 = vmul.f32 %v801_v40, %v2787_v32  ;;  %s3097_s25 = sld [smem:[#allocation3 + $0x102]] }
  0xd2   : > { %v829_v45 = vmul.f32 %v828_v43, %v2817_v42 }
  0xd5   : > { %412 = vrot.lane.b32.xlu1 %v410_v47, %s3642_s30  ;;  %439 = vrot.lane.b32.xlu0 %v437_v48, %s3641_s1  ;;  %v842_v47 = vstv %s2806_s27  ;;  %v816_v48 = vmul.f32 %v815_v46, %v2787_v32  ;;  %s3105_s27 = sld [smem:[#allocation3 + $0x202]] }
  0xd6   : > { %v843_v49 = vmul.f32 %v842_v47, %v2817_v42 }
  0xd9   : > { %432 = vrot.lane.b32.xlu1 %v430_v52, %s3640_s29  ;;  %459 = vrot.lane.b32.xlu0 %v457_v53, %s3643_s22  ;;  %v2847_v52 = vld [vmem:[#allocation2 + $0x1b] sm:$0xff]  ;;  %v862_v53 = vstv %s2822_s3  ;;  %s3114_s3 = sld [smem:[#allocation3 + $0x382]] }
  0xda   : > { %v863_v55 = vmul.f32 %v862_v53, %v2847_v52 }
  0xdd   : > { %446 = vrot.lane.b32.xlu1 %v444_v56, %s3642_s30  ;;  %473 = vrot.lane.b32.xlu0 %v471_v57, %s3641_s1  ;;  %v849_v56 = vstv %s2834_s4  ;;  %v876_v57 = vstv %s2836_s6  ;;  %s3116_s4 = sld [smem:[#allocation3 + $0x302]] }
  0xde   : > { %v850_v58 = vmul.f32 %v849_v56, %v2817_v42  ;;  %s3134_s6 = sld [smem:[#allocation3 + $0x482]] }
  0xe1   : > { %466 = vrot.lane.b32.xlu1 %v464_v60, %s3640_s29  ;;  %492 = vrot.lane.b32.xlu0 %v490_v61, %s3643_s22  ;;  %v877_v60 = vmul.f32 %v876_v57, %v2847_v52  ;;  %v869_v61 = vstv %s2850_s7  ;;  %s3136_s7 = sld [smem:[#allocation3 + $0x402]] }
  0xe5   : > { %480 = vrot.lane.b32.xlu1 %v478_v63, %s3642_s30  ;;  %504 = vrot.lane.b32.xlu0 %v502_v0, %s3641_s1  ;;  %v896_v63 = vstv %s2852_s8  ;;  %v870_v0 = vmul.f32 %v869_v61, %v2847_v52  ;;  %s3153_s8 = sld [smem:[#allocation3 + $0x602]] }
  0xe9   : > { %498 = vrot.lane.b32.xlu1 %v496_v2, %s3640_s29  ;;  %521 = vrot.lane.b32.xlu0 %v519_v3, %s3643_s22  ;;  %v897_v2 = vmul.f32 %v896_v63, %v2877_v62  ;;  %v883_v3 = vstv %s2864_s16  ;;  %s3155_s16 = sld [smem:[#allocation3 + $0x582]] }
  0xed   : > { %510 = vrot.lane.b32.xlu1 %v508_v4, %s3642_s30  ;;  %533 = vrot.lane.b32.xlu0 %v531_v5, %s3641_s1  ;;  %v910_v4 = vstv %s2866_s5  ;;  %v884_v5 = vmul.f32 %v883_v3, %v2847_v52  ;;  %s3167_s5 = sld [smem:[#allocation3 + $0x702]] }
  0xf1   : > { %527 = vrot.lane.b32.xlu1 %v525_v7, %s3640_s29  ;;  %550 = vrot.lane.b32.xlu0 %v548_v8, %s3643_s22  ;;  %v911_v7 = vmul.f32 %v910_v4, %v2877_v62  ;;  %v903_v8 = vstv %s2880_s11  ;;  %s3064_s11 = sld [smem:[#allocation3 + $0x281]] }
  0xf5   : > { %539 = vrot.lane.b32.xlu1 %v537_v9, %s3642_s30  ;;  %562 = vrot.lane.b32.xlu0 %v560_v10, %s3641_s1  ;;  %v2905_v9 = vld [vmem:[#allocation2 + $0x20] sm:$0xff]  ;;  %v317_v10 = vstv %s2884_s21  ;;  %s2121_s21 = sshll.u32 %s3612_s20, 6  ;;  %s3221_s20 = sld [smem:[#allocation3 + $0xb02]] }
  0xf9   : > { %556 = vrot.lane.b32.xlu1 %v554_v12, %s3640_s29  ;;  %579 = vrot.lane.b32.xlu0 %v577_v13, %s3643_s22 }
  0xfd   : > { %568 = vrot.lane.b32.xlu1 %v566_v14, %s3642_s30  ;;  %591 = vrot.lane.b32.xlu0 %v589_v15, %s3641_s1  ;;  %v904_v14 = vmul.f32 %v903_v8, %v2877_v62  ;;  %v932_v15 = vmul.f32 %v2905_v9, %v760_v21  ;;  %v944_v21 = vmul.f32 %v2905_v9, %v774_v27 }
 0x101   : > { %585 = vrot.lane.b32.xlu1 %v583_v17, %s3640_s29  ;;  %608 = vrot.lane.b32.xlu0 %v606_v19, %s3643_s22  ;;  %v318_v17 = vmul.f32 %v317_v10, %v2568_v18  ;;  %v917_v19 = vstv %s2894_s9  ;;  %v351_v18 = vstv %s2910_s14  ;;  %s3061_s9 = sld [smem:[#allocation3 + $0x1]] }
 0x102   : > { %v352_v27 = vmul.f32 %v351_v18, %v2578_v22  ;;  %s3073_s14 = sld [smem:[#allocation3 + $0x501]] }
 0x105   : > { %597 = vrot.lane.b32.xlu1 %v595_v23, %s3642_s30  ;;  %620 = vrot.lane.b32.xlu0 %v618_v24, %s3641_s1 }
 0x109   : > { %614 = vrot.lane.b32.xlu1 %v612_v26, %s3640_s29  ;;  %763 = vrot.lane.b32.xlu0 %v761_v25, %s3643_s22  ;;  %v918_v26 = vmul.f32 %v917_v19, %v2877_v62 }
 0x10d   : > { %626 = vrot.lane.b32.xlu1 %v624_v28, %s3642_s30  ;;  %777 = vrot.lane.b32.xlu0 %v775_v29, %s3641_s1  ;;  %v2930_v29 = vld [vmem:[#allocation2 + $0x21] sm:$0xff] }
 0x111   : > { %770 = vrot.lane.b32.xlu1 %v768_v34, %s3640_s29  ;;  %797 = vrot.lane.b32.xlu0 %v795_v35, %s3643_s22 }
 0x115   : > { %784 = vrot.lane.b32.xlu1 %v782_v38, %s3642_s30  ;;  %811 = vrot.lane.b32.xlu0 %v809_v39, %s3641_s1  ;;  %v938_v39 = vmul.f32 %v2905_v9, %v767_v30  ;;  %v950_v30 = vmul.f32 %v2905_v9, %v781_v36  ;;  %v967_v36 = vmul.f32 %v2930_v29, %v801_v40 }
 0x116   : > { %v979_v40 = vmul.f32 %v2930_v29, %v815_v46 }
 0x119   : > { %804 = vrot.lane.b32.xlu1 %v802_v44, %s3640_s29  ;;  %831 = vrot.lane.b32.xlu0 %v829_v45, %s3643_s22  ;;  %v961_v44 = vmul.f32 %v2930_v29, %v794_v33  ;;  %v973_v33 = vmul.f32 %v2930_v29, %v808_v37 }
 0x11d   : > { %818 = vrot.lane.b32.xlu1 %v816_v48, %s3642_s30  ;;  %845 = vrot.lane.b32.xlu0 %v843_v49, %s3641_s1 }
 0x121   : > { %838 = vrot.lane.b32.xlu1 %v836_v54, %s3640_s29  ;;  %865 = vrot.lane.b32.xlu0 %v863_v55, %s3643_s22 }
 0x125   : > { %852 = vrot.lane.b32.xlu1 %v850_v58, %s3642_s30  ;;  %879 = vrot.lane.b32.xlu0 %v877_v60, %s3641_s1  ;;  %v2954_v58 = vld [vmem:[#allocation2 + $0x22] sm:$0xff]  ;;  %v385_v60 = vstv %s2941_s0  ;;  %s3169_s0 = sld [smem:[#allocation3 + $0x682]] }
 0x129   : > { %872 = vrot.lane.b32.xlu1 %v870_v0, %s3640_s29  ;;  %899 = vrot.lane.b32.xlu0 %v897_v2, %s3643_s22 }
 0x12d   : > { %886 = vrot.lane.b32.xlu1 %v884_v5, %s3642_s30  ;;  %913 = vrot.lane.b32.xlu0 %v911_v7, %s3641_s1  ;;  %v990_v5 = vmul.f32 %v2954_v58, %v828_v43  ;;  %v386_v7 = vmul.f32 %v385_v60, %v2608_v31  ;;  %v1002_v43 = vmul.f32 %v2954_v58, %v842_v47 }
 0x12f   : > { %v324_v12 = vpop.permute.xlu1 %323  ;;  %v338_v13 = vpop.permute.xlu0 %337 }
 0x130   : > { %v326_v23 = vadd.f32 %v324_v12, %v318_v17  ;;  %v2978_v17 = vld [vmem:[#allocation2 + $0x23] sm:$0xff] }
 0x131   : > { %906 = vrot.lane.b32.xlu1 %v904_v14, %s3640_s29  ;;  %934 = vrot.lane.b32.xlu0 %v932_v15, %s3643_s22  ;;  %v1019_v46 = vmul.f32 %v2978_v17, %v862_v53 }
 0x133   : > { %v331_v24 = vpop.permute.xlu1 %330  ;;  %v358_v25 = vpop.permute.xlu0 %357 }
 0x134   : > { %v333_v28 = vadd.f32 %v331_v24, %v326_v23 }
 0x135   : > { %920 = vrot.lane.b32.xlu1 %v918_v26, %s3642_s30  ;;  %946 = vrot.lane.b32.xlu0 %v944_v21, %s3641_s1  ;;  %v419_v26 = vstv %s2967_s13  ;;  %s3185_s13 = sld [smem:[#allocation3 + $0x882]] }
 0x136   : > { %v340_v34 = vadd.f32 %v338_v13, %v333_v28 }
 0x137   : > { %v345_v35 = vpop.permute.xlu1 %344  ;;  %v372_v38 = vpop.permute.xlu0 %371 }
 0x138   : > { %v347_v45 = vadd.f32 %v345_v35, %v340_v34  ;;  %v1008_v35 = vmul.f32 %v2954_v58, %v849_v56 }
 0x139   : > { %940 = vrot.lane.b32.xlu1 %v938_v39, %s3640_s29  ;;  %963 = vrot.lane.b32.xlu0 %v961_v44, %s3643_s22  ;;  %v2178_v44 = vld [vmem:[%s2534_s15 + $0x20] sm:$0xff] }
 0x13a   : > { %v353_v48 = vadd.f32 %v352_v27, %v347_v45 }
 0x13b   : > { %v365_v49 = vpop.permute.xlu1 %364  ;;  %v392_v54 = vpop.permute.xlu0 %391 }
 0x13c   : > { %v360_v55 = vadd.f32 %v358_v25, %v353_v48  ;;  %v996_v25 = vmul.f32 %v2954_v58, %v835_v51  ;;  %v1031_v51 = vmul.f32 %v2978_v17, %v876_v57  ;;  %v1025_v57 = vmul.f32 %v2978_v17, %v869_v61  ;;  %v2207_v48 = vld [vmem:[%s2534_s15 + $0x30] sm:$0xff] }
 0x13d   : > { %952 = vrot.lane.b32.xlu1 %v950_v30, %s3642_s30  ;;  %975 = vrot.lane.b32.xlu0 %v973_v33, %s3641_s1  ;;  %v1037_v33 = vmul.f32 %v2978_v17, %v883_v3 }
 0x13e   : > { %v367_v22 = vadd.f32 %v365_v49, %v360_v55  ;;  %v453_v49 = vstv %s2997_s17  ;;  %s3187_s17 = sld [smem:[#allocation3 + $0x802]] }
 0x13f   : > { %v379_v0 = vpop.permute.xlu1 %378  ;;  %v406_v2 = vpop.permute.xlu0 %405  ;;  %v454_v61 = vmul.f32 %v453_v49, %v2665_v50 }
 0x140   : > { %v374_v37 = vadd.f32 %v372_v38, %v367_v22  ;;  %v420_v38 = vmul.f32 %v419_v26, %v2639_v41  ;;  %v3015_v22 = vld [vmem:[#allocation2 + $0x24] sm:$0xff] }
 0x141   : > { %969 = vrot.lane.b32.xlu1 %v967_v36, %s3640_s29  ;;  %992 = vrot.lane.b32.xlu0 %v990_v5, %s3643_s22  ;;  %v1048_v3 = vmul.f32 %v3015_v22, %v896_v63 }
 0x142   : > { %v381_v12 = vadd.f32 %v379_v0, %v374_v37 }
 0x143   : > { %v399_v13 = vpop.permute.xlu1 %398  ;;  %v426_v14 = vpop.permute.xlu0 %425 }
 0x144   : > { %v387_v15 = vadd.f32 %v386_v7, %v381_v12  ;;  %v488_v7 = vmul.f32 %v2683_v59, %v317_v10 }
 0x145   : > { %981 = vrot.lane.b32.xlu1 %v979_v40, %s3642_s30  ;;  %1004 = vrot.lane.b32.xlu0 %v1002_v43, %s3641_s1  ;;  %v1060_v43 = vmul.f32 %v3015_v22, %v910_v4  ;;  %v517_v4 = vmul.f32 %v2698_v1, %v351_v18 }
 0x146   : > { %v394_v31 = vadd.f32 %v392_v54, %v387_v15 }
 0x147   : > { %v413_v23 = vpop.permute.xlu1 %412  ;;  %v440_v24 = vpop.permute.xlu0 %439 }
 0x148   : > { %v401_v47 = vadd.f32 %v399_v13, %v394_v31  ;;  %v2208_v13 = vld [vmem:[%s2534_s15 + $0x38] sm:$0xff] }
 0x149   : > { %998 = vrot.lane.b32.xlu1 %v996_v25, %s3640_s29  ;;  %1021 = vrot.lane.b32.xlu0 %v1019_v46, %s3643_s22 }
 0x14a   : > { %v408_v21 = vadd.f32 %v406_v2, %v401_v47  ;;  %v2179_v2 = vld [vmem:[%s2534_s15 + $0x28] sm:$0xff]  ;;  %s3047_s15 = scalar_lea.vmem [#allocation6], %s2121_s21  ;;  %s3193_s21 = sld [smem:[#allocation3 + $0x282]] }
 0x14b   : > { %v433_v28 = vpop.permute.xlu1 %432  ;;  %v460_v34 = vpop.permute.xlu0 %459  ;;  %3645 = sst [smem:[#allocation19_spill]] %s3047_s15 }
 0x14c   : > { %v415_v53 = vadd.f32 %v413_v23, %v408_v21 }
 0x14d   : > { %1010 = vrot.lane.b32.xlu1 %v1008_v35, %s3642_s30  ;;  %1033 = vrot.lane.b32.xlu0 %v1031_v51, %s3641_s1 }
 0x14e   : > { %v421_v39 = vadd.f32 %v420_v38, %v415_v53  ;;  %v546_v53 = vmul.f32 %v2716_v6, %v385_v60 }
 0x14f   : > { %v447_v27 = vpop.permute.xlu1 %446  ;;  %v474_v56 = vpop.permute.xlu0 %473 }
 0x150   : > { %v428_v45 = vadd.f32 %v426_v14, %v421_v39 }
 0x151   : > { %1027 = vrot.lane.b32.xlu1 %v1025_v57, %s3640_s29  ;;  %1084 = vrot.lane.b32.xlu0 %v2178_v44, %s3644_s18 }
 0x152   : > { %v435_v41 = vadd.f32 %v433_v28, %v428_v45 }
 0x153   : > { %v467_v54 = vpop.permute.xlu1 %466  ;;  %v493_v30 = vpop.permute.xlu0 %492 }
 0x154   : > { %v442_v55 = vadd.f32 %v440_v24, %v435_v41  ;;  %v495_v50 = vadd.f32 %v493_v30, %v488_v7  ;;  %v1054_v24 = vmul.f32 %v3015_v22, %v903_v8  ;;  %v575_v30 = vmul.f32 %v2734_v11, %v419_v26 }
 0x155   : > { %1039 = vrot.lane.b32.xlu1 %v1037_v33, %s3642_s30  ;;  %1527 = vrot.lane.b32.xlu0 %v2207_v48, %s3644_s18  ;;  %v604_v11 = vmul.f32 %v2750_v16, %v453_v49 }
 0x156   : > { %v449_v0 = vadd.f32 %v447_v27, %v442_v55 }
 0x157   : > { %v481_v36 = vpop.permute.xlu1 %480  ;;  %v505_v5 = vpop.permute.xlu0 %504 }
 0x158   : > { %v455_v37 = vadd.f32 %v454_v61, %v449_v0 }
 0x159   : > { %1086 = vrot.lane.b32.xlu1 %v2179_v2, %s3644_s18  ;;  %1050 = vrot.lane.b32.xlu0 %v1048_v3, %s3643_s22  ;;  %v757_v3 = vstv %s3061_s9  ;;  %s3201_s9 = sld [smem:[#allocation3 + $0x502]] }
 0x15a   : > { %v462_v12 = vadd.f32 %v460_v34, %v455_v37  ;;  %v1066_v34 = vmul.f32 %v3015_v22, %v917_v19 }
 0x15b   : > { %v499_v14 = vpop.permute.xlu1 %498  ;;  %v522_v40 = vpop.permute.xlu0 %521 }
 0x15c   : > { %v469_v63 = vadd.f32 %v467_v54, %v462_v12  ;;  %v501_v15 = vadd.f32 %v499_v14, %v495_v50  ;;  %v758_v50 = vmul.f32 %v757_v3, %v2760_v20 }
 0x15d   : > { %1529 = vrot.lane.b32.xlu1 %v2208_v13, %s3644_s18  ;;  %1062 = vrot.lane.b32.xlu0 %v1060_v43, %s3641_s1  ;;  %s3191_s18 = sld [smem:[#allocation3 + $0x2]] }
 0x15e   : > { %v476_v59 = vadd.f32 %v474_v56, %v469_v63  ;;  %v507_v10 = vadd.f32 %v505_v5, %v501_v15 }
 0x15f   : > { %v511_v31 = vpop.permute.xlu1 %510  ;;  %v534_v23 = vpop.permute.xlu0 %533 }
 0x160   : > { %v483_v25 = vadd.f32 %v481_v36, %v476_v59  ;;  %v513_v46 = vadd.f32 %v511_v31, %v507_v10  ;;  %v791_v59 = vstv %s3064_s11  ;;  %s3205_s11 = sld [smem:[#allocation3 + $0x982]] }
 0x161   : > { %1056 = vrot.lane.b32.xlu1 %v1054_v24, %s3640_s29  ;;  %v792_v49 = vmul.f32 %v791_v59, %v2787_v32 }
 0x162   : > { %485 = vst.msk [vmem:[%s3047_s15] sm:$0xff] %vm484_vm4, %v483_v25  ;;  %v518_v47 = vadd.f32 %v517_v4, %v513_v46 }
 0x163   : > { %v528_v21 = vpop.permute.xlu1 %527  ;;  %v551_v28 = vpop.permute.xlu0 %550 }
 0x164   : > { %v524_v8 = vadd.f32 %v522_v40, %v518_v47 }
 0x165   : > { %1068 = vrot.lane.b32.xlu1 %v1066_v34, %s3642_s30 }
 0x166   : > { %v530_v35 = vadd.f32 %v528_v21, %v524_v8 }
 0x167   : > { %v540_v1 = vpop.permute.xlu1 %539  ;;  %v563_v18 = vpop.permute.xlu0 %562 }
 0x168   : > { %v536_v51 = vadd.f32 %v534_v23, %v530_v35 }
 0x16a   : > { %v542_v38 = vadd.f32 %v540_v1, %v536_v51 }
 0x16b   : > { %v557_v39 = vpop.permute.xlu1 %556  ;;  %v580_v44 = vpop.permute.xlu0 %579 }
 0x16c   : > { %v547_v27 = vadd.f32 %v546_v53, %v542_v38 }
 0x16e   : > { %v553_v56 = vadd.f32 %v551_v28, %v547_v27  ;;  %v825_v28 = vstv %s3073_s14  ;;  %s3207_s14 = sld [smem:[#allocation3 + $0x902]] }
 0x16f   : > { %v569_v57 = vpop.permute.xlu1 %568  ;;  %v592_v45 = vpop.permute.xlu0 %591  ;;  %v826_v1 = vmul.f32 %v825_v28, %v2817_v42 }
 0x170   : > { %v559_v41 = vadd.f32 %v557_v39, %v553_v56  ;;  %v859_v56 = vstv %s3079_s23  ;;  %s3211_s23 = sld [smem:[#allocation3 + $0x782]] }
 0x172   : > { %v565_v19 = vadd.f32 %v563_v18, %v559_v41 }
 0x173   : > { %v586_v48 = vpop.permute.xlu1 %585  ;;  %v609_v54 = vpop.permute.xlu0 %608 }
 0x174   : > { %v571_v33 = vadd.f32 %v569_v57, %v565_v19  ;;  %v860_v19 = vmul.f32 %v859_v56, %v2847_v52  ;;  %v930_v52 = vmul.f32 %v2905_v9, %v757_v3 }
 0x176   : > { %v576_v6 = vadd.f32 %v575_v30, %v571_v33 }
 0x177   : > { %v598_v60 = vpop.permute.xlu1 %597  ;;  %v621_v55 = vpop.permute.xlu0 %620 }
 0x178   : > { %v582_v61 = vadd.f32 %v580_v44, %v576_v6 }
 0x17a   : > { %v588_v0 = vadd.f32 %v586_v48, %v582_v61 }
 0x17b   : > { %v615_v2 = vpop.permute.xlu1 %614  ;;  %v764_v36 = vpop.permute.xlu0 %763 }
 0x17c   : > { %v594_v5 = vadd.f32 %v592_v45, %v588_v0  ;;  %v766_v14 = vadd.f32 %v764_v36, %v758_v50 }
 0x17e   : > { %v600_v26 = vadd.f32 %v598_v60, %v594_v5  ;;  %v893_v60 = vstv %s3083_s24  ;;  %s3213_s24 = sld [smem:[#allocation3 + $0xa02]] }
 0x17f   : > { %v627_v37 = vpop.permute.xlu1 %626  ;;  %v778_v7 = vpop.permute.xlu0 %777 }
 0x180   : > { %v605_v12 = vadd.f32 %v604_v11, %v600_v26 }
 0x182   : > { %v611_v13 = vadd.f32 %v609_v54, %v605_v12 }
 0x183   : > { %v771_v40 = vpop.permute.xlu1 %770  ;;  %v798_v43 = vpop.permute.xlu0 %797 }
 0x184   : > { %v617_v63 = vadd.f32 %v615_v2, %v611_v13  ;;  %v773_v15 = vadd.f32 %v771_v40, %v766_v14  ;;  %v894_v2 = vmul.f32 %v893_v60, %v2877_v62  ;;  %v959_v62 = vmul.f32 %v2930_v29, %v791_v59 }
 0x186   : > { %v623_v10 = vadd.f32 %v621_v55, %v617_v63  ;;  %v780_v31 = vadd.f32 %v778_v7, %v773_v15 }
 0x187   : > { %v785_v23 = vpop.permute.xlu1 %784  ;;  %v812_v24 = vpop.permute.xlu0 %811 }
 0x188   : > { %v629_v16 = vadd.f32 %v627_v37, %v623_v10  ;;  %v787_v25 = vadd.f32 %v785_v23, %v780_v31 }
 0x18a   : > { %2148 = vst.msk [vmem:[%s3047_s15 + $0x8] sm:$0xff] %vm484_vm4, %v629_v16  ;;  %v793_v20 = vadd.f32 %v792_v49, %v787_v25 }
 0x18b   : > { %v805_v4 = vpop.permute.xlu1 %804  ;;  %v832_v46 = vpop.permute.xlu0 %831 }
 0x18c   : > { %v800_v47 = vadd.f32 %v798_v43, %v793_v20 }
 0x18e   : > { %v807_v21 = vadd.f32 %v805_v4, %v800_v47  ;;  %v988_v4 = vmul.f32 %v2954_v58, %v825_v28 }
 0x18f   : > { %v819_v34 = vpop.permute.xlu1 %818  ;;  %v846_v8 = vpop.permute.xlu0 %845 }
 0x190   : > { %v814_v35 = vadd.f32 %v812_v24, %v807_v21 }
 0x192   : > { %v821_v18 = vadd.f32 %v819_v34, %v814_v35 }
 0x193   : > { %v839_v51 = vpop.permute.xlu1 %838  ;;  %v866_v32 = vpop.permute.xlu0 %865 }
 0x194   : > { %v827_v53 = vadd.f32 %v826_v1, %v821_v18 }
 0x196   : > { %v834_v38 = vadd.f32 %v832_v46, %v827_v53 }
 0x197   : > { %v853_v39 = vpop.permute.xlu1 %852  ;;  %v880_v44 = vpop.permute.xlu0 %879 }
 0x198   : > { %v841_v27 = vadd.f32 %v839_v51, %v834_v38 }
 0x19a   : > { %v848_v57 = vadd.f32 %v846_v8, %v841_v27 }
 0x19b   : > { %v873_v45 = vpop.permute.xlu1 %872  ;;  %v900_v41 = vpop.permute.xlu0 %899 }
 0x19c   : > { %v855_v42 = vadd.f32 %v853_v39, %v848_v57 }
 0x19e   : > { %v861_v48 = vadd.f32 %v860_v19, %v855_v42  ;;  %v1203_v19 = vstv %s3099_s26  ;;  %s2215_s26 = sld [smem:[#allocation3 + $0x303]] }
 0x19f   : > { %v887_v54 = vpop.permute.xlu1 %886  ;;  %v914_v30 = vpop.permute.xlu0 %913 }
 0x1a0   : > { %v868_v33 = vadd.f32 %v866_v32, %v861_v48  ;;  %v1017_v32 = vmul.f32 %v2978_v17, %v859_v56 }
 0x1a2   : > { %v875_v6 = vadd.f32 %v873_v45, %v868_v33 }
 0x1a3   : > { %v907_v55 = vpop.permute.xlu1 %906  ;;  %v935_v61 = vpop.permute.xlu0 %934 }
 0x1a4   : > { %v882_v0 = vadd.f32 %v880_v44, %v875_v6  ;;  %v937_v7 = vadd.f32 %v935_v61, %v930_v52  ;;  %v1046_v6 = vmul.f32 %v3015_v22, %v893_v60 }
 0x1a6   : > { %v889_v36 = vadd.f32 %v887_v54, %v882_v0 }
 0x1a7   : > { %v921_v5 = vpop.permute.xlu1 %920  ;;  %v947_v11 = vpop.permute.xlu0 %946 }
 0x1a8   : > { %v895_v26 = vadd.f32 %v894_v2, %v889_v36  ;;  %v1224_v2 = vstv %s3105_s27  ;;  %v1217_v36 = vstv %s3107_s28  ;;  %s2217_s27 = sld [smem:[#allocation3 + $0x403]] }
 0x1a9   : > { %s2218_s28 = sld [smem:[#allocation3 + $0x483]] }
 0x1aa   : > { %v902_v37 = vadd.f32 %v900_v41, %v895_v26  ;;  %v1210_v41 = vstv %s3097_s25  ;;  %s2212_s25 = sld [smem:[#allocation3 + $0x183]] }
 0x1ab   : > { %v941_v12 = vpop.permute.xlu1 %940  ;;  %v964_v50 = vpop.permute.xlu0 %963 }
 0x1ac   : > { %v909_v13 = vadd.f32 %v907_v55, %v902_v37  ;;  %v943_v14 = vadd.f32 %v941_v12, %v937_v7 }
 0x1ae   : > { %v916_v40 = vadd.f32 %v914_v30, %v909_v13  ;;  %v949_v43 = vadd.f32 %v947_v11, %v943_v14  ;;  %v1237_v13 = vstv %s3116_s4  ;;  %s2221_s4 = sld [smem:[#allocation3 + $0x603]] }
 0x1af   : > { %v953_v63 = vpop.permute.xlu1 %952  ;;  %v976_v15 = vpop.permute.xlu0 %975 }
 0x1b0   : > { %v923_v10 = vadd.f32 %v921_v5, %v916_v40  ;;  %v955_v31 = vadd.f32 %v953_v63, %v949_v43 }
 0x1b2   : > { %2176 = vst.msk [vmem:[%s3047_s15 + $0x10] sm:$0xff] %vm484_vm4, %v923_v10  ;;  %v960_v23 = vadd.f32 %v959_v62, %v955_v31  ;;  %v1258_v62 = vstv %s3134_s6  ;;  %v1251_v31 = vstv %s3136_s7  ;;  %s2222_s6 = sld [smem:[#allocation3 + $0x683]] }
 0x1b3   : > { %v970_v24 = vpop.permute.xlu1 %969  ;;  %v993_v16 = vpop.permute.xlu0 %992  ;;  %s2223_s7 = sld [smem:[#allocation3 + $0x703]] }
 0x1b4   : > { %v966_v9 = vadd.f32 %v964_v50, %v960_v23  ;;  %v1244_v50 = vstv %s3114_s3  ;;  %s2220_s3 = sld [smem:[#allocation3 + $0x583]] }
 0x1b6   : > { %v972_v3 = vadd.f32 %v970_v24, %v966_v9 }
 0x1b7   : > { %v982_v49 = vpop.permute.xlu1 %981  ;;  %v1005_v25 = vpop.permute.xlu0 %1004 }
 0x1b8   : > { %v978_v20 = vadd.f32 %v976_v15, %v972_v3  ;;  %v1278_v3 = vstv %s3153_s8  ;;  %s2225_s8 = sld [smem:[#allocation3 + $0x803]] }
 0x1ba   : > { %v984_v46 = vadd.f32 %v982_v49, %v978_v20  ;;  %v1271_v49 = vstv %s3155_s16  ;;  %s2226_s16 = sld [smem:[#allocation3 + $0x883]] }
 0x1bb   : > { %v999_v47 = vpop.permute.xlu1 %998  ;;  %v1022_v21 = vpop.permute.xlu0 %1021 }
 0x1bc   : > { %v989_v34 = vadd.f32 %v988_v4, %v984_v46  ;;  %v1292_v4 = vstv %s3167_s5  ;;  %v1285_v46 = vstv %s3169_s0  ;;  %s3424_s5 = sld [smem:[#allocation3 + $0x903]] }
 0x1bd   : > { %s2228_s0 = sld [smem:[#allocation3 + $0x983]] }
 0x1be   : > { %v995_v8 = vadd.f32 %v993_v16, %v989_v34 }
 0x1bf   : > { %v1011_v35 = vpop.permute.xlu1 %1010  ;;  %v1034_v29 = vpop.permute.xlu0 %1033 }
 0x1c0   : > { %v1001_v59 = vadd.f32 %v999_v47, %v995_v8 }
 0x1c2   : > { %v1007_v1 = vadd.f32 %v1005_v25, %v1001_v59  ;;  %v1305_v59 = vstv %s3187_s17  ;;  %s2231_s17 = sld [smem:[#allocation3 + $0xb03]] }
 0x1c3   : > { %v1028_v18 = vpop.permute.xlu1 %1027  ;;  %v1085_v51 = vpop.permute.xlu0 %1084 }
 0x1c4   : > { %v1013_v53 = vadd.f32 %v1011_v35, %v1007_v1  ;;  %v1090_v58 = vsel %vm206_vm1, 0.0, %v1085_v51  ;;  %v1234_v51 = vstv %s3193_s21  ;;  %s3648_s21 = sld [smem:[#allocation10_spill]] }
 0x1c5   : > { %v1092_v28 = vsel %vm209_vm2, %v1090_v58, 0.0 }
 0x1c6   : > { %v1018_v38 = vadd.f32 %v1017_v32, %v1013_v53  ;;  %1094 = vst.msk [vmem:[#allocation2 + $0x32] sm:$0xff] %vm212_vm3, %v1092_v28 }
 0x1c7   : > { %v1040_v39 = vpop.permute.xlu1 %1039  ;;  %v1528_v44 = vpop.permute.xlu0 %1527 }
 0x1c8   : > { %v1024_v27 = vadd.f32 %v1022_v21, %v1018_v38  ;;  %v1533_v17 = vsel %vm206_vm1, 0.0, %v1528_v44  ;;  %v1319_v44 = vstv %s3207_s14 }
 0x1c9   : > { %v1535_v56 = vsel %vm209_vm2, %v1533_v17, 0.0 }
 0x1ca   : > { %v1030_v57 = vadd.f32 %v1028_v18, %v1024_v27  ;;  %1537 = vst.msk [vmem:[#allocation2 + $0x4a] sm:$0xff] %vm212_vm3, %v1535_v56  ;;  %v1200_v18 = vstv %s3191_s18  ;;  %v1268_v27 = vstv %s3201_s9  ;;  %v1302_v56 = vstv %s3211_s23  ;;  %s3475_s18 = sld [smem:[#allocation3 + $0xb83]] }
 0x1cb   : > { %v1087_v45 = vpop.permute.xlu1 %1086  ;;  %v1051_v11 = vpop.permute.xlu0 %1050 }
 0x1cc   : > { %v1036_v42 = vadd.f32 %v1034_v29, %v1030_v57  ;;  %v1091_v48 = vsel %vm206_vm1, 0.0, %v1087_v45  ;;  %v1312_v29 = vstv %s3185_s13  ;;  %v1336_v45 = vstv %s3213_s24  ;;  %s3449_s13 = sld [smem:[#allocation3 + $0xa83]] }
 0x1cd   : > { %v1093_v54 = vsel %vm209_vm2, %v1091_v48, 0.0  ;;  %v3120_v30 = vld [vmem:[#allocation2 + $0x30] sm:$0xff] }
 0x1ce   : > { %v1042_v33 = vadd.f32 %v1040_v39, %v1036_v42  ;;  %1095 = vst.msk [vmem:[#allocation2 + $0x3a] sm:$0xff] %vm212_vm3, %v1093_v54  ;;  %v1211_v55 = vmul.f32 %v1210_v41, %v3120_v30  ;;  %v1204_v61 = vmul.f32 %v1203_v19, %v3120_v30  ;;  %v1225_v52 = vmul.f32 %v1224_v2, %v3120_v30  ;;  %v3149_v12 = vld [vmem:[#allocation2 + $0x31] sm:$0xff] }
 0x1cf   : > { %v1530_v0 = vpop.permute.xlu1 %1529  ;;  %v1218_v37 = vmul.f32 %v1217_v36, %v3120_v30  ;;  %v1063_v40 = vpop.permute.xlu0 %1062  ;;  %v1245_v43 = vmul.f32 %v1244_v50, %v3149_v12  ;;  %v1238_v63 = vmul.f32 %v1237_v13, %v3149_v12  ;;  %v1259_v24 = vmul.f32 %v1258_v62, %v3149_v12  ;;  %v3181_v9 = vld [vmem:[#allocation2 + $0x32] sm:$0xff] }
 0x1d0   : > { %v1047_v5 = vadd.f32 %v1046_v6, %v1042_v33  ;;  %v1534_v22 = vsel %vm206_vm1, 0.0, %v1530_v0  ;;  %1213 = vrot.lane.b32.xlu1 %v1211_v55, %s3640_s29  ;;  %1206 = vrot.lane.b32.xlu0 %v1204_v61, %s3643_s22  ;;  %v1252_v16 = vmul.f32 %v1251_v31, %v3149_v12  ;;  %v1279_v25 = vmul.f32 %v1278_v3, %v3181_v9 }
 0x1d1   : > { %v1536_v60 = vsel %vm209_vm2, %v1534_v22, 0.0  ;;  %v1272_v20 = vmul.f32 %v1271_v49, %v3181_v9  ;;  %v1293_v47 = vmul.f32 %v1292_v4, %v3181_v9  ;;  %v1286_v21 = vmul.f32 %v1285_v46, %v3181_v9 }
 0x1d2   : > { %v1053_v26 = vadd.f32 %v1051_v11, %v1047_v5  ;;  %1538 = vst.msk [vmem:[#allocation2 + $0x52] sm:$0xff] %vm212_vm3, %v1536_v60  ;;  %v1326_v39 = vstv %s3205_s11  ;;  %v1346_v55 = vstv %s3221_s20  ;;  %v1339_v61 = vstv %s3229_s2  ;;  %s2233_s2 = sld [smem:[#allocation3 + $0xc03]]  ;;  %s3647_s20 = sld [smem:[#allocation12_spill]] }
 0x1d3   : > { %v1057_v7 = vpop.permute.xlu1 %1056  ;;  %v1360_v11 = vstv %s3256_s19  ;;  %v1353_v22 = vstv %s3258_s10  ;;  %s3646_s10 = sld [smem:[#allocation19_spill]]  ;;  %s2214_s19 = sld [smem:[#allocation3 + $0x283]] }
 0x1d4   : > { %v1059_v14 = vadd.f32 %v1057_v7, %v1053_v26  ;;  %1227 = vrot.lane.b32.xlu1 %v1225_v52, %s3642_s30  ;;  %1220 = vrot.lane.b32.xlu0 %v1218_v37, %s3641_s1 }
 0x1d5   : > { %v1372_v34 = vld [vmem:[#allocation2 + $0x38] sm:$0xff] }
 0x1d6   : > { %v1065_v10 = vadd.f32 %v1063_v40, %v1059_v14  ;;  %v3223_v8 = vld [vmem:[#allocation2 + $0x39] sm:$0xff]  ;;  %v3247_v28 = vmul.f32 %v1372_v34, %v1200_v18  ;;  %v1381_v52 = vmul.f32 %v1372_v34, %v1210_v41  ;;  %v1375_v37 = vmul.f32 %v1372_v34, %v1203_v19  ;;  %v3324_v40 = vld [vmem:[#allocation2 + $0x48] sm:$0xff] }
 0x1d7   : > { %v1069_v15 = vpop.permute.xlu1 %1068  ;;  %v3225_v35 = vld [vmem:[#allocation2 + $0x33] sm:$0xff]  ;;  %v3243_v58 = vld [vmem:[#allocation2 + $0x3b] sm:$0xff]  ;;  %v3252_v38 = vmul.f32 %v3223_v8, %v1234_v51  ;;  %v1393_v7 = vmul.f32 %v1372_v34, %v1224_v2  ;;  %v1387_v14 = vmul.f32 %v1372_v34, %v1217_v36  ;;  %v1410_v41 = vmul.f32 %v3223_v8, %v1244_v50 }
 0x1d8   : > { %1247 = vrot.lane.b32.xlu1 %v1245_v43, %s3640_s29  ;;  %1240 = vrot.lane.b32.xlu0 %v1238_v63, %s3643_s22  ;;  %v1071_v23 = vadd.f32 %v1069_v15, %v1065_v10  ;;  %v3233_v1 = vld [vmem:[#allocation2 + $0x3a] sm:$0xff]  ;;  %v1313_v32 = vmul.f32 %v1312_v29, %v3225_v35  ;;  %v1306_v53 = vmul.f32 %v1305_v59, %v3225_v35  ;;  %v1646_v43 = vstv %s2210_s12  ;;  %s2213_s12 = sld [smem:[#allocation3 + $0x203]]  ;;  %s2242_s9 = sshll.u32 %s3647_s20, 10 }
 0x1d9   : > { %v3261_v17 = vld [vmem:[#allocation2 + $0x3c] sm:$0xff]  ;;  %v3269_v57 = vmul.f32 %v3233_v1, %v1268_v27  ;;  %v3275_v42 = vmul.f32 %v3243_v58, %v1302_v56  ;;  %v1327_v48 = vmul.f32 %v1326_v39, %v3225_v35  ;;  %v1320_v54 = vmul.f32 %v1319_v44, %v3225_v35  ;;  %v3288_v6 = vld [vmem:[#allocation2 + $0x34] sm:$0xff]  ;;  %s1976_s14 = sshll.u32 %s3646_s10, 4  ;;  %s3538_s14 = int_to_ptr.vmem [resolvable:$true] %s1976_s14 }
 0x1da   : > { %2177 = vst.msk [vmem:[%s3047_s15 + $0x18] sm:$0xff] %vm484_vm4, %v1071_v23  ;;  %v3286_v33 = vmul.f32 %v3261_v17, %v1336_v45  ;;  %v1347_v0 = vmul.f32 %v1346_v55, %v3288_v6  ;;  %v1340_v5 = vmul.f32 %v1339_v61, %v3288_v6  ;;  %v1361_v60 = vmul.f32 %v1360_v11, %v3288_v6  ;;  %s2211_s15 = sld [smem:[#allocation3 + $0x103]]  ;;  %v3338_v63 = vld [vmem:[#allocation2 + $0x50] sm:$0xff] }
 0x1db   : > { %v1354_v26 = vmul.f32 %v1353_v22, %v3288_v6  ;;  %v1404_v19 = vmul.f32 %v3223_v8, %v1237_v13  ;;  %v1647_v2 = vmul.f32 %v1646_v43, %v3324_v40  ;;  %v1416_v36 = vmul.f32 %v3223_v8, %v1251_v31 }
 0x1dc   : > { %1261 = vrot.lane.b32.xlu1 %v1259_v24, %s3642_s30  ;;  %1254 = vrot.lane.b32.xlu0 %v1252_v16, %s3641_s1  ;;  %v1817_v50 = vmul.f32 %v3338_v63, %v1646_v43  ;;  %v1660_v10 = vstv %s2212_s25  ;;  %v3378_v43 = vld [vmem:[#allocation2 + $0x4a] sm:$0xff]  ;;  %s3650_s25 = sld [smem:[#allocation22_spill]] }
 0x1dd   : > { %v1661_v23 = vmul.f32 %v1660_v10, %v3324_v40  ;;  %v1829_v16 = vmul.f32 %v3338_v63, %v1660_v10 }
 0x1de   : > { %v1667_v24 = vstv %s2213_s12 }
 0x1e0   : > { %1281 = vrot.lane.b32.xlu1 %v1279_v25, %s3640_s29  ;;  %1274 = vrot.lane.b32.xlu0 %v1272_v20, %s3643_s22  ;;  %v1653_v15 = vstv %s2211_s15  ;;  %s2216_s15 = sld [smem:[#allocation3 + $0x383]]  ;;  %v1668_v25 = vmul.f32 %v1667_v24, %v3324_v40  ;;  %v3352_v20 = vld [vmem:[#allocation2 + $0x49] sm:$0xff] }
 0x1e1   : > { %v1654_v13 = vmul.f32 %v1653_v15, %v3324_v40  ;;  %v1823_v31 = vmul.f32 %v3338_v63, %v1653_v15  ;;  %v1721_v15 = vstv %s2221_s4 }
 0x1e2   : > { %s3536_s12 = scalar_lea.hbm %s3650_s25, %s2242_s9 }
 0x1e4   : > { %1295 = vrot.lane.b32.xlu1 %v1293_v47, %s3642_s30  ;;  %1288 = vrot.lane.b32.xlu0 %v1286_v21, %s3641_s1  ;;  %v1680_v47 = vstv %s2215_s26  ;;  %v1835_v21 = vmul.f32 %v3338_v63, %v1667_v24  ;;  %v1735_v24 = vstv %s2223_s7  ;;  %s3651_s26 = sand.u32 1, %s3648_s21  }
 0x1e5   : > { %v1681_v34 = vmul.f32 %v1680_v47, %v3352_v20 }
 0x1e8   : > { %1315 = vrot.lane.b32.xlu1 %v1313_v32, %s3640_s29  ;;  %1308 = vrot.lane.b32.xlu0 %v1306_v53, %s3643_s22  ;;  %v3358_v32 = vld [vmem:[#allocation2 + $0x51] sm:$0xff]  ;;  %v1687_v53 = vstv %s2216_s15  ;;  %s3546_s15 = scalar_lea.sflag [#allocation4], %s3651_s26 }
 0x1ec   : > { %1329 = vrot.lane.b32.xlu1 %v1327_v48, %s3642_s30  ;;  %1322 = vrot.lane.b32.xlu0 %v1320_v54, %s3641_s1  ;;  %v1846_v48 = vmul.f32 %v3358_v32, %v1680_v47  ;;  %v1688_v54 = vmul.f32 %v1687_v53, %v3352_v20  ;;  %v1748_v47 = vstv %s2225_s8 }
 0x1f0   : > { %1349 = vrot.lane.b32.xlu1 %v1347_v0, %s3640_s29  ;;  %1342 = vrot.lane.b32.xlu0 %v1340_v5, %s3643_s22  ;;  %v1694_v0 = vstv %s2217_s27  ;;  %v1852_v5 = vmul.f32 %v3358_v32, %v1687_v53  ;;  %s2334_s27 = scalar_lea.vmem %s3538_s14, 1024 }
 0x1f1   : > { %p2335_p10 = scmp.ne.s32.totalorder %s3538_s14, %s2334_s27 }
 0x1f3   : > { %p2336_p11 = pnand %p2335_p10, %p2485_p4 }
 0x1f4   : > { %1363 = vrot.lane.b32.xlu1 %v1361_v60, %s3642_s30  ;;  %1356 = vrot.lane.b32.xlu0 %v1354_v26, %s3641_s1  ;;  %v1695_v60 = vmul.f32 %v1694_v0, %v3352_v20  ;;  %v1422_v26 = vmul.f32 %v3223_v8, %v1258_v62  ;;  %v1433_v62 = vmul.f32 %v3233_v1, %v1271_v49 }
 0x1f5   : > { %v1722_v49 = vmul.f32 %v1721_v15, %v3378_v43  ;;  %p2337_p13 = pneg %p2336_p11 }
 0x1f8   : > { %1383 = vrot.lane.b32.xlu1 %v1381_v52, %s3640_s29  ;;  %1377 = vrot.lane.b32.xlu0 %v1375_v37, %s3643_s22  ;;  %v1858_v52 = vmul.f32 %v3358_v32, %v1694_v0  ;;  %v1701_v37 = vstv %s2218_s28  ;;  %s2427_s28 = smov [#allocation6]  }
 0x1fc   : > { %1395 = vrot.lane.b32.xlu1 %v1393_v7, %s3642_s30  ;;  %1389 = vrot.lane.b32.xlu0 %v1387_v14, %s3641_s1  ;;  %v1702_v7 = vmul.f32 %v1701_v37, %v3352_v20  ;;  %v1864_v14 = vmul.f32 %v3358_v32, %v1701_v37 }
 0x200   : > { %1412 = vrot.lane.b32.xlu1 %v1410_v41, %s3640_s29  ;;  %1406 = vrot.lane.b32.xlu0 %v1404_v19, %s3643_s22  ;;  %v1714_v41 = vstv %s2220_s3  ;;  %v3386_v19 = vld [vmem:[#allocation2 + $0x52] sm:$0xff]  ;;  %s2338_s3 = sshll.u32 %s2427_s28, 4  ;;  %s2339_s3 = int_to_ptr.vmem [resolvable:$false] %s2338_s3 }
 0x201   : > { %v1715_v8 = vmul.f32 %v1714_v41, %v3378_v43  ;;  %s2340_s4 = scalar_lea.vmem %s2339_s3, 2048  ;;  %p2341_p0 = scmp.lt.s32.totalorder %s3538_s14, %s2339_s3 }
 0x202   : > { %p2342_p1 = scmp.lt.s32.totalorder %s2340_s4, %s2334_s27 }
 0x204   : > { %1418 = vrot.lane.b32.xlu0 %v1416_v36, %s3641_s1  ;;  %1649 = vrot.lane.b32.xlu1 %v1647_v2, %s3643_s22  ;;  %v1439_v2 = vmul.f32 %v3233_v1, %v1278_v3  ;;  %v1875_v36 = vmul.f32 %v3386_v19, %v1714_v41  ;;  %v1445_v3 = vmul.f32 %v3233_v1, %v1285_v46  ;;  %p2343_p2 = por %p2342_p1, %p2341_p0 }
 0x205   : > { %v1736_v46 = vmul.f32 %v1735_v24, %v3378_v43 }
 0x206   : > { %p2344_p3 = pnand %p2343_p2, %p2337_p13 }
 0x208   : > { %1819 = vrot.lane.b32.xlu0 %v1817_v50, %s3643_s22  ;;  %1656 = vrot.lane.b32.xlu1 %v1654_v13, %s3640_s29  ;;  %v1881_v50 = vmul.f32 %v3386_v19, %v1721_v15  ;;  %v1728_v13 = vstv %s2222_s6 }
 0x209   : > { %v1729_v10 = vmul.f32 %v1728_v13, %v3378_v43 }
 0x20c   : > { %1825 = vrot.lane.b32.xlu0 %v1823_v31, %s3640_s29  ;;  %1663 = vrot.lane.b32.xlu1 %v1661_v23, %s3641_s1  ;;  %v1887_v31 = vmul.f32 %v3386_v19, %v1728_v13  ;;  %v1451_v23 = vmul.f32 %v3233_v1, %v1292_v4  ;;  %v1462_v4 = vmul.f32 %v3243_v58, %v1305_v59  ;;  %v1769_v13 = vstv %s2228_s0 }
 0x20d   : > { %v1468_v59 = vmul.f32 %v3243_v58, %v1312_v29 }
 0x210   : > { %1831 = vrot.lane.b32.xlu0 %v1829_v16, %s3641_s1  ;;  %1670 = vrot.lane.b32.xlu1 %v1668_v25, %s3642_s30  ;;  %v1893_v16 = vmul.f32 %v3386_v19, %v1735_v24  ;;  %v3414_v25 = vld [vmem:[#allocation2 + $0x4b] sm:$0xff] }
 0x211   : > { %v1749_v1 = vmul.f32 %v1748_v47, %v3414_v25 }
 0x214   : > { %1837 = vrot.lane.b32.xlu0 %v1835_v21, %s3642_s30  ;;  %1683 = vrot.lane.b32.xlu1 %v1681_v34, %s3643_s22  ;;  %v3422_v21 = vld [vmem:[#allocation2 + $0x53] sm:$0xff]  ;;  %v1201_v34 = vmul.f32 %v1200_v18, %v3120_v30 }
 0x215   : > { %v1922_v24 = vmul.f32 %v3422_v21, %v1769_v13 }
 0x218   : > { %1848 = vrot.lane.b32.xlu0 %v1846_v48, %s3643_s22  ;;  %1690 = vrot.lane.b32.xlu1 %v1688_v54, %s3640_s29  ;;  %v1904_v54 = vmul.f32 %v3422_v21, %v1748_v47  ;;  %v3464_v47 = vld [vmem:[#allocation2 + $0x4c] sm:$0xff] }
 0x21c   : > { %1854 = vrot.lane.b32.xlu0 %v1852_v5, %s3640_s29  ;;  %1697 = vrot.lane.b32.xlu1 %v1695_v60, %s3641_s1  ;;  %v1755_v5 = vstv %s2226_s16 }
 0x21d   : > { %v1756_v30 = vmul.f32 %v1755_v5, %v3414_v25  ;;  %v1910_v18 = vmul.f32 %v3422_v21, %v1755_v5 }
 0x220   : > { %1860 = vrot.lane.b32.xlu0 %v1858_v52, %s3641_s1  ;;  %1424 = vrot.lane.b32.xlu1 %v1422_v26, %s3642_s30 }
 0x224   : > { %1704 = vrot.lane.b32.xlu0 %v1702_v7, %s3642_s30  ;;  %1866 = vrot.lane.b32.xlu1 %v1864_v14, %s3642_s30  ;;  %v1762_v7 = vstv %s3424_s5  ;;  %v1235_v14 = vmul.f32 %v1234_v51, %v3149_v12  ;;  %v1480_v51 = vmul.f32 %v3243_v58, %v1326_v39 }
 0x225   : > { %v1916_v12 = vmul.f32 %v3422_v21, %v1762_v7 }
 0x228   : > { %1435 = vrot.lane.b32.xlu0 %v1433_v62, %s3643_s22  ;;  %1717 = vrot.lane.b32.xlu1 %v1715_v8, %s3643_s22  ;;  %v1474_v8 = vmul.f32 %v3243_v58, %v1319_v44  ;;  %v1782_v58 = vstv %s3449_s13 }
 0x22c   : > { %1877 = vrot.lane.b32.xlu0 %v1875_v36, %s3643_s22  ;;  %1441 = vrot.lane.b32.xlu1 %v1439_v2, %s3640_s29  ;;  %v1763_v2 = vmul.f32 %v1762_v7, %v3414_v25 }
 0x230   : > { %1724 = vrot.lane.b32.xlu0 %v1722_v49, %s3640_s29  ;;  %1883 = vrot.lane.b32.xlu1 %v1881_v50, %s3640_s29 }
 0x234   : > { %1447 = vrot.lane.b32.xlu0 %v1445_v3, %s3641_s1  ;;  %1731 = vrot.lane.b32.xlu1 %v1729_v10, %s3641_s1 }
 0x238   : > { %1889 = vrot.lane.b32.xlu0 %v1887_v31, %s3641_s1  ;;  %1453 = vrot.lane.b32.xlu1 %v1451_v23, %s3642_s30  ;;  %v1770_v23 = vmul.f32 %v1769_v13, %v3414_v25 }
 0x23c   : > { %1738 = vrot.lane.b32.xlu0 %v1736_v46, %s3642_s30  ;;  %1895 = vrot.lane.b32.xlu1 %v1893_v16, %s3642_s30  ;;  %v1269_v16 = vmul.f32 %v1268_v27, %v3181_v9  ;;  %v3473_v9 = vld [vmem:[#allocation2 + $0x54] sm:$0xff] }
 0x240   : > { %1464 = vrot.lane.b32.xlu0 %v1462_v4, %s3643_s22  ;;  %1751 = vrot.lane.b32.xlu1 %v1749_v1, %s3643_s22 }
 0x242   : > { %v1214_v53 = vpop.permute.xlu1 %1213  ;;  %v1207_v48 = vpop.permute.xlu0 %1206 }
 0x243   : > { %v1209_v0 = vadd.f32 %v1207_v48, %v1201_v34  ;;  %v1491_v34 = vmul.f32 %v3261_v17, %v1339_v61  ;;  %v1497_v61 = vmul.f32 %v3261_v17, %v1346_v55 }
 0x244   : > { %1906 = vrot.lane.b32.xlu0 %v1904_v54, %s3643_s22  ;;  %1470 = vrot.lane.b32.xlu1 %v1468_v59, %s3640_s29 }
 0x245   : > { %v1216_v60 = vadd.f32 %v1214_v53, %v1209_v0  ;;  %v1783_v53 = vmul.f32 %v1782_v58, %v3464_v47  ;;  %v1933_v0 = vmul.f32 %v3473_v9, %v1782_v58 }
 0x246   : > { %v1228_v26 = vpop.permute.xlu1 %1227  ;;  %v1221_v52 = vpop.permute.xlu0 %1220 }
 0x247   : > { %v1223_v37 = vadd.f32 %v1221_v52, %v1216_v60  ;;  %v1789_v60 = vstv %s2231_s17  ;;  %v1303_v52 = vmul.f32 %v1302_v56, %v3225_v35  ;;  %v1503_v35 = vmul.f32 %v3261_v17, %v1353_v22 }
 0x248   : > { %1758 = vrot.lane.b32.xlu0 %v1756_v30, %s3640_s29  ;;  %1912 = vrot.lane.b32.xlu1 %v1910_v18, %s3640_s29  ;;  %v1939_v7 = vmul.f32 %v3473_v9, %v1789_v60  ;;  %v1803_v22 = vstv %s2233_s2 }
 0x249   : > { %v1230_v29 = vadd.f32 %v1228_v26, %v1223_v37  ;;  %v1790_v37 = vmul.f32 %v1789_v60, %v3464_v47 }
 0x24a   : > { %v1248_v41 = vpop.permute.xlu1 %1247  ;;  %v1241_v62 = vpop.permute.xlu0 %1240 }
 0x24b   : > { %v1236_v36 = vadd.f32 %v1235_v14, %v1230_v29  ;;  %v1796_v14 = vstv %s3475_s18 }
 0x24c   : > { %1476 = vrot.lane.b32.xlu0 %v1474_v8, %s3641_s1  ;;  %1765 = vrot.lane.b32.xlu1 %v1763_v2, %s3641_s1  ;;  %v1797_v56 = vmul.f32 %v1796_v14, %v3464_v47 }
 0x24d   : > { %v1243_v15 = vadd.f32 %v1241_v62, %v1236_v36 }
 0x24e   : > { %v1262_v49 = vpop.permute.xlu1 %1261  ;;  %v1255_v50 = vpop.permute.xlu0 %1254 }
 0x24f   : > { %v1250_v44 = vadd.f32 %v1248_v41, %v1243_v15 }
 0x250   : > { %1918 = vrot.lane.b32.xlu0 %v1916_v12, %s3641_s1  ;;  %1482 = vrot.lane.b32.xlu1 %v1480_v51, %s3642_s30  ;;  %v1337_v51 = vmul.f32 %v1336_v45, %v3288_v6 }
 0x251   : > { %v1257_v3 = vadd.f32 %v1255_v50, %v1250_v44  ;;  %v1509_v50 = vmul.f32 %v3261_v17, %v1360_v11 }
 0x252   : > { %v1282_v10 = vpop.permute.xlu1 %1281  ;;  %v1275_v31 = vpop.permute.xlu0 %1274 }
 0x253   : > { %v1264_v46 = vadd.f32 %v1262_v49, %v1257_v3  ;;  %v1945_v49 = vmul.f32 %v3473_v9, %v1796_v14 }
 0x254   : > { %1772 = vrot.lane.b32.xlu0 %v1770_v23, %s3642_s30  ;;  %1924 = vrot.lane.b32.xlu1 %v1922_v24, %s3642_s30 }
 0x255   : > { %v1270_v39 = vadd.f32 %v1269_v16, %v1264_v46 }
 0x256   : > { %v1296_v4 = vpop.permute.xlu1 %1295  ;;  %v1289_v1 = vpop.permute.xlu0 %1288 }
 0x257   : > { %v1277_v48 = vadd.f32 %v1275_v31, %v1270_v39  ;;  %v1951_v31 = vmul.f32 %v3473_v9, %v1803_v22 }
 0x258   : > { %1493 = vrot.lane.b32.xlu0 %v1491_v34, %s3643_s22  ;;  %1785 = vrot.lane.b32.xlu1 %v1783_v53, %s3643_s22 }
 0x259   : > { %v1284_v27 = vadd.f32 %v1282_v10, %v1277_v48  ;;  %v1804_v10 = vmul.f32 %v1803_v22, %v3464_v47 }
 0x25a   : > { %v1316_v54 = vpop.permute.xlu1 %1315  ;;  %v1309_v59 = vpop.permute.xlu0 %1308 }
 0x25b   : > { %v1291_v5 = vadd.f32 %v1289_v1, %v1284_v27 }
 0x25c   : > { %1935 = vrot.lane.b32.xlu0 %v1933_v0, %s3643_s22  ;;  %1499 = vrot.lane.b32.xlu1 %v1497_v61, %s3640_s29  ;;  %s2219_s22 = sld [smem:[#allocation3 + $0x503]] }
 0x25d   : > { %v1298_v26 = vadd.f32 %v1296_v4, %v1291_v5 }
 0x25e   : > { %v1330_v30 = vpop.permute.xlu1 %1329  ;;  %v1323_v18 = vpop.permute.xlu0 %1322 }
 0x25f   : > { %v1304_v29 = vadd.f32 %v1303_v52, %v1298_v26 }
 0x260   : > { %1792 = vrot.lane.b32.xlu0 %v1790_v37, %s3640_s29  ;;  %1941 = vrot.lane.b32.xlu1 %v1939_v7, %s3640_s29  ;;  %v1677_v37 = vstv %s2214_s19  ;;  %s2224_s29 = sld [smem:[#allocation3 + $0x783]] }
 0x261   : > { %v1311_v55 = vadd.f32 %v1309_v59, %v1304_v29 }
 0x262   : > { %v1350_v41 = vpop.permute.xlu1 %1349  ;;  %v1343_v62 = vpop.permute.xlu0 %1342 }
 0x263   : > { %v1318_v8 = vadd.f32 %v1316_v54, %v1311_v55 }
 0x264   : > { %1505 = vrot.lane.b32.xlu0 %v1503_v35, %s3641_s1  ;;  %1799 = vrot.lane.b32.xlu1 %v1797_v56, %s3641_s1 }
 0x265   : > { %v1325_v2 = vadd.f32 %v1323_v18, %v1318_v8 }
 0x266   : > { %v1364_v36 = vpop.permute.xlu1 %1363  ;;  %v1357_v15 = vpop.permute.xlu0 %1356 }
 0x267   : > { %v1332_v12 = vadd.f32 %v1330_v30, %v1325_v2 }
 0x268   : > { %1947 = vrot.lane.b32.xlu0 %v1945_v49, %s3641_s1  ;;  %1511 = vrot.lane.b32.xlu1 %v1509_v50, %s3642_s30  ;;  %s2209_s1 = sld [smem:[#allocation3 + $0x3]] }
 0x269   : > { %v1338_v44 = vadd.f32 %v1337_v51, %v1332_v12 }
 0x26a   : > { %v1384_v13 = vpop.permute.xlu1 %1383  ;;  %v1378_v3 = vpop.permute.xlu0 %1377 }
 0x26b   : > { %v1345_v23 = vadd.f32 %v1343_v62, %v1338_v44  ;;  %v1380_v17 = vadd.f32 %v1378_v3, %v3247_v28  ;;  %v1678_v62 = vmul.f32 %v1677_v37, %v3352_v20 }
 0x26c   : > { %1806 = vrot.lane.b32.xlu0 %v1804_v10, %s3642_s30  ;;  %1953 = vrot.lane.b32.xlu1 %v1951_v31, %s3642_s30  ;;  %v1711_v31 = vstv %s2219_s22  ;;  %s2229_s30 = sld [smem:[#allocation3 + $0xa03]] }
 0x26d   : > { %v1352_v45 = vadd.f32 %v1350_v41, %v1345_v23  ;;  %v1386_v6 = vadd.f32 %v1384_v13, %v1380_v17 }
 0x26e   : > { %v1396_v11 = vpop.permute.xlu1 %1395  ;;  %v1390_v24 = vpop.permute.xlu0 %1389  ;;  %v1643_v54 = vstv %s2209_s1 }
 0x26f   : > { %v1359_v46 = vadd.f32 %v1357_v15, %v1352_v45  ;;  %v1392_v16 = vadd.f32 %v1390_v24, %v1386_v6  ;;  %v1644_v5 = vmul.f32 %v1643_v54, %v3324_v40  ;;  %v1815_v18 = vmul.f32 %v3338_v63, %v1643_v54 }
 0x271   : > { %v1366_v58 = vadd.f32 %v1364_v36, %v1359_v46  ;;  %v1398_v39 = vadd.f32 %v1396_v11, %v1392_v16  ;;  %v1844_v36 = vmul.f32 %v3358_v32, %v1677_v37  ;;  %v1712_v46 = vmul.f32 %v1711_v31, %v3378_v43 }
 0x272   : > { %v1413_v4 = vpop.permute.xlu1 %1412  ;;  %v1407_v1 = vpop.permute.xlu0 %1406  ;;  %v1873_v16 = vmul.f32 %v3386_v19, %v1711_v31 }
 0x273   : > { %2205 = vst.msk [vmem:[%s3646_s10 + $0x20] sm:$0xff] %vm484_vm4, %v1366_v58  ;;  %v1403_v34 = vadd.f32 %v3252_v38, %v1398_v39 }
 0x275   : > { %v1409_v28 = vadd.f32 %v1407_v1, %v1403_v34 }
 0x276   : > { %v1650_v53 = vpop.permute.xlu1 %1649  ;;  %v1419_v48 = vpop.permute.xlu0 %1418 }
 0x277   : > { %v1415_v27 = vadd.f32 %v1413_v4, %v1409_v28  ;;  %v1652_v60 = vadd.f32 %v1650_v53, %v1644_v5 }
 0x279   : > { %v1421_v59 = vadd.f32 %v1419_v48, %v1415_v27 }
 0x27a   : > { %v1657_v0 = vpop.permute.xlu1 %1656  ;;  %v1820_v61 = vpop.permute.xlu0 %1819 }
 0x27b   : > { %v1659_v30 = vadd.f32 %v1657_v0, %v1652_v60  ;;  %v1822_v7 = vadd.f32 %v1820_v61, %v1815_v18 }
 0x27e   : > { %v1664_v26 = vpop.permute.xlu1 %1663  ;;  %v1826_v52 = vpop.permute.xlu0 %1825 }
 0x27f   : > { %v1666_v38 = vadd.f32 %v1664_v26, %v1659_v30  ;;  %v1828_v55 = vadd.f32 %v1826_v52, %v1822_v7  ;;  %v1745_v30 = vstv %s2224_s29 }
 0x282   : > { %v1671_v29 = vpop.permute.xlu1 %1670  ;;  %v1832_v14 = vpop.permute.xlu0 %1831 }
 0x283   : > { %v1673_v41 = vadd.f32 %v1671_v29, %v1666_v38  ;;  %v1834_v35 = vadd.f32 %v1832_v14, %v1828_v55 }
 0x285   : > { %v1679_v56 = vadd.f32 %v1678_v62, %v1673_v41  ;;  %v1746_v41 = vmul.f32 %v1745_v30, %v3414_v25  ;;  %v1902_v62 = vmul.f32 %v3422_v21, %v1745_v30 }
 0x286   : > { %v1684_v8 = vpop.permute.xlu1 %1683  ;;  %v1838_v2 = vpop.permute.xlu0 %1837 }
 0x287   : > { %v1840_v40 = vadd.f32 %v1838_v2, %v1834_v35  ;;  %v1686_v51 = vadd.f32 %v1684_v8, %v1679_v56 }
 0x289   : > { %v1845_v15 = vadd.f32 %v1844_v36, %v1840_v40 }
 0x28a   : > { %v1691_v49 = vpop.permute.xlu1 %1690  ;;  %v1849_v50 = vpop.permute.xlu0 %1848 }
 0x28b   : > { %v1851_v22 = vadd.f32 %v1849_v50, %v1845_v15  ;;  %v1693_v3 = vadd.f32 %v1691_v49, %v1686_v51 }
 0x28e   : > { %v1698_v63 = vpop.permute.xlu1 %1697  ;;  %v1855_v12 = vpop.permute.xlu0 %1854 }
 0x28f   : > { %v1857_v10 = vadd.f32 %v1855_v12, %v1851_v22  ;;  %v1700_v23 = vadd.f32 %v1698_v63, %v1693_v3 }
 0x292   : > { %v1425_v44 = vpop.permute.xlu1 %1424  ;;  %v1861_v13 = vpop.permute.xlu0 %1860 }
 0x293   : > { %v1427_v20 = vadd.f32 %v1425_v44, %v1421_v59  ;;  %v1863_v17 = vadd.f32 %v1861_v13, %v1857_v10 }
 0x295   : > { %v1432_v45 = vadd.f32 %v3269_v57, %v1427_v20  ;;  %v1779_v20 = vstv %s2229_s30 }
 0x296   : > { %v1867_v6 = vpop.permute.xlu1 %1866  ;;  %v1705_v32 = vpop.permute.xlu0 %1704 }
 0x297   : > { %v1869_v11 = vadd.f32 %v1867_v6, %v1863_v17  ;;  %v1707_v24 = vadd.f32 %v1705_v32, %v1700_v23 }
 0x299   : > { %v1713_v58 = vadd.f32 %v1712_v46, %v1707_v24  ;;  %v1874_v39 = vadd.f32 %v1873_v16, %v1869_v11  ;;  %v1780_v24 = vmul.f32 %v1779_v20, %v3464_v47  ;;  %v1931_v46 = vmul.f32 %v3473_v9, %v1779_v20 }
 0x29a   : > { %v1718_v4 = vpop.permute.xlu1 %1717  ;;  %v1436_v1 = vpop.permute.xlu0 %1435 }
 0x29b   : > { %v1438_v27 = vadd.f32 %v1436_v1, %v1432_v45  ;;  %v1720_v0 = vadd.f32 %v1718_v4, %v1713_v58 }
 0x29e   : > { %v1442_v34 = vpop.permute.xlu1 %1441  ;;  %v1878_v28 = vpop.permute.xlu0 %1877 }
 0x29f   : > { %v1444_v59 = vadd.f32 %v1442_v34, %v1438_v27  ;;  %v1880_v61 = vadd.f32 %v1878_v28, %v1874_v39 }
 0x2a2   : > { %v1884_v53 = vpop.permute.xlu1 %1883  ;;  %v1725_v48 = vpop.permute.xlu0 %1724 }
 0x2a3   : > { %v1886_v26 = vadd.f32 %v1884_v53, %v1880_v61  ;;  %v1727_v19 = vadd.f32 %v1725_v48, %v1720_v0 }
 0x2a6   : > { %v1732_v54 = vpop.permute.xlu1 %1731  ;;  %v1448_v57 = vpop.permute.xlu0 %1447 }
 0x2a7   : > { %v1450_v5 = vadd.f32 %v1448_v57, %v1444_v59  ;;  %v1734_v18 = vadd.f32 %v1732_v54, %v1727_v19 }
 0x2aa   : > { %v1454_v60 = vpop.permute.xlu1 %1453  ;;  %v1890_v43 = vpop.permute.xlu0 %1889 }
 0x2ab   : > { %v1456_v52 = vadd.f32 %v1454_v60, %v1450_v5  ;;  %v1892_v37 = vadd.f32 %v1890_v43, %v1886_v26 }
 0x2ad   : > { %v1461_v7 = vadd.f32 %v3275_v42, %v1456_v52 }
 0x2ae   : > { %v1896_v38 = vpop.permute.xlu1 %1895  ;;  %v1739_v29 = vpop.permute.xlu0 %1738 }
 0x2af   : > { %v1898_v14 = vadd.f32 %v1896_v38, %v1892_v37  ;;  %v1741_v55 = vadd.f32 %v1739_v29, %v1734_v18 }
 0x2b1   : > { %v1747_v35 = vadd.f32 %v1746_v41, %v1741_v55  ;;  %v1903_v56 = vadd.f32 %v1902_v62, %v1898_v14 }
 0x2b2   : > { %v1752_v8 = vpop.permute.xlu1 %1751  ;;  %v1465_v2 = vpop.permute.xlu0 %1464 }
 0x2b3   : > { %v1467_v50 = vadd.f32 %v1465_v2, %v1461_v7  ;;  %v1754_v51 = vadd.f32 %v1752_v8, %v1747_v35 }
 0x2b6   : > { %v1471_v40 = vpop.permute.xlu1 %1470  ;;  %v1907_v36 = vpop.permute.xlu0 %1906 }
 0x2b7   : > { %v1473_v12 = vadd.f32 %v1471_v40, %v1467_v50  ;;  %v1909_v22 = vadd.f32 %v1907_v36, %v1903_v56 }
 0x2ba   : > { %v1913_v15 = vpop.permute.xlu1 %1912  ;;  %v1759_v49 = vpop.permute.xlu0 %1758 }
 0x2bb   : > { %v1915_v3 = vadd.f32 %v1913_v15, %v1909_v22  ;;  %v1761_v21 = vadd.f32 %v1759_v49, %v1754_v51 }
 0x2be   : > { %v1766_v63 = vpop.permute.xlu1 %1765  ;;  %v1477_v42 = vpop.permute.xlu0 %1476 }
 0x2bf   : > { %v1479_v44 = vadd.f32 %v1477_v42, %v1473_v12  ;;  %v1768_v31 = vadd.f32 %v1766_v63, %v1761_v21 }
 0x2c2   : > { %v1483_v13 = vpop.permute.xlu1 %1482  ;;  %v1919_v25 = vpop.permute.xlu0 %1918 }
 0x2c3   : > { %v1485_v10 = vadd.f32 %v1483_v13, %v1479_v44  ;;  %v1921_v23 = vadd.f32 %v1919_v25, %v1915_v3 }
 0x2c5   : > { %v1490_v17 = vadd.f32 %v3286_v33, %v1485_v10 }
 0x2c6   : > { %v1925_v45 = vpop.permute.xlu1 %1924  ;;  %v1773_v6 = vpop.permute.xlu0 %1772 }
 0x2c7   : > { %v1927_v32 = vadd.f32 %v1925_v45, %v1921_v23  ;;  %v1775_v11 = vadd.f32 %v1773_v6, %v1768_v31 }
 0x2c9   : > { %v1781_v16 = vadd.f32 %v1780_v24, %v1775_v11  ;;  %v1932_v58 = vadd.f32 %v1931_v46, %v1927_v32 }
 0x2ca   : > { %v1786_v39 = vpop.permute.xlu1 %1785  ;;  %v1494_v4 = vpop.permute.xlu0 %1493 }
 0x2cb   : > { %v1496_v33 = vadd.f32 %v1494_v4, %v1490_v17  ;;  %v1788_v57 = vadd.f32 %v1786_v39, %v1781_v16 }
 0x2ce   : > { %v1500_v1 = vpop.permute.xlu1 %1499  ;;  %v1936_v34 = vpop.permute.xlu0 %1935 }
 0x2cf   : > { %v1502_v54 = vadd.f32 %v1500_v1, %v1496_v33  ;;  %v1938_v59 = vadd.f32 %v1936_v34, %v1932_v58 }
 0x2d2   : > { %v1942_v28 = vpop.permute.xlu1 %1941  ;;  %v1793_v53 = vpop.permute.xlu0 %1792 }
 0x2d3   : > { %v1944_v61 = vadd.f32 %v1942_v28, %v1938_v59  ;;  %v1795_v5 = vadd.f32 %v1793_v53, %v1788_v57 }
 0x2d6   : > { %v1800_v48 = vpop.permute.xlu1 %1799  ;;  %v1506_v27 = vpop.permute.xlu0 %1505 }
 0x2d7   : > { %v1508_v47 = vadd.f32 %v1506_v27, %v1502_v54  ;;  %v1802_v43 = vadd.f32 %v1800_v48, %v1795_v5 }
 0x2da   : > { %v1512_v0 = vpop.permute.xlu1 %1511  ;;  %v1948_v9 = vpop.permute.xlu0 %1947 }
 0x2db   : > { %v1514_v60 = vadd.f32 %v1512_v0, %v1508_v47  ;;  %v1950_v26 = vadd.f32 %v1948_v9, %v1944_v61 }
 0x2dd   : > { %2206 = vst.msk [vmem:[%s3646_s10 + $0x28] sm:$0xff] %vm484_vm4, %v1514_v60 }
 0x2de   : > { %v1954_v19 = vpop.permute.xlu1 %1953  ;;  %v1807_v52 = vpop.permute.xlu0 %1806 }
 0x2df   : > { %v1956_v30 = vadd.f32 %v1954_v19, %v1950_v26  ;;  %v1809_v18 = vadd.f32 %v1807_v52, %v1802_v43 }
 0x2e1   : > { %2235 = vst.msk [vmem:[%s3646_s10 + $0x38] sm:$0xff] %vm484_vm4, %v1956_v30  ;;  %2234 = vst.msk [vmem:[%s3646_s10 + $0x30] sm:$0xff] %vm484_vm4, %v1809_v18 }
 0x2e2   : > { %2347 = shalt.err (!%p2344_p3)
}
 0x2e3   : > { %s2348_s6 = scalar_lea.hbm %s3536_s12, 1024  ;;  %s2352_s16 = scalar_lea.hbm %s3650_s25, 2048 }
 0x2e4   : > { %p2349_p5 = scmp.ne.s32.totalorder %s3536_s12, %s2348_s6  ;;  %p2353_p9 = scmp.lt.u32.totalorder %s3536_s12, %s3650_s25 }
 0x2e5   : > { %p2354_p12 = scmp.lt.u32.totalorder %s2352_s16, %s2348_s6  ;;  %p2356_p11 = scmp.lt.u32.totalorder %s2348_s6, %s3536_s12 }
 0x2e6   : > { %p2350_p6 = pnand %p2349_p5, %p2485_p4 }
 0x2e7   : > { %p2355_p10 = por %p2354_p12, %p2353_p9 }
 0x2e8   : > { %p2351_p7 = pneg %p2350_p6 }
 0x2e9   : > { %p2357_p13 = por %p2356_p11, %p2355_p10 }
 0x2eb   : > { %p2358_p0 = pnand %p2357_p13, %p2351_p7 }
 0x2ed   : > { %2361 = shalt.err (!%p2358_p0)
}
 0x2ee   : > { %s2428_s13 = smov 128   ;;  %s2429_s17 = smov 8  }
 0x2ef   : > { %2247 = dma.vmem_to_hbm [thread:$0]  (%p2485_p4), %s3538_s14, 1024, %s3536_s12, %s3546_s15, %s2428_s13, %s2428_s13, %s2429_s17  }
 0x2f0 PF: > { %s3652_s18 = sld [smem:[#allocation14_spill]]  ;;  %s3653_s2 = sld [smem:[#allocation9_spill]] }
 0x2f6   : > { %p2259_p1 = scmp.ge.s32.totalorder %s3652_s18, 2  ;;  %s1991_s1 = sand.u32 1, %s3653_s2  }
 0x2f7   : > { %s1992_s19 = scalar_lea.sflag [#allocation4], %s1991_s1 }
 0x2f8   : > { %p2254_p2 = pnand %p2259_p1, %p2492_p8 }
 0x2fa   : > { %2391 = dma.done.wait (!%p2254_p2), %s1992_s19, 1024  }
 0x2fb   : > { %2393 = vsyncadd (!%p2254_p2), %s1992_s19, 4294966272  ;;  %s16_s14 = sadd.s32 1, %s3652_s18   ;;  %s3655_s9 = sld [smem:[#allocation10_spill]] }
 0x2fc   : > { %p13_p3 = scmp.ge.s32.totalorder %s16_s14, 4   ;;  %s3656_s10 = sld [smem:[#allocation11_spill]] }
 0x2fd   : > { %s3657_s11 = sld [smem:[#allocation18_spill]]  ;;  %s3658_s12 = sld [smem:[#allocation13_spill]] }
 0x2fe   : > { %s3659_s13 = sld [smem:[#allocation15_spill]]  ;;  %15 = sbr.rel (!%p13_p3) target bundleno = 9 (0x9), region = 120 }
 0x305   :  { %1997 = vsyncpa [#allocation4], 1 }
 0x306   :  { %1999 = vsyncpa [#allocation4 + $0x1], 1 }
 0x307   :  { %2000 = vsyncpa [#allocation5], 1 }
 0x308   :  { %2002 = vsyncpa [#allocation5 + $0x1], 1 }

</bundles_post_ra>
